<compile_context>
chip_gen: v7x
topology: tpu7x:2x2x1
jax: 0.10.0
libtpu: 0.0.40
codegen_flags: <defaults>
</compile_context>

<pallas_src>
import math

import jax
import jax.numpy as jnp
from jax import lax
from jax.experimental import pallas as pl
from jax.experimental.pallas import tpu as pltpu

# ----- config mirroring StyleCLIP opts / module __init__ -----
LATENT_DIM = 512
N_LATENTS = 18          # W+ latents
N_LAYERS = 4            # Mapper = PixelNorm + 4x EqualLinear
LR_MUL = 0.01
NEG_SLOPE = 0.2
FLRELU_SCALE = 2.0 ** 0.5
POOL_OUT = 256          # face_pool = AdaptiveAvgPool2d((256, 256))
IMG_C, IMG_H, IMG_W = 3, 512, 512

# Right-sized VMEM request (actual use ~5-15 MiB). 64 MiB would equal the entire
# per-TensorCore VMEM on v7x; 32 MiB leaves headroom on every generation.
VMEM_LIMIT_BYTES = 32 << 20


# -------------------------------------------------------------------------
# Mapper kernel: PixelNorm + 4x (EqualLinear + fused_leaky_relu)
# -------------------------------------------------------------------------
def make_mapper_kernel(n_real, n_layers):
    """n_real: true latent count (18); the latent axis is zero-padded to a
    multiple of 8 so the (BB, NP, D) -> (BB*NP, D) flatten is tile-aligned."""

    def mapper_kernel(x_ref, wt_ref, b_ref, o_ref):
        x = x_ref[...]                                          # (BB, NP, D) f32
        # PixelNorm over the latent axis (torch PixelNorm(dim=1) on (B, 18, 512)).
        # Padded rows are exactly zero, so divide by the real latent count.
        mean_sq = jnp.sum(x * x, axis=1, keepdims=True) / float(n_real)
        y = x * lax.rsqrt(mean_sq + 1e-8)
        bb, npad, d = y.shape
        y = y.reshape(bb * npad, d)                             # big MXU M
        for i in range(n_layers):                               # static unroll
            # bf16 x bf16 -> f32 accumulate: single native MXU pass
            # (replaces the former f32 HIGHEST ~6-pass emulation).
            z = jnp.dot(y.astype(jnp.bfloat16), wt_ref[i],
                        preferred_element_type=jnp.float32) + b_ref[i]
            # fused_leaky_relu(out, bias*lr_mul): leaky_relu(., 0.2) * sqrt(2)
            y = jnp.where(z >= 0.0, z, NEG_SLOPE * z) * FLRELU_SCALE
        o_ref[...] = y.reshape(bb, npad, d)

    return mapper_kernel


def run_mapper(x, w, bias, batch_block=None):
    """x: (B, N, D); w: (L, D, D) torch-style (out, in); bias: (L, D)."""
    x = x.astype(jnp.float32)
    B, N, D = x.shape
    L = w.shape[0]
    NP = ((N + 7) // 8) * 8                              # 18 -> 24 (sublane aligned)
    if NP != N:
        x = jnp.pad(x, ((0, 0), (0, NP - N), (0, 0)))    # zero rows, stripped below

    scale = (1.0 / math.sqrt(D)) * LR_MUL
    # Pre-scaled, transposed, and cast to bf16: halves the dominant weight DMA
    # (the mapper is weight-bandwidth bound) and halves resident weight VMEM.
    wt = (jnp.transpose(w, (0, 2, 1)).astype(jnp.float32) * scale).astype(jnp.bfloat16)
    b_eff = (bias.astype(jnp.float32) * LR_MUL)[:, None, :]          # (L, 1, D)

    bb = batch_block if batch_block is not None else min(B, 8)
    grid = (pl.cdiv(B, bb),)                             # (1,) for small B: weights
    #                                                      DMA'd once, no per-b steps
    out = pl.pallas_call(
        make_mapper_kernel(N, L),
        out_shape=jax.ShapeDtypeStruct((B, NP, D), jnp.float32),
        grid_spec=pltpu.PrefetchScalarGridSpec(
            num_scalar_prefetch=0,
            grid=grid,
            in_specs=[
                pl.BlockSpec((bb, NP, D), lambda i: (i, 0, 0)),
                pl.BlockSpec((L, D, D), lambda i: (0, 0, 0)),
                pl.BlockSpec((L, 1, D), lambda i: (0, 0, 0)),
            ],
            out_specs=pl.BlockSpec((bb, NP, D), lambda i: (i, 0, 0)),
        ),
        compiler_params=pltpu.CompilerParams(
            # batch axis has no cross-step dependence -> megacore-shardable on v7x
            dimension_semantics=("parallel",),
            vmem_limit_bytes=VMEM_LIMIT_BYTES),
    )(x, wt, b_eff)
    return out[:, :N, :]


# -------------------------------------------------------------------------
# face_pool kernel: AdaptiveAvgPool2d((256, 256)) via MXU matmuls
#   lane (W) pool: one (C*H, W) @ (W, 256) matmul for all channels (big M)
#   sublane (H) pool: per-channel (256, H) @ (H, 256)
# -------------------------------------------------------------------------
def facepool_kernel(ar_ref, act_ref, img_ref, o_ref):
    _, c, h, w = img_ref.shape
    img = img_ref[0].reshape(c * h, w)                           # tile-aligned merge
    # HIGH (bf16_3x) keeps the exact-average semantics to ~1e-5 while being
    # ~2x cheaper than HIGHEST's ~6-pass emulation.
    t = jnp.dot(img, act_ref[...], preferred_element_type=jnp.float32,
                precision=lax.Precision.HIGH)                    # (C*H, 256)
    for ci in range(c):                                          # static unroll, C small
        o_ref[0, ci] = jnp.dot(ar_ref[...], t[ci * h:(ci + 1) * h, :],
                               preferred_element_type=jnp.float32,
                               precision=lax.Precision.HIGH)     # (256, 256)


def avg_pool_matrix(n_in, n_out):
    assert n_in % n_out == 0, "adaptive pool implemented for evenly dividing sizes"
    f = n_in // n_out
    rows = jnp.repeat(jnp.arange(n_out), f)
    return jnp.zeros((n_out, n_in), jnp.float32).at[rows, jnp.arange(n_in)].set(1.0 / f)


def run_face_pool(images):
    B, C, H, W = images.shape
    assert H % POOL_OUT == 0 and W % POOL_OUT == 0
    a_r = avg_pool_matrix(H, POOL_OUT)                   # (256, H)
    a_ct = avg_pool_matrix(W, POOL_OUT).T                # (W, 256)
    return pl.pallas_call(
        facepool_kernel,
        out_shape=jax.ShapeDtypeStruct((B, C, POOL_OUT, POOL_OUT), jnp.float32),
        grid_spec=pltpu.PrefetchScalarGridSpec(
            num_scalar_prefetch=0,
            grid=(B,),                                   # all channels per step
            in_specs=[
                pl.BlockSpec((POOL_OUT, H), lambda b: (0, 0)),
                pl.BlockSpec((W, POOL_OUT), lambda b: (0, 0)),
                pl.BlockSpec((1, C, H, W), lambda b: (b, 0, 0, 0)),
            ],
            out_specs=pl.BlockSpec((1, C, POOL_OUT, POOL_OUT),
                                   lambda b: (b, 0, 0, 0)),
        ),
        compiler_params=pltpu.CompilerParams(
            dimension_semantics=("parallel",),
            vmem_limit_bytes=VMEM_LIMIT_BYTES),
    )(a_r, a_ct, images.astype(jnp.float32))


# -------------------------------------------------------------------------
# Decoder stand-in + full forward
# -------------------------------------------------------------------------
def standin_synthesis(codes, proj, H=IMG_H, W=IMG_W):
    # TODO(synk): the real decoder is an external StyleGAN2 generator injected via
    # set_G() (not defined in this module); replaced by a deterministic stand-in.
    s = jnp.tanh(jnp.mean(codes, axis=1) @ proj)             # (B, C)
    hh = jnp.linspace(-1.0, 1.0, H)
    ww = jnp.linspace(-1.0, 1.0, W)
    pattern = hh[:, None] * ww[None, :] + 1.0                # (H, W)
    return s[:, :, None, None] * pattern[None, None, :, :]   # (B, C, H, W)


def styleclip_mapper_forward(x, params, resize=True, latent_mask=None,
                             input_code=False, inject_latent=None, alpha=None):
    codes = x if input_code else run_mapper(x, params["w"], params["b"])
    if latent_mask is not None:
        mask = jnp.zeros((codes.shape[1],), bool).at[jnp.asarray(latent_mask)].set(True)
        if inject_latent is not None:
            mixed = (inject_latent if alpha is None
                     else alpha * inject_latent + (1.0 - alpha) * codes)
            codes = jnp.where(mask[None, :, None], mixed, codes)
        else:
            codes = jnp.where(mask[None, :, None], 0.0, codes)
    images = standin_synthesis(codes, params["proj"])
    if resize:
        images = run_face_pool(images)
    return images


# -------------------------------------------------------------------------
# Pure-JAX references (correctness check)
# -------------------------------------------------------------------------
def mapper_ref(x, w, bias):
    D = x.shape[-1]
    scale = (1.0 / math.sqrt(D)) * LR_MUL
    y = x * lax.rsqrt(jnp.mean(x * x, axis=1, keepdims=True) + 1e-8)
    for i in range(N_LAYERS):
        z = jnp.einsum("bnd,od->bno", y, w[i] * scale,
                       precision=lax.Precision.HIGHEST) + bias[i] * LR_MUL
        y = jnp.where(z >= 0.0, z, NEG_SLOPE * z) * FLRELU_SCALE
    return y


def pool_ref(img):
    B, C, H, W = img.shape
    return img.reshape(B, C, POOL_OUT, H // POOL_OUT,
                       POOL_OUT, W // POOL_OUT).mean(axis=(3, 5))


if __name__ == "__main__":
    key = jax.random.PRNGKey(0)
    kx, kw, kp = jax.random.split(key, 3)
    B = 2

    x = jax.random.normal(kx, (B, N_LATENTS, LATENT_DIM), jnp.float32)
    # EqualLinear init: weight = randn(out, in) / lr_mul, bias = zeros (bias_init=0)
    w = jax.random.normal(kw, (N_LAYERS, LATENT_DIM, LATENT_DIM), jnp.float32) / LR_MUL
    bias = jnp.zeros((N_LAYERS, LATENT_DIM), jnp.float32)
    proj = 0.05 * jax.random.normal(kp, (LATENT_DIM, IMG_C), jnp.float32)
    params = {"w": w, "b": bias, "proj": proj}

    # Full forward (mapper -> stand-in synthesis -> face_pool), default args.
    images = styleclip_mapper_forward(x, params, resize=True)
    images = jax.block_until_ready(images)
    assert images.shape == (B, IMG_C, POOL_OUT, POOL_OUT)

    # Pallas mapper vs exact f32 reference. Tolerance reflects the intentional
    # bf16 weight cast + single-pass bf16 MXU (measured error ~1e-2 worst-case).
    codes_pl = jax.block_until_ready(run_mapper(x, w, bias))
    codes_rf = mapper_ref(x, w, bias)
    assert codes_pl.shape == codes_rf.shape
    assert jnp.allclose(codes_pl, codes_rf, rtol=5e-2, atol=5e-2), "mapper mismatch"

    # Pallas face_pool vs exact f32 reference (HIGH = bf16_3x, error ~1e-5).
    imgs_full = standin_synthesis(codes_pl, proj)
    pooled_pl = jax.block_until_ready(run_face_pool(imgs_full))
    pooled_rf = pool_ref(imgs_full)
    assert jnp.allclose(pooled_pl, pooled_rf, rtol=1e-3, atol=1e-3), "face_pool mismatch"

    print("KERNEL_OK")
</pallas_src>

<mosaic_0001>
module attributes {stable_mosaic.version = 11 : i64} {
  func.func @mapper_kernel(%arg0: i32, %arg1: memref<2x24x512xf32, #tpu.memory_space<vmem>>, %arg2: memref<4x512x512xbf16, #tpu.memory_space<vmem>>, %arg3: memref<4x1x512xf32, #tpu.memory_space<vmem>>, %arg4: memref<2x24x512xf32, #tpu.memory_space<vmem>>) attributes {dimension_semantics = [#tpu.dimension_semantics<parallel>], iteration_bounds = array<i64: 1>, scalar_prefetch = 0 : i64, scratch_operands = 0 : i64, tpu.core_type = #tpu.core_type<tc>, window_params = [{transform_indices = @transform_0, window_bounds = array<i64: 2, 24, 512>}, {pipeline_mode = #tpu.pipeline_mode<synchronous>, transform_indices = @transform_1, window_bounds = array<i64: 4, 512, 512>}, {pipeline_mode = #tpu.pipeline_mode<synchronous>, transform_indices = @transform_2, window_bounds = array<i64: 4, 1, 512>}, {transform_indices = @transform_3, window_bounds = array<i64: 2, 24, 512>}]} {
    %c0 = arith.constant 0 : index
    %c0_0 = arith.constant 0 : index
    %c0_1 = arith.constant 0 : index
    %0 = vector.load %arg1[%c0, %c0_0, %c0_1] : memref<2x24x512xf32, #tpu.memory_space<vmem>>, vector<2x24x512xf32>
    %1 = arith.mulf %0, %0 : vector<2x24x512xf32>
    %cst = arith.constant dense<0.000000e+00> : vector<2x512xf32>
    %2 = vector.multi_reduction <add>, %1, %cst [1] : vector<2x24x512xf32> to vector<2x512xf32>
    %3 = vector.shape_cast %2 : vector<2x512xf32> to vector<2x1x512xf32>
    %cst_2 = arith.constant 1.800000e+01 : f32
    %4 = vector.broadcast %cst_2 : f32 to vector<2x1x512xf32>
    %5 = arith.divf %3, %4 : vector<2x1x512xf32>
    %cst_3 = arith.constant 9.99999993E-9 : f32
    %6 = vector.broadcast %cst_3 : f32 to vector<2x1x512xf32>
    %7 = arith.addf %5, %6 : vector<2x1x512xf32>
    %8 = math.rsqrt %7 : vector<2x1x512xf32>
    %9 = vector.broadcast %8 : vector<2x1x512xf32> to vector<2x24x512xf32>
    %10 = arith.mulf %0, %9 : vector<2x24x512xf32>
    %11 = vector.shape_cast %10 : vector<2x24x512xf32> to vector<48x512xf32>
    %12 = arith.truncf %11 : vector<48x512xf32> to vector<48x512xbf16>
    %c0_4 = arith.constant 0 : index
    %c0_5 = arith.constant 0 : index
    %c0_6 = arith.constant 0 : index
    %13 = vector.load %arg2[%c0_4, %c0_5, %c0_6] : memref<4x512x512xbf16, #tpu.memory_space<vmem>>, vector<1x512x512xbf16>
    %14 = vector.shape_cast %13 : vector<1x512x512xbf16> to vector<512x512xbf16>
    %cst_7 = arith.constant dense<0.000000e+00> : vector<48x512xf32>
    %15 = tpu.matmul %12, %14, %cst_7 {dimension_numbers = #tpu.dot_dimension_numbers<[1], [0], [0], [1], [0, 0, 1, 1], [], []>} : vector<48x512xbf16>, vector<512x512xbf16>, vector<48x512xf32> -> vector<48x512xf32>
    %c0_8 = arith.constant 0 : index
    %c0_9 = arith.constant 0 : index
    %c0_10 = arith.constant 0 : index
    %16 = vector.load %arg3[%c0_8, %c0_9, %c0_10] : memref<4x1x512xf32, #tpu.memory_space<vmem>>, vector<1x1x512xf32>
    %17 = vector.shape_cast %16 : vector<1x1x512xf32> to vector<1x512xf32>
    %18 = vector.broadcast %17 : vector<1x512xf32> to vector<48x512xf32>
    %19 = arith.addf %15, %18 : vector<48x512xf32>
    %cst_11 = arith.constant 0.000000e+00 : f32
    %20 = vector.broadcast %cst_11 : f32 to vector<48x512xf32>
    %21 = arith.cmpf oge, %19, %20 : vector<48x512xf32>
    %cst_12 = arith.constant 2.000000e-01 : f32
    %22 = vector.broadcast %cst_12 : f32 to vector<48x512xf32>
    %23 = arith.mulf %22, %19 : vector<48x512xf32>
    %24 = arith.select %21, %19, %23 : vector<48x512xi1>, vector<48x512xf32>
    %cst_13 = arith.constant 1.41421354 : f32
    %25 = vector.broadcast %cst_13 : f32 to vector<48x512xf32>
    %26 = arith.mulf %24, %25 : vector<48x512xf32>
    %27 = arith.truncf %26 : vector<48x512xf32> to vector<48x512xbf16>
    %c1 = arith.constant 1 : index
    %c0_14 = arith.constant 0 : index
    %c0_15 = arith.constant 0 : index
    %28 = vector.load %arg2[%c1, %c0_14, %c0_15] : memref<4x512x512xbf16, #tpu.memory_space<vmem>>, vector<1x512x512xbf16>
    %29 = vector.shape_cast %28 : vector<1x512x512xbf16> to vector<512x512xbf16>
    %cst_16 = arith.constant dense<0.000000e+00> : vector<48x512xf32>
    %30 = tpu.matmul %27, %29, %cst_16 {dimension_numbers = #tpu.dot_dimension_numbers<[1], [0], [0], [1], [0, 0, 1, 1], [], []>} : vector<48x512xbf16>, vector<512x512xbf16>, vector<48x512xf32> -> vector<48x512xf32>
    %c1_17 = arith.constant 1 : index
    %c0_18 = arith.constant 0 : index
    %c0_19 = arith.constant 0 : index
    %31 = vector.load %arg3[%c1_17, %c0_18, %c0_19] : memref<4x1x512xf32, #tpu.memory_space<vmem>>, vector<1x1x512xf32>
    %32 = vector.shape_cast %31 : vector<1x1x512xf32> to vector<1x512xf32>
    %33 = vector.broadcast %32 : vector<1x512xf32> to vector<48x512xf32>
    %34 = arith.addf %30, %33 : vector<48x512xf32>
    %cst_20 = arith.constant 0.000000e+00 : f32
    %35 = vector.broadcast %cst_20 : f32 to vector<48x512xf32>
    %36 = arith.cmpf oge, %34, %35 : vector<48x512xf32>
    %cst_21 = arith.constant 2.000000e-01 : f32
    %37 = vector.broadcast %cst_21 : f32 to vector<48x512xf32>
    %38 = arith.mulf %37, %34 : vector<48x512xf32>
    %39 = arith.select %36, %34, %38 : vector<48x512xi1>, vector<48x512xf32>
    %cst_22 = arith.constant 1.41421354 : f32
    %40 = vector.broadcast %cst_22 : f32 to vector<48x512xf32>
    %41 = arith.mulf %39, %40 : vector<48x512xf32>
    %42 = arith.truncf %41 : vector<48x512xf32> to vector<48x512xbf16>
    %c2 = arith.constant 2 : index
    %c0_23 = arith.constant 0 : index
    %c0_24 = arith.constant 0 : index
    %43 = vector.load %arg2[%c2, %c0_23, %c0_24] : memref<4x512x512xbf16, #tpu.memory_space<vmem>>, vector<1x512x512xbf16>
    %44 = vector.shape_cast %43 : vector<1x512x512xbf16> to vector<512x512xbf16>
    %cst_25 = arith.constant dense<0.000000e+00> : vector<48x512xf32>
    %45 = tpu.matmul %42, %44, %cst_25 {dimension_numbers = #tpu.dot_dimension_numbers<[1], [0], [0], [1], [0, 0, 1, 1], [], []>} : vector<48x512xbf16>, vector<512x512xbf16>, vector<48x512xf32> -> vector<48x512xf32>
    %c2_26 = arith.constant 2 : index
    %c0_27 = arith.constant 0 : index
    %c0_28 = arith.constant 0 : index
    %46 = vector.load %arg3[%c2_26, %c0_27, %c0_28] : memref<4x1x512xf32, #tpu.memory_space<vmem>>, vector<1x1x512xf32>
    %47 = vector.shape_cast %46 : vector<1x1x512xf32> to vector<1x512xf32>
    %48 = vector.broadcast %47 : vector<1x512xf32> to vector<48x512xf32>
    %49 = arith.addf %45, %48 : vector<48x512xf32>
    %cst_29 = arith.constant 0.000000e+00 : f32
    %50 = vector.broadcast %cst_29 : f32 to vector<48x512xf32>
    %51 = arith.cmpf oge, %49, %50 : vector<48x512xf32>
    %cst_30 = arith.constant 2.000000e-01 : f32
    %52 = vector.broadcast %cst_30 : f32 to vector<48x512xf32>
    %53 = arith.mulf %52, %49 : vector<48x512xf32>
    %54 = arith.select %51, %49, %53 : vector<48x512xi1>, vector<48x512xf32>
    %cst_31 = arith.constant 1.41421354 : f32
    %55 = vector.broadcast %cst_31 : f32 to vector<48x512xf32>
    %56 = arith.mulf %54, %55 : vector<48x512xf32>
    %57 = arith.truncf %56 : vector<48x512xf32> to vector<48x512xbf16>
    %c3 = arith.constant 3 : index
    %c0_32 = arith.constant 0 : index
    %c0_33 = arith.constant 0 : index
    %58 = vector.load %arg2[%c3, %c0_32, %c0_33] : memref<4x512x512xbf16, #tpu.memory_space<vmem>>, vector<1x512x512xbf16>
    %59 = vector.shape_cast %58 : vector<1x512x512xbf16> to vector<512x512xbf16>
    %cst_34 = arith.constant dense<0.000000e+00> : vector<48x512xf32>
    %60 = tpu.matmul %57, %59, %cst_34 {dimension_numbers = #tpu.dot_dimension_numbers<[1], [0], [0], [1], [0, 0, 1, 1], [], []>} : vector<48x512xbf16>, vector<512x512xbf16>, vector<48x512xf32> -> vector<48x512xf32>
    %c3_35 = arith.constant 3 : index
    %c0_36 = arith.constant 0 : index
    %c0_37 = arith.constant 0 : index
    %61 = vector.load %arg3[%c3_35, %c0_36, %c0_37] : memref<4x1x512xf32, #tpu.memory_space<vmem>>, vector<1x1x512xf32>
    %62 = vector.shape_cast %61 : vector<1x1x512xf32> to vector<1x512xf32>
    %63 = vector.broadcast %62 : vector<1x512xf32> to vector<48x512xf32>
    %64 = arith.addf %60, %63 : vector<48x512xf32>
    %cst_38 = arith.constant 0.000000e+00 : f32
    %65 = vector.broadcast %cst_38 : f32 to vector<48x512xf32>
    %66 = arith.cmpf oge, %64, %65 : vector<48x512xf32>
    %cst_39 = arith.constant 2.000000e-01 : f32
    %67 = vector.broadcast %cst_39 : f32 to vector<48x512xf32>
    %68 = arith.mulf %67, %64 : vector<48x512xf32>
    %69 = arith.select %66, %64, %68 : vector<48x512xi1>, vector<48x512xf32>
    %cst_40 = arith.constant 1.41421354 : f32
    %70 = vector.broadcast %cst_40 : f32 to vector<48x512xf32>
    %71 = arith.mulf %69, %70 : vector<48x512xf32>
    %72 = vector.shape_cast %71 : vector<48x512xf32> to vector<2x24x512xf32>
    %c0_41 = arith.constant 0 : index
    %c0_42 = arith.constant 0 : index
    %c0_43 = arith.constant 0 : index
    %73 = vector.load %arg4[%c0_41, %c0_42, %c0_43] : memref<2x24x512xf32, #tpu.memory_space<vmem>>, vector<2x24x512xf32>
    tpu.vector_store %arg4[%c0_41, %c0_42, %c0_43], %72 {strides = array<i32>} : memref<2x24x512xf32, #tpu.memory_space<vmem>>, vector<2x24x512xf32>,
    return
  }
  func.func @transform_0(%arg0: i32) -> (i32, i32, i32) {
    %c0_i32 = arith.constant 0 : i32
    %c0_i32_0 = arith.constant 0 : i32
    %c0_i32_1 = arith.constant 0 : i32
    return %arg0, %c0_i32, %c0_i32_0 : i32, i32, i32
  }
  func.func @transform_1(%arg0: i32) -> (i32, i32, i32) {
    %c0_i32 = arith.constant 0 : i32
    %c0_i32_0 = arith.constant 0 : i32
    %c0_i32_1 = arith.constant 0 : i32
    %c0_i32_2 = arith.constant 0 : i32
    return %c0_i32, %c0_i32_0, %c0_i32_1 : i32, i32, i32
  }
  func.func @transform_2(%arg0: i32) -> (i32, i32, i32) {
    %c0_i32 = arith.constant 0 : i32
    %c0_i32_0 = arith.constant 0 : i32
    %c0_i32_1 = arith.constant 0 : i32
    %c0_i32_2 = arith.constant 0 : i32
    return %c0_i32, %c0_i32_0, %c0_i32_1 : i32, i32, i32
  }
  func.func @transform_3(%arg0: i32) -> (i32, i32, i32) {
    %c0_i32 = arith.constant 0 : i32
    %c0_i32_0 = arith.constant 0 : i32
    %c0_i32_1 = arith.constant 0 : i32
    return %arg0, %c0_i32, %c0_i32_0 : i32, i32, i32
  }
}

</mosaic_0001>

<bundles_post_ra>
// kernel: tpu_custom_call.1
= control target key start
LH: loop header
LB: loop body
LE: loop exit
PB: predicated region body
PF: predicated region fallthrough
CT: control target
= control target key end

     0   :  { %8 = vsyncpa [#allocation3], 0  ;;  %s6977_s0 = inlined_call_operand.hbm [shape: f32[2,24,512], index: 0, kind: input, shape index: {}]   ;;  %s6978_s1 = inlined_call_operand.hbm [shape: bf16[4,512,512], index: 1, kind: input, shape index: {}]   ;;  %s6979_s2 = inlined_call_operand.hbm [shape: f32[4,1,512], index: 2, kind: input, shape index: {}]   ;;  %s6980_s3 = inlined_call_operand.hbm [shape: f32[2,24,512], index: 3, kind: output, shape index: {}]  }
   0x1   :  { %9 = vsyncpa [#allocation6], 0 }
   0x2   :  { %10 = vsyncpa [#allocation4], 0  ;;  %s6457_s12 = smov [#allocation5]   ;;  %s6363_s16 = scalar_lea.hbm %s6978_s1, 65536 }
   0x3   :  { %s28_s13 = sshll.u32 %s6457_s12, 4  ;;  %p6364_p0 = scmp.ne.s32.totalorder %s6978_s1, %s6363_s16  ;;  %s29_s13 = int_to_ptr.vmem [resolvable:$true] %s28_s13 }
   0x4   :  { %p6367_p1 = scmp.lt.u32.totalorder %s6363_s16, %s6978_s1 }
   0x6   :  { %p6369_p2 = pnand %p6367_p1, %p6364_p0 }
   0x8   :  { %6372 = shalt.err (!%p6369_p2)
}
   0x9   :  { %s6373_s21 = scalar_lea.vmem %s29_s13, 65536  ;;  %p6378_p4 = scmp.lt.s32.totalorder %s29_s13, %s29_s13 }
   0xa   :  { %p6374_p3 = scmp.ne.s32.totalorder %s29_s13, %s6373_s21  ;;  %p6379_p5 = scmp.lt.s32.totalorder %s6373_s21, %s6373_s21 }
   0xc   :  { %p6380_p6 = por %p6379_p5, %p6378_p4 }
   0xe   :  { %p6381_p7 = pnand %p6380_p6, %p6374_p3 }
  0x10   :  { %6384 = shalt.err (!%p6381_p7)
}
  0x11   :  { %s6458_s22 = smov 256   ;;  %s6459_s23 = smov 16  }
  0x12   :  { %34 = dma.hbm_to_vmem [thread:$0]  %s6978_s1, 65536, %s29_s13, [#allocation6], %s6458_s22, %s6458_s22, %s6459_s23  }
  0x13   :  { %s6460_s26 = smov [#allocation2]   ;;  %s6385_s30 = scalar_lea.hbm %s6977_s0, 3072 }
  0x14   :  { %s16_s27 = sshll.u32 %s6460_s26, 4  ;;  %p6386_p8 = scmp.ne.s32.totalorder %s6977_s0, %s6385_s30  ;;  %s17_s27 = int_to_ptr.vmem [resolvable:$true] %s16_s27 }
  0x15   :  { %p6389_p9 = scmp.lt.u32.totalorder %s6385_s30, %s6977_s0 }
  0x17   :  { %p6391_p10 = pnand %p6389_p9, %p6386_p8 }
  0x19   :  { %6394 = shalt.err (!%p6391_p10)
}
  0x1a   :  { %s6395_s8 = scalar_lea.vmem %s17_s27, 3072  ;;  %p6400_p12 = scmp.lt.s32.totalorder %s17_s27, %s17_s27 }
  0x1b   :  { %p6396_p11 = scmp.ne.s32.totalorder %s17_s27, %s6395_s8  ;;  %p6401_p13 = scmp.lt.s32.totalorder %s6395_s8, %s6395_s8 }
  0x1d   :  { %p6402_p0 = por %p6401_p13, %p6400_p12 }
  0x1f   :  { %p6403_p1 = pnand %p6402_p0, %p6396_p11 }
  0x21   :  { %6406 = shalt.err (!%p6403_p1)
}
  0x22   :  { %s6461_s1 = smov 512   ;;  %s6462_s9 = smov 32  }
  0x23   :  { %22 = dma.hbm_to_vmem [thread:$0]  %s6977_s0, 3072, %s17_s27, [#allocation3], %s6461_s1, %s6461_s1, %s6462_s9  }
  0x24   :  { %s6463_s12 = smov [#allocation7]   ;;  %s6407_s16 = scalar_lea.hbm %s6979_s2, 256 }
  0x25   :  { %s40_s13 = sshll.u32 %s6463_s12, 4  ;;  %p6408_p2 = scmp.ne.s32.totalorder %s6979_s2, %s6407_s16  ;;  %s41_s13 = int_to_ptr.vmem [resolvable:$true] %s40_s13 }
  0x26   :  { %p6411_p3 = scmp.lt.u32.totalorder %s6407_s16, %s6979_s2 }
  0x28   :  { %p6413_p4 = pnand %p6411_p3, %p6408_p2 }
  0x2a   :  { %6416 = shalt.err (!%p6413_p4)
}
  0x2b   :  { %s6417_s21 = scalar_lea.vmem %s41_s13, 256  ;;  %p6422_p6 = scmp.lt.s32.totalorder %s41_s13, %s41_s13 }
  0x2c   :  { %p6418_p5 = scmp.ne.s32.totalorder %s41_s13, %s6417_s21  ;;  %p6423_p7 = scmp.lt.s32.totalorder %s6417_s21, %s6417_s21 }
  0x2e   :  { %p6424_p8 = por %p6423_p7, %p6422_p6 }
  0x30   :  { %p6425_p9 = pnand %p6424_p8, %p6418_p5 }
  0x32   :  { %6428 = shalt.err (!%p6425_p9)
}
  0x33   :  { %s6464_s0 = smov 64   ;;  %s6465_s22 = smov 4  }
  0x34   :  { %46 = dma.hbm_to_vmem [thread:$0]  %s6979_s2, 256, %s41_s13, [#allocation6], %s6464_s0, %s6464_s0, %s6465_s22  }
  0x35   :  { %6451 = dma.done.wait [#allocation3], 3072  }
  0x36   :  { %6452 = vsyncadd [#allocation3], 4294964224 }
  0x37   :  { %6453 = dma.done.wait [#allocation6], 65792  }
  0x38   :  { %6454 = vsyncadd [#allocation6], 4294901504  ;;  %v5579_v0 = vld [vmem:[#allocation5 + $0x4] ss:$16 sps:$4 sm:$0xff]   ;;  %v5581_v1 = vld [vmem:[#allocation5 + $0xc] ss:$16 sps:$4 sm:$0xff]  }
  0x39   :  { %1019 = vmatprep.subr.bf16.mxu0 %v5579_v0  ;;  %v5583_v2 = vld [vmem:[#allocation5] ss:$16 sps:$4 sm:$0xff]   ;;  %v5584_v3 = vld [vmem:[#allocation5 + $0x8] ss:$16 sps:$4 sm:$0xff]   ;;  %1145 = vmatprep.subr.bf16.mxu1 %v5581_v1  ;;  %v5585_v4 = vld [vmem:[#allocation5 + $0x24] ss:$16 sps:$4 sm:$0xff]  }
  0x3a   :  { %1020 = vmatpush1.bf16.msra.mxu0 %v5583_v2  ;;  %1146 = vmatpush1.bf16.msra.mxu1 %v5584_v3  ;;  %v5587_v5 = vld [vmem:[#allocation5 + $0x2c] ss:$16 sps:$4 sm:$0xff]   ;;  %v5589_v6 = vld [vmem:[#allocation5 + $0x20] ss:$16 sps:$4 sm:$0xff]   ;;  %v5590_v7 = vld [vmem:[#allocation5 + $0x28] ss:$16 sps:$4 sm:$0xff]  }
  0x3b   :  { %1021 = vmatprep.subr.bf16.mxu0 %v5585_v4  ;;  %1147 = vmatprep.subr.bf16.mxu1 %v5587_v5  ;;  %v5591_v8 = vld [vmem:[#allocation5 + $0x44] ss:$16 sps:$4 sm:$0xff]   ;;  %v5593_v9 = vld [vmem:[#allocation5 + $0x4c] ss:$16 sps:$4 sm:$0xff]   ;;  %v5595_v10 = vld [vmem:[#allocation5 + $0x40] ss:$16 sps:$4 sm:$0xff]  }
  0x3c   :  { %v5596_v11 = vld [vmem:[#allocation5 + $0x48] ss:$16 sps:$4 sm:$0xff]   ;;  %v5597_v12 = vld [vmem:[#allocation5 + $0x64] ss:$16 sps:$4 sm:$0xff]   ;;  %v5599_v13 = vld [vmem:[#allocation5 + $0x6c] ss:$16 sps:$4 sm:$0xff]  }
  0x3d   :  { %v5601_v14 = vld [vmem:[#allocation5 + $0x60] ss:$16 sps:$4 sm:$0xff]   ;;  %v5602_v15 = vld [vmem:[#allocation5 + $0x68] ss:$16 sps:$4 sm:$0xff]   ;;  %v5603_v16 = vld [vmem:[#allocation5 + $0x84] ss:$16 sps:$4 sm:$0xff]  }
  0x3e   :  { %1022 = vmatpush1.bf16.msra.mxu0 %v5589_v6  ;;  %1148 = vmatpush1.bf16.msra.mxu1 %v5590_v7  ;;  %v5605_v17 = vld [vmem:[#allocation5 + $0x8c] ss:$16 sps:$4 sm:$0xff]   ;;  %v5607_v18 = vld [vmem:[#allocation5 + $0x80] ss:$16 sps:$4 sm:$0xff]   ;;  %v5608_v19 = vld [vmem:[#allocation5 + $0x88] ss:$16 sps:$4 sm:$0xff]  }
  0x3f   :  { %1023 = vmatprep.subr.bf16.mxu0 %v5591_v8  ;;  %1149 = vmatprep.subr.bf16.mxu1 %v5593_v9  ;;  %v5609_v20 = vld [vmem:[#allocation5 + $0xa4] ss:$16 sps:$4 sm:$0xff]   ;;  %v5611_v21 = vld [vmem:[#allocation5 + $0xac] ss:$16 sps:$4 sm:$0xff]   ;;  %v5613_v22 = vld [vmem:[#allocation5 + $0xa0] ss:$16 sps:$4 sm:$0xff]  }
  0x40   :  { %v5614_v23 = vld [vmem:[#allocation5 + $0xa8] ss:$16 sps:$4 sm:$0xff]   ;;  %v5615_v24 = vld [vmem:[#allocation5 + $0xc4] ss:$16 sps:$4 sm:$0xff]   ;;  %v5617_v25 = vld [vmem:[#allocation5 + $0xcc] ss:$16 sps:$4 sm:$0xff]  }
  0x41   :  { %v5619_v26 = vld [vmem:[#allocation5 + $0xc0] ss:$16 sps:$4 sm:$0xff]   ;;  %v5620_v27 = vld [vmem:[#allocation5 + $0xc8] ss:$16 sps:$4 sm:$0xff]   ;;  %v5621_v28 = vld [vmem:[#allocation5 + $0xe4] ss:$16 sps:$4 sm:$0xff]  }
  0x42   :  { %1024 = vmatpush1.bf16.msra.mxu0 %v5595_v10  ;;  %1150 = vmatpush1.bf16.msra.mxu1 %v5596_v11  ;;  %v5623_v29 = vld [vmem:[#allocation5 + $0xec] ss:$16 sps:$4 sm:$0xff]   ;;  %v5625_v30 = vld [vmem:[#allocation5 + $0xe0] ss:$16 sps:$4 sm:$0xff]   ;;  %v5626_v31 = vld [vmem:[#allocation5 + $0xe8] ss:$16 sps:$4 sm:$0xff]  }
  0x43   :  { %1025 = vmatprep.subr.bf16.mxu0 %v5597_v12  ;;  %1151 = vmatprep.subr.bf16.mxu1 %v5599_v13  ;;  %v5627_v32 = vld [vmem:[#allocation5 + $0x104] ss:$16 sps:$4 sm:$0xff]   ;;  %v5629_v33 = vld [vmem:[#allocation5 + $0x10c] ss:$16 sps:$4 sm:$0xff]   ;;  %v5631_v34 = vld [vmem:[#allocation5 + $0x100] ss:$16 sps:$4 sm:$0xff]  }
  0x44   :  { %v5632_v35 = vld [vmem:[#allocation5 + $0x108] ss:$16 sps:$4 sm:$0xff]   ;;  %v5633_v36 = vld [vmem:[#allocation5 + $0x124] ss:$16 sps:$4 sm:$0xff]   ;;  %v5635_v37 = vld [vmem:[#allocation5 + $0x12c] ss:$16 sps:$4 sm:$0xff]  }
  0x45   :  { %v5637_v38 = vld [vmem:[#allocation5 + $0x120] ss:$16 sps:$4 sm:$0xff]   ;;  %v5638_v39 = vld [vmem:[#allocation5 + $0x128] ss:$16 sps:$4 sm:$0xff]   ;;  %v5639_v40 = vld [vmem:[#allocation5 + $0x144] ss:$16 sps:$4 sm:$0xff]  }
  0x46   :  { %1026 = vmatpush1.bf16.msra.mxu0 %v5601_v14  ;;  %1152 = vmatpush1.bf16.msra.mxu1 %v5602_v15  ;;  %v5641_v41 = vld [vmem:[#allocation5 + $0x14c] ss:$16 sps:$4 sm:$0xff]   ;;  %v5643_v42 = vld [vmem:[#allocation5 + $0x140] ss:$16 sps:$4 sm:$0xff]   ;;  %v5644_v43 = vld [vmem:[#allocation5 + $0x148] ss:$16 sps:$4 sm:$0xff]  }
  0x47   :  { %1027 = vmatprep.subr.bf16.mxu0 %v5603_v16  ;;  %1153 = vmatprep.subr.bf16.mxu1 %v5605_v17  ;;  %v5645_v44 = vld [vmem:[#allocation5 + $0x164] ss:$16 sps:$4 sm:$0xff]   ;;  %v5647_v45 = vld [vmem:[#allocation5 + $0x16c] ss:$16 sps:$4 sm:$0xff]   ;;  %v5649_v46 = vld [vmem:[#allocation5 + $0x160] ss:$16 sps:$4 sm:$0xff]  }
  0x48   :  { %v6526_v47 = vld [vmem:[#allocation2 + $0x8] sm:$0xff]  ;;  %v5651_v52 = vld [vmem:[#allocation5 + $0x184] ss:$16 sps:$4 sm:$0xff]   ;;  %v5655_v62 = vld [vmem:[#allocation5 + $0x180] ss:$16 sps:$4 sm:$0xff]   ;;  %s6466_s2 = smov [#allocation8]  }
  0x49   :  { %v6528_v48 = vld [vmem:[#allocation2 + $0x28] sm:$0xff]  ;;  %v81_v50 = vmul.f32 %v6526_v47, %v6526_v47  ;;  %v6538_v57 = vld [vmem:[#allocation2] sm:$0xff]  ;;  %s4852_s25 = sshll.u32 %s6466_s2, 4  ;;  %s4853_s25 = int_to_ptr.vmem [resolvable:$true] %s4852_s25 }
  0x4a   :  { %1028 = vmatpush1.bf16.msra.mxu0 %v5607_v18  ;;  %1154 = vmatpush1.bf16.msra.mxu1 %v5608_v19  ;;  %v6530_v49 = vld [vmem:[#allocation2 + $0x48] sm:$0xff]  ;;  %v85_v53 = vmul.f32 %v6528_v48, %v6528_v48  ;;  %v6540_v58 = vld [vmem:[#allocation2 + $0x20] sm:$0xff]  ;;  %v80_v60 = vmul.f32 %v6538_v57, %v6538_v57  ;;  %s6429_s26 = scalar_lea.vmem %s4853_s25, 3072  ;;  %p6434_p11 = scmp.lt.s32.totalorder %s4853_s25, %s4853_s25 }
  0x4b   :  { %1029 = vmatprep.subr.bf16.mxu0 %v5609_v20  ;;  %1155 = vmatprep.subr.bf16.mxu1 %v5611_v21  ;;  %v5650_v51 = vld [vmem:[#allocation5 + $0x168] ss:$16 sps:$4 sm:$0xff]   ;;  %v89_v54 = vmul.f32 %v6530_v49, %v6530_v49  ;;  %v5653_v55 = vld [vmem:[#allocation5 + $0x18c] ss:$16 sps:$4 sm:$0xff]   ;;  %v6542_v59 = vld [vmem:[#allocation2 + $0x40] sm:$0xff]  ;;  %v84_v61 = vmul.f32 %v6540_v58, %v6540_v58  ;;  %p6430_p10 = scmp.ne.s32.totalorder %s4853_s25, %s6429_s26  ;;  %p6435_p12 = scmp.lt.s32.totalorder %s6429_s26, %s6429_s26 }
  0x4c   :  { %v112_v56 = vadd.f32 %v85_v53, %v81_v50  ;;  %v5656_v63 = vld [vmem:[#allocation5 + $0x188] ss:$16 sps:$4 sm:$0xff]   ;;  %v88_v1 = vmul.f32 %v6542_v59, %v6542_v59  ;;  %v5657_v2 = vld [vmem:[#allocation5 + $0x1a4] ss:$16 sps:$4 sm:$0xff]   ;;  %v5659_v3 = vld [vmem:[#allocation5 + $0x1ac] ss:$16 sps:$4 sm:$0xff]  }
  0x4d   :  { %v104_v4 = vadd.f32 %v84_v61, %v80_v60  ;;  %v5661_v7 = vld [vmem:[#allocation5 + $0x1a0] ss:$16 sps:$4 sm:$0xff]   ;;  %v5662_v8 = vld [vmem:[#allocation5 + $0x1a8] ss:$16 sps:$4 sm:$0xff]   ;;  %v5663_v10 = vld [vmem:[#allocation5 + $0x1c4] ss:$16 sps:$4 sm:$0xff]   ;;  %p6436_p13 = por %p6435_p12, %p6434_p11 }
  0x4e   :  { %1030 = vmatpush1.bf16.msra.mxu0 %v5613_v22  ;;  %1156 = vmatpush1.bf16.msra.mxu1 %v5614_v23  ;;  %v113_v0 = vadd.f32 %v112_v56, %v89_v54  ;;  %v5665_v11 = vld [vmem:[#allocation5 + $0x1cc] ss:$16 sps:$4 sm:$0xff]   ;;  %v5667_v15 = vld [vmem:[#allocation5 + $0x1c0] ss:$16 sps:$4 sm:$0xff]   ;;  %v5668_v16 = vld [vmem:[#allocation5 + $0x1c8] ss:$16 sps:$4 sm:$0xff]  }
  0x4f   :  { %1031 = vmatprep.subr.bf16.mxu0 %v5615_v24  ;;  %1157 = vmatprep.subr.bf16.mxu1 %v5617_v25  ;;  %v105_v6 = vadd.f32 %v104_v4, %v88_v1  ;;  %v5669_v18 = vld [vmem:[#allocation5 + $0x1e4] ss:$16 sps:$4 sm:$0xff]   ;;  %v5671_v19 = vld [vmem:[#allocation5 + $0x1ec] ss:$16 sps:$4 sm:$0xff]   ;;  %v5673_v23 = vld [vmem:[#allocation5 + $0x1e0] ss:$16 sps:$4 sm:$0xff]   ;;  %p6437_p0 = pnand %p6436_p13, %p6430_p10 }
  0x50   :  { %v114_v5 = vrot.slane %v113_v0, 4  ;;  %v5674_v24 = vld [vmem:[#allocation5 + $0x1e8] ss:$16 sps:$4 sm:$0xff]   ;;  %v5683_v60 = vld [vmem:[#allocation5 + $0x224] ss:$16 sps:$4 sm:$0xff]  }
  0x51   :  { %v106_v12 = vrot.slane %v105_v6, 4  ;;  %v5678_v56 = vld [vmem:[#allocation5 + $0x208] ss:$16 sps:$4 sm:$0xff]  }
  0x52   :  { %1032 = vmatpush1.bf16.msra.mxu0 %v5619_v26  ;;  %1158 = vmatpush1.bf16.msra.mxu1 %v5620_v27  ;;  %v115_v9 = vadd.f32 %v114_v5, %v113_v0  ;;  %v5677_v26 = vld [vmem:[#allocation5 + $0x204] ss:$16 sps:$4 sm:$0xff]   ;;  %v5680_v27 = vld [vmem:[#allocation5 + $0x20c] ss:$16 sps:$4 sm:$0xff]  }
  0x53   :  { %1033 = vmatprep.subr.bf16.mxu0 %v5621_v28  ;;  %1159 = vmatprep.subr.bf16.mxu1 %v5623_v29  ;;  %v107_v14 = vadd.f32 %v106_v12, %v105_v6  ;;  %v5692_v5 = vld [vmem:[#allocation5 + $0x24c] ss:$16 sps:$4 sm:$0xff]  }
  0x54   :  { %v116_v13 = vrot.slane %v115_v9, 2  ;;  %v5698_v12 = vld [vmem:[#allocation5 + $0x26c] ss:$16 sps:$4 sm:$0xff]  }
  0x55   :  { %v108_v20 = vrot.slane %v107_v14, 2 }
  0x56   :  { %1034 = vmatpush1.bf16.msra.mxu0 %v5625_v30  ;;  %1160 = vmatpush1.bf16.msra.mxu1 %v5626_v31  ;;  %v117_v17 = vadd.f32 %v116_v13, %v115_v9  ;;  %v5690_v9 = vld [vmem:[#allocation5 + $0x248] ss:$16 sps:$4 sm:$0xff]  }
  0x57   :  { %1035 = vmatprep.subr.bf16.mxu0 %v5627_v32  ;;  %1161 = vmatprep.subr.bf16.mxu1 %v5629_v33  ;;  %v109_v22 = vadd.f32 %v108_v20, %v107_v14 }
  0x58   :  { %v118_v21 = vrot.slane %v117_v17, 1 }
  0x59   :  { %v110_v28 = vrot.slane %v109_v22, 1 }
  0x5a   :  { %1036 = vmatpush1.bf16.msra.mxu0 %v5631_v34  ;;  %1162 = vmatpush1.bf16.msra.mxu1 %v5632_v35  ;;  %v119_v25 = vadd.f32 %v118_v21, %v117_v17  ;;  %v6590_v17 = vld [vmem:[#allocation2 + $0x58] sm:$0xff] }
  0x5b   :  { %1037 = vmatprep.subr.bf16.mxu0 %v5633_v36  ;;  %1163 = vmatprep.subr.bf16.mxu1 %v5635_v37  ;;  %v111_v30 = vadd.f32 %v110_v28, %v109_v22  ;;  %v6556_v37 = vld [vmem:[#allocation2 + $0x68] sm:$0xff] }
  0x5c   :  { %v170_v29 = vmul.f32 0.055555556, %v119_v25  ;;  %v6600_v25 = vld [vmem:[#allocation2 + $0x30] sm:$0xff] }
  0x5d   :  { %v169_v32 = vmul.f32 0.055555556, %v111_v30  ;;  %v86_v30 = vmul.f32 %v6600_v25, %v6600_v25 }
  0x5e   :  { %1038 = vmatpush1.bf16.msra.mxu0 %v5637_v38  ;;  %1164 = vmatpush1.bf16.msra.mxu1 %v5638_v39  ;;  %v178_v31 = vadd.f32 1e-08, %v170_v29  ;;  %v6558_v38 = vld [vmem:[#allocation2 + $0x88] sm:$0xff] }
  0x5f   :  { %1039 = vmatprep.subr.bf16.mxu0 %v5639_v40  ;;  %1165 = vmatprep.subr.bf16.mxu1 %v5641_v41  ;;  %v177_v33 = vadd.f32 1e-08, %v169_v32  ;;  %v6560_v39 = vld [vmem:[#allocation2 + $0xa8] sm:$0xff]  ;;  %v93_v40 = vmul.f32 %v6556_v37, %v6556_v37  ;;  %v97_v41 = vmul.f32 %v6558_v38, %v6558_v38  ;;  %v6610_v32 = vld [vmem:[#allocation2 + $0x78] sm:$0xff] }
  0x60   :  { %6347 = vrsqrt.f32 %v178_v31 }
  0x61   :  { %6349 = vrsqrt.f32 %v177_v33  ;;  %v144_v54 = vadd.f32 %v97_v41, %v93_v40  ;;  %v6612_v33 = vld [vmem:[#allocation2 + $0x98] sm:$0xff]  ;;  %v95_v41 = vmul.f32 %v6610_v32, %v6610_v32 }
  0x62   :  { %1040 = vmatpush1.bf16.msra.mxu0 %v5643_v42  ;;  %1166 = vmatpush1.bf16.msra.mxu1 %v5644_v43  ;;  %v6566_v42 = vld [vmem:[#allocation2 + $0x60] sm:$0xff] }
  0x63   :  { %1041 = vmatprep.subr.bf16.mxu0 %v5645_v44  ;;  %1167 = vmatprep.subr.bf16.mxu1 %v5647_v45  ;;  %v6568_v43 = vld [vmem:[#allocation2 + $0x80] sm:$0xff] }
  0x64   :  { %v96_v50 = vmul.f32 %v6568_v43, %v6568_v43 }
  0x66   :  { %1042 = vmatpush1.bf16.msra.mxu0 %v5649_v46  ;;  %1168 = vmatpush1.bf16.msra.mxu1 %v5650_v51  ;;  %v101_v46 = vmul.f32 %v6560_v39, %v6560_v39  ;;  %v5675_v51 = vld [vmem:[#allocation5 + $0x200] ss:$16 sps:$4 sm:$0xff]  }
  0x67   :  { %1043 = vmatprep.subr.bf16.mxu0 %v5651_v52  ;;  %1169 = vmatprep.subr.bf16.mxu1 %v5653_v55 }
  0x68   :  { %v145_v0 = vadd.f32 %v144_v54, %v101_v46  ;;  %v6620_v46 = vld [vmem:[#allocation2 + $0x70] sm:$0xff] }
  0x6a   :  { %1044 = vmatpush1.bf16.msra.mxu0 %v5655_v62  ;;  %1170 = vmatpush1.bf16.msra.mxu1 %v5656_v63  ;;  %v6550_v34 = vpop.eup %6347  ;;  %v5686_v63 = vld [vmem:[#allocation5 + $0x22c] ss:$16 sps:$4 sm:$0xff]  }
  0x6b   :  { %1045 = vmatprep.subr.bf16.mxu0 %v5657_v2  ;;  %1171 = vmatprep.subr.bf16.mxu1 %v5659_v3  ;;  %v194_v35 = vmul.f32 %v6550_v34, %v6526_v47  ;;  %v198_v36 = vmul.f32 %v6550_v34, %v6528_v48  ;;  %v6570_v44 = vpop.eup %6349  ;;  %v6574_v47 = vld [vmem:[#allocation2 + $0xa0] sm:$0xff]  ;;  %v92_v48 = vmul.f32 %v6566_v42, %v6566_v42 }
  0x6c   :  { %v193_v52 = vmul.f32 %v6570_v44, %v6538_v57  ;;  %v197_v53 = vmul.f32 %v6570_v44, %v6540_v58  ;;  %v100_v55 = vmul.f32 %v6574_v47, %v6574_v47  ;;  %v5681_v2 = vld [vmem:[#allocation5 + $0x220] ss:$16 sps:$4 sm:$0xff]   ;;  %v146_v57 = vrot.slane %v145_v0, 4  ;;  %v5684_v58 = vld [vmem:[#allocation5 + $0x228] ss:$16 sps:$4 sm:$0xff]  }
  0x6d   :  { %v218_v45 = vpack.c.bf16 %v198_v36, %v194_v35  ;;  %v136_v61 = vadd.f32 %v96_v50, %v92_v48  ;;  %v5689_v3 = vld [vmem:[#allocation5 + $0x244] ss:$16 sps:$4 sm:$0xff]   ;;  %v6614_v35 = vld [vmem:[#allocation2 + $0xb8] sm:$0xff] }
  0x6e   :  { %1046 = vmatpush1.bf16.msra.mxu0 %v5661_v7  ;;  %1172 = vmatpush1.bf16.msra.mxu1 %v5662_v8  ;;  %v217_v62 = vpack.c.bf16 %v197_v53, %v193_v52  ;;  %v147_v6 = vadd.f32 %v146_v57, %v145_v0  ;;  %v5687_v8 = vld [vmem:[#allocation5 + $0x240] ss:$16 sps:$4 sm:$0xff]   ;;  %v103_v54 = vmul.f32 %v6614_v35, %v6614_v35  ;;  %v5707_v0 = vld [vmem:[#allocation5 + $0x2a4] ss:$16 sps:$4 sm:$0xff]  }
  0x6f   :  { %1047 = vmatprep.subr.bf16.mxu0 %v5663_v10  ;;  %1173 = vmatprep.subr.bf16.mxu1 %v5665_v11  ;;  %v137_v1 = vadd.f32 %v136_v61, %v100_v55  ;;  %v5695_v11 = vld [vmem:[#allocation5 + $0x264] ss:$16 sps:$4 sm:$0xff]   ;;  %v5699_v55 = vld [vmem:[#allocation5 + $0x280] ss:$16 sps:$4 sm:$0xff]  }
  0x70   :  { %1051 = vmatprep.mubr.bf16.mxu0 %v218_v45  ;;  %1177 = vmatprep.mubr.bf16.mxu1 %v218_v45  ;;  %v148_v10 = vrot.slane %v147_v6, 2  ;;  %v99_v45 = vmul.f32 %v6612_v33, %v6612_v33  ;;  %v6622_v48 = vld [vmem:[#allocation2 + $0x90] sm:$0xff] }
  0x71   :  { %v138_v4 = vrot.slane %v137_v1, 4  ;;  %v6624_v50 = vld [vmem:[#allocation2 + $0xb0] sm:$0xff]  ;;  %v98_v57 = vmul.f32 %v6622_v48, %v6622_v48 }
  0x72   :  { %1048 = vmatpush1.bf16.msra.mxu0 %v5667_v15  ;;  %1174 = vmatpush1.bf16.msra.mxu1 %v5668_v16  ;;  %v149_v14 = vadd.f32 %v148_v10, %v147_v6  ;;  %v6586_v15 = vld [vmem:[#allocation2 + $0x18] sm:$0xff]  ;;  %v160_v61 = vadd.f32 %v99_v45, %v95_v41 }
  0x73   :  { %1049 = vmatprep.subr.bf16.mxu0 %v5669_v18  ;;  %1175 = vmatprep.subr.bf16.mxu1 %v5671_v19  ;;  %v139_v7 = vadd.f32 %v138_v4, %v137_v1  ;;  %v6588_v16 = vld [vmem:[#allocation2 + $0x38] sm:$0xff]  ;;  %v5693_v18 = vld [vmem:[#allocation5 + $0x260] ss:$16 sps:$4 sm:$0xff]   ;;  %v83_v21 = vmul.f32 %v6586_v15, %v6586_v15 }
  0x74   :  { %v5696_v19 = vld [vmem:[#allocation5 + $0x268] ss:$16 sps:$4 sm:$0xff]   ;;  %v87_v22 = vmul.f32 %v6588_v16, %v6588_v16  ;;  %v150_v28 = vrot.slane %v149_v14, 1  ;;  %v5710_v6 = vld [vmem:[#allocation5 + $0x2ac] ss:$16 sps:$4 sm:$0xff]  }
  0x75   :  { %v140_v13 = vrot.slane %v139_v7, 2  ;;  %v5722_v45 = vld [vmem:[#allocation5 + $0x2ec] ss:$16 sps:$4 sm:$0xff]  }
  0x76   :  { %1050 = vmatpush1.bf16.msra.mxu0 %v5673_v23  ;;  %1176 = vmatpush1.bf16.msra.mxu1 %v5674_v24  ;;  %v91_v23 = vmul.f32 %v6590_v17, %v6590_v17  ;;  %v6598_v24 = vld [vmem:[#allocation2 + $0x10] sm:$0xff]  ;;  %v128_v40 = vadd.f32 %v87_v22, %v83_v21  ;;  %v151_v52 = vadd.f32 %v150_v28, %v149_v14 }
  0x77   :  { %1082 = vmatprep.subr.bf16.mxu0 %v5677_v26  ;;  %1208 = vmatprep.subr.bf16.mxu1 %v5680_v27  ;;  %v141_v20 = vadd.f32 %v140_v13, %v139_v7  ;;  %v6602_v26 = vld [vmem:[#allocation2 + $0x50] sm:$0xff]  ;;  %v82_v29 = vmul.f32 %v6598_v24, %v6598_v24 }
  0x78   :  { %v5701_v27 = vld [vmem:[#allocation5 + $0x284] ss:$16 sps:$4 sm:$0xff]   ;;  %v90_v31 = vmul.f32 %v6602_v26, %v6602_v26  ;;  %v174_v1 = vmul.f32 0.055555556, %v151_v52  ;;  %v5705_v13 = vld [vmem:[#allocation5 + $0x2a0] ss:$16 sps:$4 sm:$0xff]  }
  0x79   :  { %1052 = vmatmul.mubr.bf16.vlgmr.msra.gmra.mrb[0].mxu0 %v217_v62  ;;  %1178 = vmatmul.mubr.bf16.vlgmr.msra.gmra.mrb[0].mxu1 %v217_v62  ;;  %v142_v36 = vrot.slane %v141_v20, 1  ;;  %v120_v53 = vadd.f32 %v86_v30, %v82_v29  ;;  %v94_v62 = vmul.f32 %v6620_v46, %v6620_v46  ;;  %v5711_v30 = vld [vmem:[#allocation5 + $0x2c0] ss:$16 sps:$4 sm:$0xff]  }
  0x7a   :  { %1083 = vmatpush1.bf16.msra.mxu0 %v5675_v51  ;;  %1209 = vmatpush1.bf16.msra.mxu1 %v5678_v56  ;;  %v5704_v51 = vld [vmem:[#allocation5 + $0x28c] ss:$16 sps:$4 sm:$0xff]   ;;  %v182_v7 = vadd.f32 1e-08, %v174_v1  ;;  %v201_v1 = vmul.f32 %v6570_v44, %v6542_v59  ;;  %v5731_v59 = vld [vmem:[#allocation5 + $0x324] ss:$16 sps:$4 sm:$0xff]  }
  0x7b   :  { %1084 = vmatprep.subr.bf16.mxu0 %v5683_v60  ;;  %1210 = vmatprep.subr.bf16.mxu1 %v5686_v63  ;;  %v143_v56 = vadd.f32 %v142_v36, %v141_v20  ;;  %v129_v60 = vadd.f32 %v128_v40, %v91_v23  ;;  %v5702_v63 = vld [vmem:[#allocation5 + $0x288] ss:$16 sps:$4 sm:$0xff]   ;;  %v5716_v23 = vld [vmem:[#allocation5 + $0x2cc] ss:$16 sps:$4 sm:$0xff]   ;;  %v5719_v40 = vld [vmem:[#allocation5 + $0x2e4] ss:$16 sps:$4 sm:$0xff]  }
  0x7c   :  { %6351 = vrsqrt.f32 %v182_v7  ;;  %v5714_v36 = vld [vmem:[#allocation5 + $0x2c8] ss:$16 sps:$4 sm:$0xff]   ;;  %v5723_v7 = vld [vmem:[#allocation5 + $0x300] ss:$16 sps:$4 sm:$0xff]   ;;  %v5734_v44 = vld [vmem:[#allocation5 + $0x32c] ss:$16 sps:$4 sm:$0xff]  }
  0x7d   :  { %v130_v4 = vrot.slane %v129_v60, 4 }
  0x7e   :  { %1085 = vmatpush1.bf16.msra.mxu0 %v5681_v2  ;;  %1211 = vmatpush1.bf16.msra.mxu1 %v5684_v58  ;;  %v121_v2 = vadd.f32 %v120_v53, %v90_v31  ;;  %v102_v58 = vmul.f32 %v6624_v50, %v6624_v50  ;;  %v5717_v53 = vld [vmem:[#allocation5 + $0x2e0] ss:$16 sps:$4 sm:$0xff]  }
  0x7f   :  { %1086 = vmatprep.subr.bf16.mxu0 %v5689_v3  ;;  %1212 = vmatprep.subr.bf16.mxu1 %v5692_v5  ;;  %v173_v3 = vmul.f32 0.055555556, %v143_v56  ;;  %v161_v5 = vadd.f32 %v160_v61, %v103_v54  ;;  %v5728_v61 = vld [vmem:[#allocation5 + $0x30c] ss:$16 sps:$4 sm:$0xff]  }
  0x81   :  { %v181_v10 = vadd.f32 1e-08, %v173_v3 }
  0x82   :  { %1087 = vmatpush1.bf16.msra.mxu0 %v5687_v8  ;;  %1213 = vmatpush1.bf16.msra.mxu1 %v5690_v9  ;;  %v122_v8 = vrot.slane %v121_v2, 4  ;;  %v152_v9 = vadd.f32 %v98_v57, %v94_v62  ;;  %v202_v62 = vmul.f32 %v6550_v34, %v6530_v49 }
  0x83   :  { %1088 = vmatprep.subr.bf16.mxu0 %v5695_v11  ;;  %1214 = vmatprep.subr.bf16.mxu1 %v5698_v12  ;;  %v131_v11 = vadd.f32 %v130_v4, %v129_v60  ;;  %v162_v12 = vrot.slane %v161_v5, 4  ;;  %6353 = vrsqrt.f32 %v181_v10  ;;  %v5725_v60 = vld [vmem:[#allocation5 + $0x304] ss:$16 sps:$4 sm:$0xff]  }
  0x84   :  { %v123_v14 = vadd.f32 %v122_v8, %v121_v2  ;;  %v153_v20 = vadd.f32 %v152_v9, %v102_v58  ;;  %v5726_v8 = vld [vmem:[#allocation5 + $0x308] ss:$16 sps:$4 sm:$0xff]  }
  0x85   :  { %v132_v21 = vrot.slane %v131_v11, 2  ;;  %v163_v22 = vadd.f32 %v162_v12, %v161_v5 }
  0x86   :  { %1089 = vmatpush1.bf16.msra.mxu0 %v5693_v18  ;;  %1215 = vmatpush1.bf16.msra.mxu1 %v5696_v19  ;;  %v5708_v18 = vld [vmem:[#allocation5 + $0x2a8] ss:$16 sps:$4 sm:$0xff]   ;;  %v5713_v19 = vld [vmem:[#allocation5 + $0x2c4] ss:$16 sps:$4 sm:$0xff]   ;;  %v154_v28 = vrot.slane %v153_v20, 4 }
  0x87   :  { %1090 = vmatprep.subr.bf16.mxu0 %v5701_v27  ;;  %1216 = vmatprep.subr.bf16.mxu1 %v5704_v51  ;;  %v124_v27 = vrot.slane %v123_v14, 2  ;;  %v133_v29 = vadd.f32 %v132_v21, %v131_v11  ;;  %v164_v31 = vrot.slane %v163_v22, 2  ;;  %v5729_v11 = vld [vmem:[#allocation5 + $0x320] ss:$16 sps:$4 sm:$0xff]  }
  0x88   :  { %v155_v52 = vadd.f32 %v154_v28, %v153_v20  ;;  %v5737_v20 = vld [vmem:[#allocation5 + $0x344] ss:$16 sps:$4 sm:$0xff]   ;;  %v5746_v28 = vld [vmem:[#allocation5 + $0x36c] ss:$16 sps:$4 sm:$0xff]  }
  0x89   :  { %v134_v41 = vrot.slane %v133_v29, 1  ;;  %v125_v51 = vadd.f32 %v124_v27, %v123_v14  ;;  %v165_v56 = vadd.f32 %v164_v31, %v163_v22  ;;  %v5732_v14 = vld [vmem:[#allocation5 + $0x328] ss:$16 sps:$4 sm:$0xff]   ;;  %v5735_v27 = vld [vmem:[#allocation5 + $0x340] ss:$16 sps:$4 sm:$0xff]  }
  0x8a   :  { %1091 = vmatpush1.bf16.msra.mxu0 %v5699_v55  ;;  %1217 = vmatpush1.bf16.msra.mxu1 %v5702_v63  ;;  %v5720_v55 = vld [vmem:[#allocation5 + $0x2e8] ss:$16 sps:$4 sm:$0xff]   ;;  %v156_v57 = vrot.slane %v155_v52, 2 }
  0x8b   :  { %1092 = vmatprep.subr.bf16.mxu0 %v5707_v0  ;;  %1218 = vmatprep.subr.bf16.mxu1 %v5710_v6  ;;  %v135_v54 = vadd.f32 %v134_v41, %v133_v29  ;;  %v6352_v0 = vpop.eup %6351  ;;  %v126_v2 = vrot.slane %v125_v51, 1  ;;  %v166_v34 = vrot.slane %v165_v56, 1 }
  0x8c   :  { %v206_v3 = vmul.f32 %v6352_v0, %v6556_v37  ;;  %v210_v4 = vmul.f32 %v6352_v0, %v6558_v38  ;;  %v214_v5 = vmul.f32 %v6352_v0, %v6560_v39  ;;  %v157_v39 = vadd.f32 %v156_v57, %v155_v52  ;;  %v5749_v52 = vld [vmem:[#allocation5 + $0x384] ss:$16 sps:$4 sm:$0xff]   ;;  %v5762_v57 = vld [vmem:[#allocation5 + $0x3c8] ss:$16 sps:$4 sm:$0xff]  }
  0x8d   :  { %v172_v63 = vmul.f32 0.055555556, %v135_v54  ;;  %v6354_v58 = vpop.eup %6353  ;;  %v127_v38 = vadd.f32 %v126_v2, %v125_v51  ;;  %v5744_v51 = vld [vmem:[#allocation5 + $0x368] ss:$16 sps:$4 sm:$0xff]   ;;  %v5761_v0 = vld [vmem:[#allocation5 + $0x3c4] ss:$16 sps:$4 sm:$0xff]  }
  0x8e   :  { %1093 = vmatpush1.bf16.msra.mxu0 %v5705_v13  ;;  %1219 = vmatpush1.bf16.msra.mxu1 %v5708_v18  ;;  %v205_v49 = vmul.f32 %v6354_v58, %v6566_v42  ;;  %v222_v9 = vpack.c.bf16 %v206_v3, %v202_v62  ;;  %v226_v37 = vpack.c.bf16 %v214_v5, %v210_v4  ;;  %v5740_v18 = vld [vmem:[#allocation5 + $0x34c] ss:$16 sps:$4 sm:$0xff]   ;;  %v158_v21 = vrot.slane %v157_v39, 1  ;;  %v5756_v62 = vld [vmem:[#allocation5 + $0x3a8] ss:$16 sps:$4 sm:$0xff]  }
  0x8f   :  { %1094 = vmatprep.subr.bf16.mxu0 %v5713_v19  ;;  %1220 = vmatprep.subr.bf16.mxu1 %v5716_v23  ;;  %v180_v6 = vadd.f32 1e-08, %v172_v63  ;;  %v209_v42 = vmul.f32 %v6354_v58, %v6568_v43  ;;  %v213_v12 = vmul.f32 %v6354_v58, %v6574_v47  ;;  %v167_v13 = vadd.f32 %v166_v34, %v165_v56  ;;  %v5738_v43 = vld [vmem:[#allocation5 + $0x348] ss:$16 sps:$4 sm:$0xff]   ;;  %v5743_v47 = vld [vmem:[#allocation5 + $0x364] ss:$16 sps:$4 sm:$0xff]  }
  0x90   :  { %v221_v10 = vpack.c.bf16 %v205_v49, %v201_v1  ;;  %1061 = vmatprep.mubr.bf16.mxu0 %v222_v9  ;;  %1187 = vmatprep.mubr.bf16.mxu1 %v222_v9  ;;  %v171_v19 = vmul.f32 0.055555556, %v127_v38  ;;  %v159_v31 = vadd.f32 %v158_v21, %v157_v39  ;;  %v5750_v56 = vld [vmem:[#allocation5 + $0x388] ss:$16 sps:$4 sm:$0xff]   ;;  %v5764_v1 = vld [vmem:[#allocation5 + $0x3cc] ss:$16 sps:$4 sm:$0xff]  }
  0x91   :  { %6355 = vrsqrt.f32 %v180_v6  ;;  %v225_v22 = vpack.c.bf16 %v213_v12, %v209_v42  ;;  %v176_v23 = vmul.f32 0.055555556, %v167_v13  ;;  %v5759_v2 = vld [vmem:[#allocation5 + $0x3c0] ss:$16 sps:$4 sm:$0xff]   ;;  %v5767_v58 = vld [vmem:[#allocation5 + $0x3e4] ss:$16 sps:$4 sm:$0xff]  }
  0x92   :  { %1095 = vmatpush1.bf16.msra.mxu0 %v5711_v30  ;;  %1221 = vmatpush1.bf16.msra.mxu1 %v5714_v36  ;;  %v179_v30 = vadd.f32 1e-08, %v171_v19  ;;  %v5770_v3 = vld [vmem:[#allocation5 + $0x3ec] ss:$16 sps:$4 sm:$0xff]   ;;  %v5765_v6 = vld [vmem:[#allocation5 + $0x3e0] ss:$16 sps:$4 sm:$0xff]  }
  0x93   :  { %1096 = vmatprep.subr.bf16.mxu0 %v5719_v40  ;;  %1222 = vmatprep.subr.bf16.mxu1 %v5722_v45  ;;  %v184_v41 = vadd.f32 1e-08, %v176_v23  ;;  %v5741_v45 = vld [vmem:[#allocation5 + $0x360] ss:$16 sps:$4 sm:$0xff]   ;;  %v5776_v9 = vld [vmem:[#allocation5 + $0x40c] ss:$16 sps:$4 sm:$0xff]  }
  0x94   :  { %1062 = vmatmul.mubr.bf16.gmra.mrb[4].mxu0 %v221_v10  ;;  %1188 = vmatmul.mubr.bf16.gmra.mrb[4].mxu1 %v221_v10  ;;  %6357 = vrsqrt.f32 %v179_v30  ;;  %v5774_v38 = vld [vmem:[#allocation5 + $0x408] ss:$16 sps:$4 sm:$0xff]   ;;  %v5782_v42 = vld [vmem:[#allocation5 + $0x42c] ss:$16 sps:$4 sm:$0xff]   ;;  %v5783_v21 = vld [vmem:[#allocation5 + $0x440] ss:$16 sps:$4 sm:$0xff]  }
  0x95   :  { %1071 = vmatprep.mubr.bf16.mxu0 %v226_v37  ;;  %1197 = vmatprep.mubr.bf16.mxu1 %v226_v37  ;;  %6359 = vrsqrt.f32 %v184_v41  ;;  %v5771_v37 = vld [vmem:[#allocation5 + $0x400] ss:$16 sps:$4 sm:$0xff]   ;;  %v5780_v12 = vld [vmem:[#allocation5 + $0x428] ss:$16 sps:$4 sm:$0xff]   ;;  %v5791_v23 = vld [vmem:[#allocation5 + $0x464] ss:$16 sps:$4 sm:$0xff]  }
  0x96   :  { %1097 = vmatpush1.bf16.msra.mxu0 %v5717_v53  ;;  %1223 = vmatpush1.bf16.msra.mxu1 %v5720_v55  ;;  %v5752_v53 = vld [vmem:[#allocation5 + $0x38c] ss:$16 sps:$4 sm:$0xff]   ;;  %v175_v55 = vmul.f32 0.055555556, %v159_v31  ;;  %v5795_v30 = vld [vmem:[#allocation5 + $0x480] ss:$16 sps:$4 sm:$0xff]  }
  0x97   :  { %1098 = vmatprep.subr.bf16.mxu0 %v5725_v60  ;;  %1224 = vmatprep.subr.bf16.mxu1 %v5728_v61  ;;  %v5758_v60 = vld [vmem:[#allocation5 + $0x3ac] ss:$16 sps:$4 sm:$0xff]   ;;  %v5753_v61 = vld [vmem:[#allocation5 + $0x3a0] ss:$16 sps:$4 sm:$0xff]   ;;  %v5798_v31 = vld [vmem:[#allocation5 + $0x488] ss:$16 sps:$4 sm:$0xff]  }
  0x98   :  { %v183_v63 = vadd.f32 1e-08, %v175_v55  ;;  %v5809_v41 = vld [vmem:[#allocation5 + $0x4c4] ss:$16 sps:$4 sm:$0xff]   ;;  %v5813_v55 = vld [vmem:[#allocation5 + $0x4e0] ss:$16 sps:$4 sm:$0xff]  }
  0x9a   :  { %1099 = vmatpush1.bf16.msra.mxu0 %v5723_v7  ;;  %1225 = vmatpush1.bf16.msra.mxu1 %v5726_v8  ;;  %6361 = vrsqrt.f32 %v183_v63  ;;  %v5768_v7 = vld [vmem:[#allocation5 + $0x3e8] ss:$16 sps:$4 sm:$0xff]   ;;  %v5773_v8 = vld [vmem:[#allocation5 + $0x404] ss:$16 sps:$4 sm:$0xff]   ;;  %v5830_v63 = vld [vmem:[#allocation5 + $0x52c] ss:$16 sps:$4 sm:$0xff]  }
  0x9b   :  { %1100 = vmatprep.subr.bf16.mxu0 %v5731_v59  ;;  %1226 = vmatprep.subr.bf16.mxu1 %v5734_v44  ;;  %v6356_v29 = vpop.eup %6355 }
  0x9c   :  { %1072 = vmatmul.mubr.bf16.gmra.mrb[8].mxu0 %v225_v22  ;;  %1198 = vmatmul.mubr.bf16.gmra.mrb[8].mxu1 %v225_v22  ;;  %v196_v36 = vmul.f32 %v6356_v29, %v6586_v15  ;;  %v200_v40 = vmul.f32 %v6356_v29, %v6588_v16  ;;  %v5747_v15 = vld [vmem:[#allocation5 + $0x380] ss:$16 sps:$4 sm:$0xff]   ;;  %v5755_v16 = vld [vmem:[#allocation5 + $0x3a4] ss:$16 sps:$4 sm:$0xff]   ;;  %v204_v59 = vmul.f32 %v6356_v29, %v6590_v17  ;;  %v5786_v22 = vld [vmem:[#allocation5 + $0x448] ss:$16 sps:$4 sm:$0xff]  }
  0x9e   :  { %1101 = vmatpush1.bf16.msra.mxu0 %v5729_v11  ;;  %1227 = vmatpush1.bf16.msra.mxu1 %v5732_v14  ;;  %v220_v54 = vpack.c.bf16 %v200_v40, %v196_v36  ;;  %v6358_v4 = vpop.eup %6357  ;;  %v5803_v36 = vld [vmem:[#allocation5 + $0x4a4] ss:$16 sps:$4 sm:$0xff]   ;;  %v5806_v40 = vld [vmem:[#allocation5 + $0x4ac] ss:$16 sps:$4 sm:$0xff]  }
  0x9f   :  { %1102 = vmatprep.subr.bf16.mxu0 %v5737_v20  ;;  %1228 = vmatprep.subr.bf16.mxu1 %v5740_v18  ;;  %v6360_v5 = vpop.eup %6359  ;;  %v195_v49 = vmul.f32 %v6358_v4, %v6598_v24  ;;  %v199_v34 = vmul.f32 %v6358_v4, %v6600_v25  ;;  %v5779_v24 = vld [vmem:[#allocation5 + $0x424] ss:$16 sps:$4 sm:$0xff]   ;;  %v203_v25 = vmul.f32 %v6358_v4, %v6602_v26  ;;  %v5788_v18 = vld [vmem:[#allocation5 + $0x44c] ss:$16 sps:$4 sm:$0xff]  }
  0xa0   :  { %1114 = vmatprep.mubr.bf16.mxu0 %v220_v54  ;;  %1240 = vmatprep.mubr.bf16.mxu1 %v220_v54  ;;  %v208_v44 = vmul.f32 %v6360_v5, %v6610_v32  ;;  %v5777_v32 = vld [vmem:[#allocation5 + $0x420] ss:$16 sps:$4 sm:$0xff]   ;;  %v212_v13 = vmul.f32 %v6360_v5, %v6612_v33  ;;  %v216_v14 = vmul.f32 %v6360_v5, %v6614_v35  ;;  %v5785_v20 = vld [vmem:[#allocation5 + $0x444] ss:$16 sps:$4 sm:$0xff]   ;;  %v5818_v54 = vld [vmem:[#allocation5 + $0x4ec] ss:$16 sps:$4 sm:$0xff]  }
  0xa1   :  { %v219_v10 = vpack.c.bf16 %v199_v34, %v195_v49  ;;  %v5839_v4 = vld [vmem:[#allocation5 + $0x564] ss:$16 sps:$4 sm:$0xff]   ;;  %v5842_v5 = vld [vmem:[#allocation5 + $0x56c] ss:$16 sps:$4 sm:$0xff]  }
  0xa2   :  { %1103 = vmatpush1.bf16.msra.mxu0 %v5735_v27  ;;  %1229 = vmatpush1.bf16.msra.mxu1 %v5738_v43  ;;  %v224_v11 = vpack.c.bf16 %v208_v44, %v204_v59  ;;  %v228_v26 = vpack.c.bf16 %v216_v14, %v212_v13  ;;  %v5789_v27 = vld [vmem:[#allocation5 + $0x460] ss:$16 sps:$4 sm:$0xff]   ;;  %v5792_v43 = vld [vmem:[#allocation5 + $0x468] ss:$16 sps:$4 sm:$0xff]   ;;  %v5845_v49 = vld [vmem:[#allocation5 + $0x584] ss:$16 sps:$4 sm:$0xff]   ;;  %v359_v14 = vlaneseq }
  0xa3   :  { %1104 = vmatprep.subr.bf16.mxu0 %v5743_v47  ;;  %1230 = vmatprep.subr.bf16.mxu1 %v5746_v28  ;;  %v5797_v47 = vld [vmem:[#allocation5 + $0x484] ss:$16 sps:$4 sm:$0xff]   ;;  %v5800_v28 = vld [vmem:[#allocation5 + $0x48c] ss:$16 sps:$4 sm:$0xff]  }
  0xa4   :  { %v6362_v39 = vpop.eup %6361  ;;  %v5848_v34 = vld [vmem:[#allocation5 + $0x58c] ss:$16 sps:$4 sm:$0xff]   ;;  %v5851_v59 = vld [vmem:[#allocation5 + $0x5a4] ss:$16 sps:$4 sm:$0xff]  }
  0xa5   :  { %v207_v17 = vmul.f32 %v6362_v39, %v6620_v46  ;;  %v5794_v46 = vld [vmem:[#allocation5 + $0x46c] ss:$16 sps:$4 sm:$0xff]   ;;  %v211_v33 = vmul.f32 %v6362_v39, %v6622_v48  ;;  %v215_v35 = vmul.f32 %v6362_v39, %v6624_v50  ;;  %v5801_v48 = vld [vmem:[#allocation5 + $0x4a0] ss:$16 sps:$4 sm:$0xff]   ;;  %v5804_v50 = vld [vmem:[#allocation5 + $0x4a8] ss:$16 sps:$4 sm:$0xff]  }
  0xa6   :  { %1105 = vmatpush1.bf16.msra.mxu0 %v5741_v45  ;;  %1231 = vmatpush1.bf16.msra.mxu1 %v5744_v51  ;;  %v5812_v45 = vld [vmem:[#allocation5 + $0x4cc] ss:$16 sps:$4 sm:$0xff]   ;;  %v5807_v51 = vld [vmem:[#allocation5 + $0x4c0] ss:$16 sps:$4 sm:$0xff]  }
  0xa7   :  { %1106 = vmatprep.subr.bf16.mxu0 %v5749_v52  ;;  %1232 = vmatprep.subr.bf16.mxu1 %v5752_v53  ;;  %v223_v19 = vpack.c.bf16 %v207_v17, %v203_v25  ;;  %v227_v29 = vpack.c.bf16 %v215_v35, %v211_v33  ;;  %v5810_v52 = vld [vmem:[#allocation5 + $0x4c8] ss:$16 sps:$4 sm:$0xff]   ;;  %v5815_v53 = vld [vmem:[#allocation5 + $0x4e4] ss:$16 sps:$4 sm:$0xff]   ;;  %v5854_v44 = vld [vmem:[#allocation5 + $0x5ac] ss:$16 sps:$4 sm:$0xff]  }
  0xa8   :  { %v5860_v39 = vld [vmem:[#allocation5 + $0x5cc] ss:$16 sps:$4 sm:$0xff]   ;;  %v5861_v17 = vld [vmem:[#allocation5 + $0x5e0] ss:$16 sps:$4 sm:$0xff]  }
  0xa9   :  { %v5866_v25 = vld [vmem:[#allocation5 + $0x5ec] ss:$16 sps:$4 sm:$0xff]  }
  0xaa   :  { %1107 = vmatpush1.bf16.msra.mxu0 %v5747_v15  ;;  %1233 = vmatpush1.bf16.msra.mxu1 %v5750_v56  ;;  %v5816_v15 = vld [vmem:[#allocation5 + $0x4e8] ss:$16 sps:$4 sm:$0xff]   ;;  %v5821_v56 = vld [vmem:[#allocation5 + $0x504] ss:$16 sps:$4 sm:$0xff]   ;;  %v5872_v13 = vld [vmem:[#allocation5 + $0x60c] ss:$16 sps:$4 sm:$0xff]  }
  0xab   :  { %1108 = vmatprep.subr.bf16.mxu0 %v5755_v16  ;;  %1234 = vmatprep.subr.bf16.mxu1 %v5758_v60  ;;  %v5824_v16 = vld [vmem:[#allocation5 + $0x50c] ss:$16 sps:$4 sm:$0xff]   ;;  %v5819_v60 = vld [vmem:[#allocation5 + $0x500] ss:$16 sps:$4 sm:$0xff]  }
  0xae   :  { %1109 = vmatpush1.bf16.msra.mxu0 %v5753_v61  ;;  %1235 = vmatpush1.bf16.msra.mxu1 %v5756_v62  ;;  %v5822_v61 = vld [vmem:[#allocation5 + $0x508] ss:$16 sps:$4 sm:$0xff]   ;;  %v5827_v62 = vld [vmem:[#allocation5 + $0x524] ss:$16 sps:$4 sm:$0xff]  }
  0xaf   :  { %1110 = vmatprep.subr.bf16.mxu0 %v5761_v0  ;;  %1236 = vmatprep.subr.bf16.mxu1 %v5764_v1  ;;  %v5825_v0 = vld [vmem:[#allocation5 + $0x520] ss:$16 sps:$4 sm:$0xff]   ;;  %v5828_v1 = vld [vmem:[#allocation5 + $0x528] ss:$16 sps:$4 sm:$0xff]  }
  0xb2   :  { %1111 = vmatpush1.bf16.msra.mxu0 %v5759_v2  ;;  %1237 = vmatpush1.bf16.msra.mxu1 %v5762_v57  ;;  %v5833_v2 = vld [vmem:[#allocation5 + $0x544] ss:$16 sps:$4 sm:$0xff]   ;;  %v5836_v57 = vld [vmem:[#allocation5 + $0x54c] ss:$16 sps:$4 sm:$0xff]  }
  0xb3   :  { %1112 = vmatprep.subr.bf16.mxu0 %v5767_v58  ;;  %1238 = vmatprep.subr.bf16.mxu1 %v5770_v3  ;;  %v5831_v58 = vld [vmem:[#allocation5 + $0x540] ss:$16 sps:$4 sm:$0xff]   ;;  %v5834_v3 = vld [vmem:[#allocation5 + $0x548] ss:$16 sps:$4 sm:$0xff]  }
  0xb6   :  { %1113 = vmatpush1.bf16.msra.mxu0 %v5765_v6  ;;  %1239 = vmatpush1.bf16.msra.mxu1 %v5768_v7  ;;  %v5837_v6 = vld [vmem:[#allocation5 + $0x560] ss:$16 sps:$4 sm:$0xff]   ;;  %v5840_v7 = vld [vmem:[#allocation5 + $0x568] ss:$16 sps:$4 sm:$0xff]  }
  0xb7   :  { %2171 = vmatprep.subr.bf16.mxu0 %v5773_v8  ;;  %2297 = vmatprep.subr.bf16.mxu1 %v5776_v9  ;;  %v5843_v8 = vld [vmem:[#allocation5 + $0x580] ss:$16 sps:$4 sm:$0xff]   ;;  %v5846_v9 = vld [vmem:[#allocation5 + $0x588] ss:$16 sps:$4 sm:$0xff]  }
  0xb9   :  { %1115 = vmatmul.mubr.bf16.vlgmr.msra.gmra.mrb[0].mxu0 %v219_v10  ;;  %1241 = vmatmul.mubr.bf16.vlgmr.msra.gmra.mrb[0].mxu1 %v219_v10  ;;  %v5849_v10 = vld [vmem:[#allocation5 + $0x5a0] ss:$16 sps:$4 sm:$0xff]  }
  0xba   :  { %1124 = vmatprep.mubr.bf16.mxu0 %v224_v11  ;;  %1250 = vmatprep.mubr.bf16.mxu1 %v224_v11  ;;  %v5855_v11 = vld [vmem:[#allocation5 + $0x5c0] ss:$16 sps:$4 sm:$0xff]  }
  0xbb   :  { %2172 = vmatpush1.bf16.msra.mxu0 %v5771_v37  ;;  %2298 = vmatpush1.bf16.msra.mxu1 %v5774_v38  ;;  %v5852_v37 = vld [vmem:[#allocation5 + $0x5a8] ss:$16 sps:$4 sm:$0xff]   ;;  %v5857_v38 = vld [vmem:[#allocation5 + $0x5c4] ss:$16 sps:$4 sm:$0xff]  }
  0xbc   :  { %2173 = vmatprep.subr.bf16.mxu0 %v5779_v24  ;;  %2299 = vmatprep.subr.bf16.mxu1 %v5782_v42  ;;  %v5858_v24 = vld [vmem:[#allocation5 + $0x5c8] ss:$16 sps:$4 sm:$0xff]   ;;  %v5863_v42 = vld [vmem:[#allocation5 + $0x5e4] ss:$16 sps:$4 sm:$0xff]  }
  0xbf   :  { %2174 = vmatpush1.bf16.msra.mxu0 %v5777_v32  ;;  %2300 = vmatpush1.bf16.msra.mxu1 %v5780_v12  ;;  %v5864_v32 = vld [vmem:[#allocation5 + $0x5e8] ss:$16 sps:$4 sm:$0xff]   ;;  %v5869_v12 = vld [vmem:[#allocation5 + $0x604] ss:$16 sps:$4 sm:$0xff]  }
  0xc0   :  { %2175 = vmatprep.subr.bf16.mxu0 %v5785_v20  ;;  %2301 = vmatprep.subr.bf16.mxu1 %v5788_v18  ;;  %v360_v20 = vshrl.u32 %v359_v14, 7 }
  0xc1   :  { %1125 = vmatmul.mubr.bf16.gmra.mrb[4].mxu0 %v223_v19  ;;  %1251 = vmatmul.mubr.bf16.gmra.mrb[4].mxu1 %v223_v19 }
  0xc2   :  { %1134 = vmatprep.mubr.bf16.mxu0 %v228_v26  ;;  %1260 = vmatprep.mubr.bf16.mxu1 %v228_v26  ;;  %v6656_v18 = vsub.s32 0, %v360_v20  ;;  %v6658_v19 = vsub.s32 2, %v360_v20  ;;  %v6662_v26 = vsub.s32 3, %v360_v20 }
  0xc3   :  { %2176 = vmatpush1.bf16.msra.mxu0 %v5783_v21  ;;  %2302 = vmatpush1.bf16.msra.mxu1 %v5786_v22  ;;  %v357_v21 = vld [vmem:[#allocation7] sm:$0xf]  ;;  %v6660_v22 = vsub.s32 1, %v360_v20 }
  0xc4   :  { %2177 = vmatprep.subr.bf16.mxu0 %v5791_v23  ;;  %2303 = vmatprep.subr.bf16.mxu1 %v5794_v46  ;;  %v6665_v23 = vrot.slane %v357_v21, %v6656_v18  ;;  %v6668_v46 = vrot.slane %v357_v21, %v6658_v19  ;;  %v6674_v35 = vrot.slane %v357_v21, %v6662_v26 }
  0xc5   :  { %v6671_v33 = vrot.slane %v357_v21, %v6660_v22  ;;  %v5867_v21 = vld [vmem:[#allocation5 + $0x600] ss:$16 sps:$4 sm:$0xff]  }
  0xc7   :  { %2178 = vmatpush1.bf16.msra.mxu0 %v5789_v27  ;;  %2304 = vmatpush1.bf16.msra.mxu1 %v5792_v43 }
  0xc8   :  { %2179 = vmatprep.subr.bf16.mxu0 %v5797_v47  ;;  %2305 = vmatprep.subr.bf16.mxu1 %v5800_v28 }
  0xc9   :  { %1135 = vmatmul.mubr.bf16.gmra.mrb[8].mxu0 %v227_v29  ;;  %1261 = vmatmul.mubr.bf16.gmra.mrb[8].mxu1 %v227_v29 }
  0xcb   :  { %2180 = vmatpush1.bf16.msra.mxu0 %v5795_v30  ;;  %2306 = vmatpush1.bf16.msra.mxu1 %v5798_v31 }
  0xcc   :  { %2181 = vmatprep.subr.bf16.mxu0 %v5803_v36  ;;  %2307 = vmatprep.subr.bf16.mxu1 %v5806_v40 }
  0xcf   :  { %2182 = vmatpush1.bf16.msra.mxu0 %v5801_v48  ;;  %2308 = vmatpush1.bf16.msra.mxu1 %v5804_v50 }
  0xd0   :  { %2183 = vmatprep.subr.bf16.mxu0 %v5809_v41  ;;  %2309 = vmatprep.subr.bf16.mxu1 %v5812_v45 }
  0xd3   :  { %2184 = vmatpush1.bf16.msra.mxu0 %v5807_v51  ;;  %2310 = vmatpush1.bf16.msra.mxu1 %v5810_v52 }
  0xd4   :  { %2185 = vmatprep.subr.bf16.mxu0 %v5815_v53  ;;  %2311 = vmatprep.subr.bf16.mxu1 %v5818_v54 }
  0xd7   :  { %2186 = vmatpush1.bf16.msra.mxu0 %v5813_v55  ;;  %2312 = vmatpush1.bf16.msra.mxu1 %v5816_v15 }
  0xd8   :  { %2187 = vmatprep.subr.bf16.mxu0 %v5821_v56  ;;  %2313 = vmatprep.subr.bf16.mxu1 %v5824_v16 }
  0xdb   :  { %2188 = vmatpush1.bf16.msra.mxu0 %v5819_v60  ;;  %2314 = vmatpush1.bf16.msra.mxu1 %v5822_v61 }
  0xdc   :  { %2189 = vmatprep.subr.bf16.mxu0 %v5827_v62  ;;  %2315 = vmatprep.subr.bf16.mxu1 %v5830_v63 }
  0xdf   :  { %2190 = vmatpush1.bf16.msra.mxu0 %v5825_v0  ;;  %2316 = vmatpush1.bf16.msra.mxu1 %v5828_v1 }
  0xe0   :  { %2191 = vmatprep.subr.bf16.mxu0 %v5833_v2  ;;  %2317 = vmatprep.subr.bf16.mxu1 %v5836_v57 }
  0xe3   :  { %2192 = vmatpush1.bf16.msra.mxu0 %v5831_v58  ;;  %2318 = vmatpush1.bf16.msra.mxu1 %v5834_v3 }
  0xe4   :  { %2193 = vmatprep.subr.bf16.mxu0 %v5839_v4  ;;  %2319 = vmatprep.subr.bf16.mxu1 %v5842_v5 }
  0xe7   :  { %2194 = vmatpush1.bf16.msra.mxu0 %v5837_v6  ;;  %2320 = vmatpush1.bf16.msra.mxu1 %v5840_v7 }
  0xe8   :  { %2195 = vmatprep.subr.bf16.mxu0 %v5845_v49  ;;  %2321 = vmatprep.subr.bf16.mxu1 %v5848_v34 }
  0xeb   :  { %2196 = vmatpush1.bf16.msra.mxu0 %v5843_v8  ;;  %2322 = vmatpush1.bf16.msra.mxu1 %v5846_v9 }
  0xec   :  { %2197 = vmatprep.subr.bf16.mxu0 %v5851_v59  ;;  %2323 = vmatprep.subr.bf16.mxu1 %v5854_v44 }
  0xef   :  { %2198 = vmatpush1.bf16.msra.mxu0 %v5849_v10  ;;  %2324 = vmatpush1.bf16.msra.mxu1 %v5852_v37 }
  0xf0   :  { %2199 = vmatprep.subr.bf16.mxu0 %v5857_v38  ;;  %2325 = vmatprep.subr.bf16.mxu1 %v5860_v39 }
  0xf3   :  { %2200 = vmatpush1.bf16.msra.mxu0 %v5855_v11  ;;  %2326 = vmatpush1.bf16.msra.mxu1 %v5858_v24 }
  0xf4   :  { %2201 = vmatprep.subr.bf16.mxu0 %v5863_v42  ;;  %2327 = vmatprep.subr.bf16.mxu1 %v5866_v25 }
  0xf7   :  { %2202 = vmatpush1.bf16.msra.mxu0 %v5861_v17  ;;  %2328 = vmatpush1.bf16.msra.mxu1 %v5864_v32 }
  0xf8   :  { %2234 = vmatprep.subr.bf16.mxu0 %v5869_v12  ;;  %2360 = vmatprep.subr.bf16.mxu1 %v5872_v13 }
 0x18c   :  { %v1116_v27 = vpop.f32.mrb[0].mxu0  ;;  %v1242_v43 = vpop.f32.mrb[0].mxu1 }
 0x18d   :  { %v5377_v47 = vadd.f32 %v1116_v27, %v6665_v23  ;;  %v5389_v28 = vadd.f32 %v1242_v43, %v6668_v46  ;;  %v1118_v29 = vpop.f32.mrb[1].mxu0  ;;  %v1244_v30 = vpop.f32.mrb[1].mxu1  ;;  %v5870_v27 = vld [vmem:[#allocation5 + $0x608] ss:$16 sps:$4 sm:$0xff]  }
 0x18e   :  { %v5378_v31 = vadd.f32 %v1118_v29, %v6671_v33  ;;  %v5390_v36 = vadd.f32 %v1244_v30, %v6674_v35  ;;  %v1120_v40 = vpop.f32.mrb[2].mxu0  ;;  %v1246_v48 = vpop.f32.mrb[2].mxu1  ;;  %v5875_v29 = vld [vmem:[#allocation5 + $0x624] ss:$16 sps:$4 sm:$0xff]   ;;  %v5878_v30 = vld [vmem:[#allocation5 + $0x62c] ss:$16 sps:$4 sm:$0xff]  }
 0x18f   :  { %vm1271_vm0 = vcmp.ge.f32.partialorder %v5377_v47, 0.0  ;;  %v1295_v50 = vmul.f32 0.2, %v5377_v47  ;;  %vm1273_vm1 = vcmp.ge.f32.partialorder %v5389_v28, 0.0  ;;  %v1297_v41 = vmul.f32 0.2, %v5389_v28 }
 0x190   :  { %vm1272_vm2 = vcmp.ge.f32.partialorder %v5378_v31, 0.0  ;;  %v1296_v45 = vmul.f32 0.2, %v5378_v31  ;;  %v1298_v51 = vmul.f32 0.2, %v5390_v36  ;;  %v5379_v54 = vadd.f32 %v1120_v40, %v6665_v23  ;;  %v1122_v15 = vpop.f32.mrb[3].mxu0 }
 0x191   :  { %v1319_v52 = vsel %vm1271_vm0, %v5377_v47, %v1295_v50  ;;  %v1321_v53 = vsel %vm1273_vm1, %v5389_v28, %v1297_v41  ;;  %v5391_v55 = vadd.f32 %v1246_v48, %v6668_v46  ;;  %v1248_v56 = vpop.f32.mrb[3].mxu1  ;;  %vm1274_vm3 = vcmp.ge.f32.partialorder %v5390_v36, 0.0 }
 0x192   :  { %v1320_v16 = vsel %vm1272_vm2, %v5378_v31, %v1296_v45  ;;  %v1343_v60 = vmul.f32 1.4142135, %v1319_v52  ;;  %v1345_v61 = vmul.f32 1.4142135, %v1321_v53  ;;  %vm1275_vm4 = vcmp.ge.f32.partialorder %v5379_v54, 0.0 }
 0x193   :  { %vm1277_vm5 = vcmp.ge.f32.partialorder %v5391_v55, 0.0  ;;  %v1299_v62 = vmul.f32 0.2, %v5379_v54  ;;  %v1301_v63 = vmul.f32 0.2, %v5391_v55  ;;  %v5380_v0 = vadd.f32 %v1122_v15, %v6671_v33 }
 0x194   :  { %v5392_v1 = vadd.f32 %v1248_v56, %v6674_v35  ;;  %v1126_v2 = vpop.f32.mrb[4].mxu0  ;;  %v1252_v57 = vpop.f32.mrb[4].mxu1  ;;  %v1344_v58 = vmul.f32 1.4142135, %v1320_v16  ;;  %v1322_v3 = vsel %vm1274_vm3, %v5390_v36, %v1298_v51  ;;  %v5876_v15 = vld [vmem:[#allocation5 + $0x628] ss:$16 sps:$4 sm:$0xff]  }
 0x195   :  { %v5381_v4 = vadd.f32 %v1126_v2, %v6665_v23  ;;  %v1128_v5 = vpop.f32.mrb[5].mxu0  ;;  %v6686_v6 = vadd.f32 %v1252_v57, %v6668_v46  ;;  %v6688_v7 = vpop.f32.mrb[5].mxu1  ;;  %v1323_v49 = vsel %vm1275_vm4, %v5379_v54, %v1299_v62  ;;  %v1325_v34 = vsel %vm1277_vm5, %v5391_v55, %v1301_v63  ;;  %v5873_v55 = vld [vmem:[#allocation5 + $0x620] ss:$16 sps:$4 sm:$0xff]   ;;  %v5881_v2 = vld [vmem:[#allocation5 + $0x644] ss:$16 sps:$4 sm:$0xff]  }
 0x196   :  { %vm1276_vm6 = vcmp.ge.f32.partialorder %v5380_v0, 0.0  ;;  %v1300_v8 = vmul.f32 0.2, %v5380_v0  ;;  %v1130_v9 = vpop.f32.mrb[6].mxu0  ;;  %v6690_v59 = vpop.f32.mrb[6].mxu1  ;;  %vm1278_vm7 = vcmp.ge.f32.partialorder %v5392_v1, 0.0  ;;  %v5382_v11 = vadd.f32 %v1128_v5, %v6671_v33 }
 0x197   :  { %v1347_v44 = vmul.f32 1.4142135, %v1323_v49  ;;  %v1349_v10 = vmul.f32 1.4142135, %v1325_v34  ;;  %vm1279_vm8 = vcmp.ge.f32.partialorder %v5381_v4, 0.0  ;;  %v1132_v24 = vpop.f32.mrb[7].mxu0  ;;  %v5383_v12 = vadd.f32 %v1130_v9, %v6665_v23 }
 0x198   :  { %v1324_v37 = vsel %vm1276_vm6, %v5380_v0, %v1300_v8  ;;  %v1302_v38 = vmul.f32 0.2, %v5392_v1  ;;  %v1303_v39 = vmul.f32 0.2, %v5381_v4  ;;  %v6693_v42 = vpop.f32.mrb[7].mxu1  ;;  %vm1280_vm9 = vcmp.ge.f32.partialorder %v5382_v11, 0.0 }
 0x199   :  { %v1367_v25 = vpack.c.bf16 %v1347_v44, %v1343_v60  ;;  %v6695_v17 = vpack.c.bf16 %v1349_v10, %v1345_v61  ;;  %v1348_v32 = vmul.f32 1.4142135, %v1324_v37  ;;  %v1304_v20 = vmul.f32 0.2, %v5382_v11  ;;  %v5884_v8 = vld [vmem:[#allocation5 + $0x64c] ss:$16 sps:$4 sm:$0xff]  }
 0x19a   :  { %v1326_v13 = vsel %vm1278_vm7, %v5392_v1, %v1302_v38  ;;  %v1327_v14 = vsel %vm1279_vm8, %v5381_v4, %v1303_v39  ;;  %v1346_v43 = vmul.f32 1.4142135, %v1322_v3  ;;  %vm1283_vm10 = vcmp.ge.f32.partialorder %v5383_v12, 0.0  ;;  %v5879_v38 = vld [vmem:[#allocation5 + $0x640] ss:$16 sps:$4 sm:$0xff]  }
 0x19b   :  { %v1350_v47 = vmul.f32 1.4142135, %v1326_v13  ;;  %v5384_v28 = vadd.f32 %v1132_v24, %v6671_v33  ;;  %v1351_v31 = vmul.f32 1.4142135, %v1327_v14  ;;  %v1328_v36 = vsel %vm1280_vm9, %v5382_v11, %v1304_v20 }
 0x19c   :  { %v1307_v40 = vmul.f32 0.2, %v5383_v12  ;;  %v1368_v48 = vpack.c.bf16 %v1348_v32, %v1344_v58  ;;  %v1136_v50 = vpop.f32.mrb[8].mxu0  ;;  %v6699_v41 = vpop.f32.mrb[8].mxu1  ;;  %vm1281_vm12 = vcmp.ge.f32.partialorder %v6686_v6, 0.0  ;;  %v5394_v13 = vadd.f32 %v6688_v7, %v6674_v35 }
 0x19d   :  { %vm1284_vm11 = vcmp.ge.f32.partialorder %v5384_v28, 0.0  ;;  %v1308_v45 = vmul.f32 0.2, %v5384_v28  ;;  %v5385_v51 = vadd.f32 %v1136_v50, %v6665_v23  ;;  %v1138_v52 = vpop.f32.mrb[9].mxu0  ;;  %v6704_v16 = vpack.c.bf16 %v1350_v47, %v1346_v43  ;;  %v6707_v61 = vpop.f32.mrb[9].mxu1 }
 0x19e   :  { %v1331_v53 = vsel %vm1283_vm10, %v5383_v12, %v1307_v40  ;;  %2203 = vmatprep.mubr.bf16.mxu0 %v1368_v48  ;;  %2329 = vmatprep.mubr.bf16.mxu1 %v1368_v48  ;;  %v5386_v54 = vadd.f32 %v1138_v52, %v6671_v33  ;;  %v1140_v56 = vpop.f32.mrb[10].mxu0  ;;  %v1305_v60 = vmul.f32 0.2, %v6686_v6  ;;  %v6711_v4 = vpop.f32.mrb[10].mxu1  ;;  %v1352_v5 = vmul.f32 1.4142135, %v1328_v36 }
 0x19f   :  { %v1355_v62 = vmul.f32 1.4142135, %v1331_v53  ;;  %v1332_v63 = vsel %vm1284_vm11, %v5384_v28, %v1308_v45  ;;  %2204 = vmatmul.mubr.bf16.vlgmr.msra.gmra.mrb[12].mxu0 %v1367_v25  ;;  %2330 = vmatmul.mubr.bf16.vlgmr.msra.gmra.mrb[12].mxu1 %v1367_v25  ;;  %vm1287_vm13 = vcmp.ge.f32.partialorder %v5385_v51, 0.0  ;;  %v1311_v0 = vmul.f32 0.2, %v5385_v51  ;;  %v1142_v1 = vpop.f32.mrb[11].mxu0 }
 0x1a0   :  { %v1356_v57 = vmul.f32 1.4142135, %v1332_v63  ;;  %2235 = vmatpush1.bf16.msra.mxu0 %v5867_v21  ;;  %2361 = vmatpush1.bf16.msra.mxu1 %v5870_v27  ;;  %vm1288_vm14 = vcmp.ge.f32.partialorder %v5386_v54, 0.0  ;;  %v1312_v58 = vmul.f32 0.2, %v5386_v54  ;;  %v5387_v3 = vadd.f32 %v1140_v56, %v6665_v23  ;;  %v1268_v44 = vpop.f32.mrb[11].mxu1 }
 0x1a1   :  { %v1335_v49 = vsel %vm1287_vm13, %v5385_v51, %v1311_v0  ;;  %2236 = vmatprep.subr.bf16.mxu0 %v5875_v29  ;;  %2362 = vmatprep.subr.bf16.mxu1 %v5878_v30  ;;  %v5388_v34 = vadd.f32 %v1142_v1, %v6671_v33  ;;  %v1371_v9 = vpack.c.bf16 %v1355_v62, %v1351_v31  ;;  %v5882_v32 = vld [vmem:[#allocation5 + $0x648] ss:$16 sps:$4 sm:$0xff]   ;;  %v5887_v12 = vld [vmem:[#allocation5 + $0x664] ss:$16 sps:$4 sm:$0xff]   ;;  %v5890_v21 = vld [vmem:[#allocation5 + $0x66c] ss:$16 sps:$4 sm:$0xff]  }
 0x1a2   :  { %v1336_v10 = vsel %vm1288_vm14, %v5386_v54, %v1312_v58  ;;  %vm1291_vm15 = vcmp.ge.f32.partialorder %v5387_v3, 0.0  ;;  %v1315_v37 = vmul.f32 0.2, %v5387_v3  ;;  %v1359_v39 = vmul.f32 1.4142135, %v1335_v49 }
 0x1a3   :  { %vm1292_vm0 = vcmp.ge.f32.partialorder %v5388_v34, 0.0  ;;  %v1316_v11 = vmul.f32 0.2, %v5388_v34  ;;  %v1372_v24 = vpack.c.bf16 %v1356_v57, %v1352_v5  ;;  %v1360_v23 = vmul.f32 1.4142135, %v1336_v10 }
 0x1a4   :  { %v1339_v25 = vsel %vm1291_vm15, %v5387_v3, %v1315_v37  ;;  %2237 = vmatpush1.bf16.msra.mxu0 %v5873_v55  ;;  %2363 = vmatpush1.bf16.msra.mxu1 %v5876_v15  ;;  %v1329_v33 = vsel %vm1281_vm12, %v6686_v6, %v1305_v60  ;;  %v5395_v43 = vadd.f32 %v6690_v59, %v6668_v46  ;;  %v5885_v28 = vld [vmem:[#allocation5 + $0x660] ss:$16 sps:$4 sm:$0xff]   ;;  %v5888_v29 = vld [vmem:[#allocation5 + $0x668] ss:$16 sps:$4 sm:$0xff]   ;;  %vm1282_vm1 = vcmp.ge.f32.partialorder %v5394_v13, 0.0 }
 0x1a5   :  { %v1363_v14 = vmul.f32 1.4142135, %v1339_v25  ;;  %v1340_v20 = vsel %vm1292_vm0, %v5388_v34, %v1316_v11  ;;  %2213 = vmatprep.mubr.bf16.mxu0 %v1372_v24  ;;  %2238 = vmatprep.subr.bf16.mxu0 %v5881_v2  ;;  %v1353_v27 = vmul.f32 1.4142135, %v1329_v33  ;;  %v1306_v30 = vmul.f32 0.2, %v5394_v13 }
 0x1a6   :  { %v1364_v47 = vmul.f32 1.4142135, %v1340_v20  ;;  %2339 = vmatprep.mubr.bf16.mxu1 %v1372_v24  ;;  %2364 = vmatprep.subr.bf16.mxu1 %v5884_v8  ;;  %v5396_v6 = vadd.f32 %v6693_v42, %v6674_v35  ;;  %v5893_v7 = vld [vmem:[#allocation5 + $0x684] ss:$16 sps:$4 sm:$0xff]   ;;  %vm1285_vm2 = vcmp.ge.f32.partialorder %v5395_v43, 0.0  ;;  %v5397_v40 = vadd.f32 %v6699_v41, %v6668_v46 }
 0x1a7   :  { %2214 = vmatmul.mubr.bf16.gmra.mrb[16].mxu0 %v1371_v9  ;;  %2340 = vmatmul.mubr.bf16.gmra.mrb[16].mxu1 %v1371_v9  ;;  %v1375_v31 = vpack.c.bf16 %v1363_v14, %v1359_v39  ;;  %v1309_v36 = vmul.f32 0.2, %v5395_v43  ;;  %v5896_v48 = vld [vmem:[#allocation5 + $0x68c] ss:$16 sps:$4 sm:$0xff]   ;;  %v1330_v50 = vsel %vm1282_vm1, %v5394_v13, %v1306_v30  ;;  %v5398_v41 = vadd.f32 %v6707_v61, %v6674_v35  ;;  %v5891_v15 = vld [vmem:[#allocation5 + $0x680] ss:$16 sps:$4 sm:$0xff]  }
 0x1a8   :  { %2239 = vmatpush1.bf16.msra.mxu0 %v5879_v38  ;;  %2365 = vmatpush1.bf16.msra.mxu1 %v5882_v32  ;;  %v1376_v59 = vpack.c.bf16 %v1364_v47, %v1360_v23  ;;  %vm1286_vm3 = vcmp.ge.f32.partialorder %v5396_v6, 0.0  ;;  %v1310_v45 = vmul.f32 0.2, %v5396_v6  ;;  %v1354_v51 = vmul.f32 1.4142135, %v1330_v50 }
 0x1a9   :  { %2240 = vmatprep.subr.bf16.mxu0 %v5887_v12  ;;  %2366 = vmatprep.subr.bf16.mxu1 %v5890_v21  ;;  %v1333_v42 = vsel %vm1285_vm2, %v5395_v43, %v1309_v36  ;;  %vm1289_vm4 = vcmp.ge.f32.partialorder %v5397_v40, 0.0  ;;  %v1313_v52 = vmul.f32 0.2, %v5397_v40  ;;  %v5399_v55 = vadd.f32 %v6711_v4, %v6668_v46  ;;  %v5894_v63 = vld [vmem:[#allocation5 + $0x688] ss:$16 sps:$4 sm:$0xff]  }
 0x1aa   :  { %2223 = vmatprep.mubr.bf16.mxu0 %v1376_v59  ;;  %2349 = vmatprep.mubr.bf16.mxu1 %v1376_v59  ;;  %v1357_v53 = vmul.f32 1.4142135, %v1333_v42  ;;  %v1334_v54 = vsel %vm1286_vm3, %v5396_v6, %v1310_v45  ;;  %v5400_v62 = vadd.f32 %v1268_v44, %v6674_v35  ;;  %vm1290_vm5 = vcmp.ge.f32.partialorder %v5398_v41, 0.0  ;;  %v5899_v57 = vld [vmem:[#allocation5 + $0x6a4] ss:$16 sps:$4 sm:$0xff]  }
 0x1ab   :  { %v1358_v56 = vmul.f32 1.4142135, %v1334_v54  ;;  %v1337_v60 = vsel %vm1289_vm4, %v5397_v40, %v1313_v52  ;;  %v1314_v0 = vmul.f32 0.2, %v5398_v41  ;;  %vm1293_vm6 = vcmp.ge.f32.partialorder %v5399_v55, 0.0 }
 0x1ac   :  { %2241 = vmatpush1.bf16.msra.mxu0 %v5885_v28  ;;  %2367 = vmatpush1.bf16.msra.mxu1 %v5888_v29  ;;  %v1317_v1 = vmul.f32 0.2, %v5399_v55  ;;  %vm1294_vm7 = vcmp.ge.f32.partialorder %v5400_v62, 0.0  ;;  %v1318_v2 = vmul.f32 0.2, %v5400_v62  ;;  %v6732_v4 = vpack.c.bf16 %v1357_v53, %v1353_v27 }
 0x1ad   :  { %2242 = vmatprep.subr.bf16.mxu0 %v5893_v7  ;;  %2368 = vmatprep.subr.bf16.mxu1 %v5896_v48  ;;  %v6730_v61 = vpack.c.bf16 %v1358_v56, %v1354_v51  ;;  %v5902_v46 = vld [vmem:[#allocation5 + $0x6ac] ss:$16 sps:$4 sm:$0xff]   ;;  %v1361_v58 = vmul.f32 1.4142135, %v1337_v60  ;;  %v1338_v3 = vsel %vm1290_vm5, %v5398_v41, %v1314_v0  ;;  %v5897_v35 = vld [vmem:[#allocation5 + $0x6a0] ss:$16 sps:$4 sm:$0xff]  }
 0x1ae   :  { %v1362_v5 = vmul.f32 1.4142135, %v1338_v3  ;;  %v1341_v49 = vsel %vm1293_vm6, %v5399_v55, %v1317_v1  ;;  %v1342_v34 = vsel %vm1294_vm7, %v5400_v62, %v1318_v2  ;;  %v5900_v8 = vld [vmem:[#allocation5 + $0x6a8] ss:$16 sps:$4 sm:$0xff]   ;;  %v5905_v10 = vld [vmem:[#allocation5 + $0x6c4] ss:$16 sps:$4 sm:$0xff]  }
 0x1af   :  { %2224 = vmatmul.mubr.bf16.gmra.mrb[20].mxu0 %v1375_v31  ;;  %2350 = vmatmul.mubr.bf16.gmra.mrb[20].mxu1 %v1375_v31  ;;  %v1365_v9 = vmul.f32 1.4142135, %v1341_v49  ;;  %v1366_v44 = vmul.f32 1.4142135, %v1342_v34  ;;  %v5908_v37 = vld [vmem:[#allocation5 + $0x6cc] ss:$16 sps:$4 sm:$0xff]  }
 0x1b0   :  { %2243 = vmatpush1.bf16.msra.mxu0 %v5891_v15  ;;  %2369 = vmatpush1.bf16.msra.mxu1 %v5894_v63  ;;  %v5903_v11 = vld [vmem:[#allocation5 + $0x6c0] ss:$16 sps:$4 sm:$0xff]   ;;  %v5906_v24 = vld [vmem:[#allocation5 + $0x6c8] ss:$16 sps:$4 sm:$0xff]   ;;  %v5911_v23 = vld [vmem:[#allocation5 + $0x6e4] ss:$16 sps:$4 sm:$0xff]  }
 0x1b1   :  { %2266 = vmatprep.mubr.bf16.mxu0 %v6704_v16  ;;  %2392 = vmatprep.mubr.bf16.mxu1 %v6704_v16  ;;  %v6737_v38 = vpack.c.bf16 %v1366_v44, %v1362_v5  ;;  %v6739_v39 = vpack.c.bf16 %v1365_v9, %v1361_v58  ;;  %v5914_v25 = vld [vmem:[#allocation5 + $0x6ec] ss:$16 sps:$4 sm:$0xff]   ;;  %v5909_v32 = vld [vmem:[#allocation5 + $0x6e0] ss:$16 sps:$4 sm:$0xff]   ;;  %v5912_v16 = vld [vmem:[#allocation5 + $0x6e8] ss:$16 sps:$4 sm:$0xff]  }
 0x1b2   :  { %2244 = vmatprep.subr.bf16.mxu0 %v5899_v57  ;;  %2370 = vmatprep.subr.bf16.mxu1 %v5902_v46  ;;  %v5917_v12 = vld [vmem:[#allocation5 + $0x704] ss:$16 sps:$4 sm:$0xff]   ;;  %v5920_v33 = vld [vmem:[#allocation5 + $0x70c] ss:$16 sps:$4 sm:$0xff]   ;;  %v5915_v13 = vld [vmem:[#allocation5 + $0x700] ss:$16 sps:$4 sm:$0xff]  }
 0x1b3   :  { %v5918_v14 = vld [vmem:[#allocation5 + $0x708] ss:$16 sps:$4 sm:$0xff]   ;;  %v5923_v20 = vld [vmem:[#allocation5 + $0x724] ss:$16 sps:$4 sm:$0xff]   ;;  %v5926_v21 = vld [vmem:[#allocation5 + $0x72c] ss:$16 sps:$4 sm:$0xff]  }
 0x1b4   :  { %2245 = vmatpush1.bf16.msra.mxu0 %v5897_v35  ;;  %2371 = vmatpush1.bf16.msra.mxu1 %v5900_v8  ;;  %v5921_v27 = vld [vmem:[#allocation5 + $0x720] ss:$16 sps:$4 sm:$0xff]   ;;  %v5924_v43 = vld [vmem:[#allocation5 + $0x728] ss:$16 sps:$4 sm:$0xff]   ;;  %v5929_v47 = vld [vmem:[#allocation5 + $0x744] ss:$16 sps:$4 sm:$0xff]  }
 0x1b5   :  { %2246 = vmatprep.subr.bf16.mxu0 %v5905_v10  ;;  %2372 = vmatprep.subr.bf16.mxu1 %v5908_v37  ;;  %v5932_v28 = vld [vmem:[#allocation5 + $0x74c] ss:$16 sps:$4 sm:$0xff]   ;;  %v5927_v29 = vld [vmem:[#allocation5 + $0x740] ss:$16 sps:$4 sm:$0xff]   ;;  %v5930_v30 = vld [vmem:[#allocation5 + $0x748] ss:$16 sps:$4 sm:$0xff]  }
 0x1b6   :  { %v5935_v6 = vld [vmem:[#allocation5 + $0x764] ss:$16 sps:$4 sm:$0xff]   ;;  %v5938_v7 = vld [vmem:[#allocation5 + $0x76c] ss:$16 sps:$4 sm:$0xff]   ;;  %v5933_v31 = vld [vmem:[#allocation5 + $0x760] ss:$16 sps:$4 sm:$0xff]  }
 0x1b7   :  { %v5936_v36 = vld [vmem:[#allocation5 + $0x768] ss:$16 sps:$4 sm:$0xff]   ;;  %v5941_v40 = vld [vmem:[#allocation5 + $0x784] ss:$16 sps:$4 sm:$0xff]   ;;  %v5944_v59 = vld [vmem:[#allocation5 + $0x78c] ss:$16 sps:$4 sm:$0xff]  }
 0x1b8   :  { %2247 = vmatpush1.bf16.msra.mxu0 %v5903_v11  ;;  %2373 = vmatpush1.bf16.msra.mxu1 %v5906_v24  ;;  %v5939_v48 = vld [vmem:[#allocation5 + $0x780] ss:$16 sps:$4 sm:$0xff]   ;;  %v5942_v50 = vld [vmem:[#allocation5 + $0x788] ss:$16 sps:$4 sm:$0xff]   ;;  %v5947_v45 = vld [vmem:[#allocation5 + $0x7a4] ss:$16 sps:$4 sm:$0xff]  }
 0x1b9   :  { %2248 = vmatprep.subr.bf16.mxu0 %v5911_v23  ;;  %2374 = vmatprep.subr.bf16.mxu1 %v5914_v25  ;;  %v5950_v51 = vld [vmem:[#allocation5 + $0x7ac] ss:$16 sps:$4 sm:$0xff]   ;;  %v5945_v42 = vld [vmem:[#allocation5 + $0x7a0] ss:$16 sps:$4 sm:$0xff]   ;;  %v5948_v52 = vld [vmem:[#allocation5 + $0x7a8] ss:$16 sps:$4 sm:$0xff]  }
 0x1ba   :  { %v5953_v53 = vld [vmem:[#allocation5 + $0x7c4] ss:$16 sps:$4 sm:$0xff]   ;;  %v5956_v54 = vld [vmem:[#allocation5 + $0x7cc] ss:$16 sps:$4 sm:$0xff]   ;;  %v5951_v41 = vld [vmem:[#allocation5 + $0x7c0] ss:$16 sps:$4 sm:$0xff]  }
 0x1bb   :  { %v5954_v55 = vld [vmem:[#allocation5 + $0x7c8] ss:$16 sps:$4 sm:$0xff]   ;;  %v5959_v15 = vld [vmem:[#allocation5 + $0x7e4] ss:$16 sps:$4 sm:$0xff]   ;;  %v5962_v56 = vld [vmem:[#allocation5 + $0x7ec] ss:$16 sps:$4 sm:$0xff]  }
 0x1bc   :  { %2249 = vmatpush1.bf16.msra.mxu0 %v5909_v32  ;;  %2375 = vmatpush1.bf16.msra.mxu1 %v5912_v16  ;;  %v5957_v60 = vld [vmem:[#allocation5 + $0x7e0] ss:$16 sps:$4 sm:$0xff]   ;;  %v5960_v62 = vld [vmem:[#allocation5 + $0x7e8] ss:$16 sps:$4 sm:$0xff]   ;;  %v5965_v63 = vld [vmem:[#allocation5 + $0x804] ss:$16 sps:$4 sm:$0xff]  }
 0x1bd   :  { %2250 = vmatprep.subr.bf16.mxu0 %v5917_v12  ;;  %2376 = vmatprep.subr.bf16.mxu1 %v5920_v33  ;;  %v5968_v0 = vld [vmem:[#allocation5 + $0x80c] ss:$16 sps:$4 sm:$0xff]   ;;  %v5963_v1 = vld [vmem:[#allocation5 + $0x800] ss:$16 sps:$4 sm:$0xff]   ;;  %v5966_v2 = vld [vmem:[#allocation5 + $0x808] ss:$16 sps:$4 sm:$0xff]  }
 0x1be   :  { %v5971_v57 = vld [vmem:[#allocation5 + $0x824] ss:$16 sps:$4 sm:$0xff]   ;;  %v5974_v46 = vld [vmem:[#allocation5 + $0x82c] ss:$16 sps:$4 sm:$0xff]   ;;  %v5969_v58 = vld [vmem:[#allocation5 + $0x820] ss:$16 sps:$4 sm:$0xff]  }
 0x1bf   :  { %v5972_v3 = vld [vmem:[#allocation5 + $0x828] ss:$16 sps:$4 sm:$0xff]   ;;  %v5977_v35 = vld [vmem:[#allocation5 + $0x844] ss:$16 sps:$4 sm:$0xff]   ;;  %v5980_v5 = vld [vmem:[#allocation5 + $0x84c] ss:$16 sps:$4 sm:$0xff]  }
 0x1c0   :  { %2251 = vmatpush1.bf16.msra.mxu0 %v5915_v13  ;;  %2377 = vmatpush1.bf16.msra.mxu1 %v5918_v14  ;;  %v5975_v49 = vld [vmem:[#allocation5 + $0x840] ss:$16 sps:$4 sm:$0xff]   ;;  %v5978_v34 = vld [vmem:[#allocation5 + $0x848] ss:$16 sps:$4 sm:$0xff]   ;;  %v5983_v8 = vld [vmem:[#allocation5 + $0x864] ss:$16 sps:$4 sm:$0xff]  }
 0x1c1   :  { %2252 = vmatprep.subr.bf16.mxu0 %v5923_v20  ;;  %2378 = vmatprep.subr.bf16.mxu1 %v5926_v21  ;;  %v5984_v9 = vld [vmem:[#allocation5 + $0x868] ss:$16 sps:$4 sm:$0xff]   ;;  %v5989_v44 = vld [vmem:[#allocation5 + $0x884] ss:$16 sps:$4 sm:$0xff]   ;;  %v5992_v10 = vld [vmem:[#allocation5 + $0x88c] ss:$16 sps:$4 sm:$0xff]  }
 0x1c2   :  { %v5987_v37 = vld [vmem:[#allocation5 + $0x880] ss:$16 sps:$4 sm:$0xff]   ;;  %v5990_v11 = vld [vmem:[#allocation5 + $0x888] ss:$16 sps:$4 sm:$0xff]   ;;  %v5995_v24 = vld [vmem:[#allocation5 + $0x8a4] ss:$16 sps:$4 sm:$0xff]  }
 0x1c3   :  { %v5996_v23 = vld [vmem:[#allocation5 + $0x8a8] ss:$16 sps:$4 sm:$0xff]   ;;  %v6001_v25 = vld [vmem:[#allocation5 + $0x8c4] ss:$16 sps:$4 sm:$0xff]   ;;  %v6004_v32 = vld [vmem:[#allocation5 + $0x8cc] ss:$16 sps:$4 sm:$0xff]  }
 0x1c4   :  { %2253 = vmatpush1.bf16.msra.mxu0 %v5921_v27  ;;  %2379 = vmatpush1.bf16.msra.mxu1 %v5924_v43  ;;  %v5999_v16 = vld [vmem:[#allocation5 + $0x8c0] ss:$16 sps:$4 sm:$0xff]   ;;  %v6002_v12 = vld [vmem:[#allocation5 + $0x8c8] ss:$16 sps:$4 sm:$0xff]   ;;  %v6007_v33 = vld [vmem:[#allocation5 + $0x8e4] ss:$16 sps:$4 sm:$0xff]  }
 0x1c5   :  { %2254 = vmatprep.subr.bf16.mxu0 %v5929_v47  ;;  %2380 = vmatprep.subr.bf16.mxu1 %v5932_v28  ;;  %v6010_v13 = vld [vmem:[#allocation5 + $0x8ec] ss:$16 sps:$4 sm:$0xff]   ;;  %v6005_v14 = vld [vmem:[#allocation5 + $0x8e0] ss:$16 sps:$4 sm:$0xff]   ;;  %v6013_v20 = vld [vmem:[#allocation5 + $0x904] ss:$16 sps:$4 sm:$0xff]  }
 0x1c6   :  { %v6016_v21 = vld [vmem:[#allocation5 + $0x90c] ss:$16 sps:$4 sm:$0xff]   ;;  %v6011_v27 = vld [vmem:[#allocation5 + $0x900] ss:$16 sps:$4 sm:$0xff]   ;;  %v6014_v43 = vld [vmem:[#allocation5 + $0x908] ss:$16 sps:$4 sm:$0xff]  }
 0x1c7   :  { %v6019_v47 = vld [vmem:[#allocation5 + $0x924] ss:$16 sps:$4 sm:$0xff]   ;;  %v6022_v28 = vld [vmem:[#allocation5 + $0x92c] ss:$16 sps:$4 sm:$0xff]  }
 0x1c8   :  { %2255 = vmatpush1.bf16.msra.mxu0 %v5927_v29  ;;  %2381 = vmatpush1.bf16.msra.mxu1 %v5930_v30  ;;  %v6017_v29 = vld [vmem:[#allocation5 + $0x920] ss:$16 sps:$4 sm:$0xff]   ;;  %v6020_v30 = vld [vmem:[#allocation5 + $0x928] ss:$16 sps:$4 sm:$0xff]  }
 0x1c9   :  { %2256 = vmatprep.subr.bf16.mxu0 %v5935_v6  ;;  %2382 = vmatprep.subr.bf16.mxu1 %v5938_v7  ;;  %v6025_v6 = vld [vmem:[#allocation5 + $0x944] ss:$16 sps:$4 sm:$0xff]   ;;  %v6028_v7 = vld [vmem:[#allocation5 + $0x94c] ss:$16 sps:$4 sm:$0xff]  }
 0x1cc   :  { %2257 = vmatpush1.bf16.msra.mxu0 %v5933_v31  ;;  %2383 = vmatpush1.bf16.msra.mxu1 %v5936_v36  ;;  %v6023_v31 = vld [vmem:[#allocation5 + $0x940] ss:$16 sps:$4 sm:$0xff]   ;;  %v6026_v36 = vld [vmem:[#allocation5 + $0x948] ss:$16 sps:$4 sm:$0xff]  }
 0x1cd   :  { %2258 = vmatprep.subr.bf16.mxu0 %v5941_v40  ;;  %2384 = vmatprep.subr.bf16.mxu1 %v5944_v59  ;;  %v6031_v40 = vld [vmem:[#allocation5 + $0x964] ss:$16 sps:$4 sm:$0xff]   ;;  %v6034_v59 = vld [vmem:[#allocation5 + $0x96c] ss:$16 sps:$4 sm:$0xff]  }
 0x1d0   :  { %2259 = vmatpush1.bf16.msra.mxu0 %v5939_v48  ;;  %2385 = vmatpush1.bf16.msra.mxu1 %v5942_v50  ;;  %v6029_v48 = vld [vmem:[#allocation5 + $0x960] ss:$16 sps:$4 sm:$0xff]   ;;  %v6032_v50 = vld [vmem:[#allocation5 + $0x968] ss:$16 sps:$4 sm:$0xff]  }
 0x1d1   :  { %2260 = vmatprep.subr.bf16.mxu0 %v5947_v45  ;;  %2386 = vmatprep.subr.bf16.mxu1 %v5950_v51  ;;  %v6037_v45 = vld [vmem:[#allocation5 + $0x984] ss:$16 sps:$4 sm:$0xff]   ;;  %v6040_v51 = vld [vmem:[#allocation5 + $0x98c] ss:$16 sps:$4 sm:$0xff]  }
 0x1d4   :  { %2261 = vmatpush1.bf16.msra.mxu0 %v5945_v42  ;;  %2387 = vmatpush1.bf16.msra.mxu1 %v5948_v52  ;;  %v6035_v42 = vld [vmem:[#allocation5 + $0x980] ss:$16 sps:$4 sm:$0xff]   ;;  %v6038_v52 = vld [vmem:[#allocation5 + $0x988] ss:$16 sps:$4 sm:$0xff]  }
 0x1d5   :  { %2262 = vmatprep.subr.bf16.mxu0 %v5953_v53  ;;  %2388 = vmatprep.subr.bf16.mxu1 %v5956_v54  ;;  %v6043_v53 = vld [vmem:[#allocation5 + $0x9a4] ss:$16 sps:$4 sm:$0xff]   ;;  %v6046_v54 = vld [vmem:[#allocation5 + $0x9ac] ss:$16 sps:$4 sm:$0xff]  }
 0x1d8   :  { %2263 = vmatpush1.bf16.msra.mxu0 %v5951_v41  ;;  %2389 = vmatpush1.bf16.msra.mxu1 %v5954_v55  ;;  %v6041_v41 = vld [vmem:[#allocation5 + $0x9a0] ss:$16 sps:$4 sm:$0xff]   ;;  %v6044_v55 = vld [vmem:[#allocation5 + $0x9a8] ss:$16 sps:$4 sm:$0xff]  }
 0x1d9   :  { %2264 = vmatprep.subr.bf16.mxu0 %v5959_v15  ;;  %2390 = vmatprep.subr.bf16.mxu1 %v5962_v56  ;;  %v6049_v15 = vld [vmem:[#allocation5 + $0x9c4] ss:$16 sps:$4 sm:$0xff]   ;;  %v6052_v56 = vld [vmem:[#allocation5 + $0x9cc] ss:$16 sps:$4 sm:$0xff]  }
 0x1dc   :  { %2265 = vmatpush1.bf16.msra.mxu0 %v5957_v60  ;;  %2391 = vmatpush1.bf16.msra.mxu1 %v5960_v62  ;;  %v6047_v60 = vld [vmem:[#allocation5 + $0x9c0] ss:$16 sps:$4 sm:$0xff]   ;;  %v6050_v62 = vld [vmem:[#allocation5 + $0x9c8] ss:$16 sps:$4 sm:$0xff]  }
 0x1dd   :  { %3323 = vmatprep.subr.bf16.mxu0 %v5965_v63  ;;  %3449 = vmatprep.subr.bf16.mxu1 %v5968_v0  ;;  %v6055_v63 = vld [vmem:[#allocation5 + $0x9e4] ss:$16 sps:$4 sm:$0xff]   ;;  %v6058_v0 = vld [vmem:[#allocation5 + $0x9ec] ss:$16 sps:$4 sm:$0xff]  }
 0x1df   :  { %2267 = vmatmul.mubr.bf16.vlgmr.msra.gmra.mrb[12].mxu0 %v6695_v17  ;;  %2393 = vmatmul.mubr.bf16.vlgmr.msra.gmra.mrb[12].mxu1 %v6695_v17  ;;  %v5986_v17 = vld [vmem:[#allocation5 + $0x86c] ss:$16 sps:$4 sm:$0xff]  }
 0x1e0   :  { %2276 = vmatprep.mubr.bf16.mxu0 %v6730_v61  ;;  %2402 = vmatprep.mubr.bf16.mxu1 %v6730_v61  ;;  %v5981_v61 = vld [vmem:[#allocation5 + $0x860] ss:$16 sps:$4 sm:$0xff]  }
 0x1e1   :  { %3324 = vmatpush1.bf16.msra.mxu0 %v5963_v1  ;;  %3450 = vmatpush1.bf16.msra.mxu1 %v5966_v2  ;;  %v6053_v1 = vld [vmem:[#allocation5 + $0x9e0] ss:$16 sps:$4 sm:$0xff]   ;;  %v6056_v2 = vld [vmem:[#allocation5 + $0x9e8] ss:$16 sps:$4 sm:$0xff]  }
 0x1e2   :  { %3325 = vmatprep.subr.bf16.mxu0 %v5971_v57  ;;  %3451 = vmatprep.subr.bf16.mxu1 %v5974_v46  ;;  %v6061_v57 = vld [vmem:[#allocation5 + $0xa04] ss:$16 sps:$4 sm:$0xff]   ;;  %v6064_v46 = vld [vmem:[#allocation5 + $0xa0c] ss:$16 sps:$4 sm:$0xff]  }
 0x1e5   :  { %3326 = vmatpush1.bf16.msra.mxu0 %v5969_v58  ;;  %3452 = vmatpush1.bf16.msra.mxu1 %v5972_v3  ;;  %v1509_v58 = vld [vmem:[#allocation7 + $0x4] sm:$0xf] }
 0x1e6   :  { %3327 = vmatprep.subr.bf16.mxu0 %v5977_v35  ;;  %3453 = vmatprep.subr.bf16.mxu1 %v5980_v5  ;;  %v6752_v3 = vrot.slane %v1509_v58, %v6656_v18  ;;  %v6755_v35 = vrot.slane %v1509_v58, %v6658_v19  ;;  %v6758_v5 = vrot.slane %v1509_v58, %v6660_v22 }
 0x1e7   :  { %2277 = vmatmul.mubr.bf16.gmra.mrb[16].mxu0 %v6732_v4  ;;  %2403 = vmatmul.mubr.bf16.gmra.mrb[16].mxu1 %v6732_v4  ;;  %v5998_v4 = vld [vmem:[#allocation5 + $0x8ac] ss:$16 sps:$4 sm:$0xff]  }
 0x1e8   :  { %2286 = vmatprep.mubr.bf16.mxu0 %v6737_v38  ;;  %2412 = vmatprep.mubr.bf16.mxu1 %v6737_v38  ;;  %v5993_v38 = vld [vmem:[#allocation5 + $0x8a0] ss:$16 sps:$4 sm:$0xff]  }
 0x1e9   :  { %3328 = vmatpush1.bf16.msra.mxu0 %v5975_v49  ;;  %3454 = vmatpush1.bf16.msra.mxu1 %v5978_v34  ;;  %v6761_v49 = vrot.slane %v1509_v58, %v6662_v26 }
 0x1ea   :  { %3329 = vmatprep.subr.bf16.mxu0 %v5983_v8  ;;  %3455 = vmatprep.subr.bf16.mxu1 %v5986_v17 }
 0x1ed   :  { %3330 = vmatpush1.bf16.msra.mxu0 %v5981_v61  ;;  %3456 = vmatpush1.bf16.msra.mxu1 %v5984_v9 }
 0x1ee   :  { %3331 = vmatprep.subr.bf16.mxu0 %v5989_v44  ;;  %3457 = vmatprep.subr.bf16.mxu1 %v5992_v10 }
 0x1ef   :  { %2287 = vmatmul.mubr.bf16.gmra.mrb[20].mxu0 %v6739_v39  ;;  %2413 = vmatmul.mubr.bf16.gmra.mrb[20].mxu1 %v6739_v39  ;;  %v6008_v39 = vld [vmem:[#allocation5 + $0x8e8] ss:$16 sps:$4 sm:$0xff]  }
 0x1f1   :  { %3332 = vmatpush1.bf16.msra.mxu0 %v5987_v37  ;;  %3458 = vmatpush1.bf16.msra.mxu1 %v5990_v11 }
 0x1f2   :  { %3333 = vmatprep.subr.bf16.mxu0 %v5995_v24  ;;  %3459 = vmatprep.subr.bf16.mxu1 %v5998_v4 }
 0x1f5   :  { %3334 = vmatpush1.bf16.msra.mxu0 %v5993_v38  ;;  %3460 = vmatpush1.bf16.msra.mxu1 %v5996_v23 }
 0x1f6   :  { %3335 = vmatprep.subr.bf16.mxu0 %v6001_v25  ;;  %3461 = vmatprep.subr.bf16.mxu1 %v6004_v32 }
 0x1f9   :  { %3336 = vmatpush1.bf16.msra.mxu0 %v5999_v16  ;;  %3462 = vmatpush1.bf16.msra.mxu1 %v6002_v12 }
 0x1fa   :  { %3337 = vmatprep.subr.bf16.mxu0 %v6007_v33  ;;  %3463 = vmatprep.subr.bf16.mxu1 %v6010_v13 }
 0x1fd   :  { %3338 = vmatpush1.bf16.msra.mxu0 %v6005_v14  ;;  %3464 = vmatpush1.bf16.msra.mxu1 %v6008_v39 }
 0x1fe   :  { %3339 = vmatprep.subr.bf16.mxu0 %v6013_v20  ;;  %3465 = vmatprep.subr.bf16.mxu1 %v6016_v21 }
 0x201   :  { %3340 = vmatpush1.bf16.msra.mxu0 %v6011_v27  ;;  %3466 = vmatpush1.bf16.msra.mxu1 %v6014_v43 }
 0x202   :  { %3341 = vmatprep.subr.bf16.mxu0 %v6019_v47  ;;  %3467 = vmatprep.subr.bf16.mxu1 %v6022_v28 }
 0x205   :  { %3342 = vmatpush1.bf16.msra.mxu0 %v6017_v29  ;;  %3468 = vmatpush1.bf16.msra.mxu1 %v6020_v30 }
 0x206   :  { %3343 = vmatprep.subr.bf16.mxu0 %v6025_v6  ;;  %3469 = vmatprep.subr.bf16.mxu1 %v6028_v7 }
 0x209   :  { %3344 = vmatpush1.bf16.msra.mxu0 %v6023_v31  ;;  %3470 = vmatpush1.bf16.msra.mxu1 %v6026_v36 }
 0x20a   :  { %3345 = vmatprep.subr.bf16.mxu0 %v6031_v40  ;;  %3471 = vmatprep.subr.bf16.mxu1 %v6034_v59 }
 0x20d   :  { %3346 = vmatpush1.bf16.msra.mxu0 %v6029_v48  ;;  %3472 = vmatpush1.bf16.msra.mxu1 %v6032_v50 }
 0x20e   :  { %3347 = vmatprep.subr.bf16.mxu0 %v6037_v45  ;;  %3473 = vmatprep.subr.bf16.mxu1 %v6040_v51 }
 0x211   :  { %3348 = vmatpush1.bf16.msra.mxu0 %v6035_v42  ;;  %3474 = vmatpush1.bf16.msra.mxu1 %v6038_v52 }
 0x212   :  { %3349 = vmatprep.subr.bf16.mxu0 %v6043_v53  ;;  %3475 = vmatprep.subr.bf16.mxu1 %v6046_v54 }
 0x215   :  { %3350 = vmatpush1.bf16.msra.mxu0 %v6041_v41  ;;  %3476 = vmatpush1.bf16.msra.mxu1 %v6044_v55 }
 0x216   :  { %3351 = vmatprep.subr.bf16.mxu0 %v6049_v15  ;;  %3477 = vmatprep.subr.bf16.mxu1 %v6052_v56 }
 0x219   :  { %3352 = vmatpush1.bf16.msra.mxu0 %v6047_v60  ;;  %3478 = vmatpush1.bf16.msra.mxu1 %v6050_v62 }
 0x21a   :  { %3353 = vmatprep.subr.bf16.mxu0 %v6055_v63  ;;  %3479 = vmatprep.subr.bf16.mxu1 %v6058_v0 }
 0x21d   :  { %3354 = vmatpush1.bf16.msra.mxu0 %v6053_v1  ;;  %3480 = vmatpush1.bf16.msra.mxu1 %v6056_v2 }
 0x21e   :  { %3386 = vmatprep.subr.bf16.mxu0 %v6061_v57  ;;  %3512 = vmatprep.subr.bf16.mxu1 %v6064_v46 }
 0x2b2   :  { %v2268_v34 = vpop.f32.mrb[12].mxu0  ;;  %v2394_v8 = vpop.f32.mrb[12].mxu1 }
 0x2b3   :  { %v5401_v17 = vadd.f32 %v2268_v34, %v6752_v3  ;;  %v5413_v61 = vadd.f32 %v2394_v8, %v6755_v35  ;;  %v2270_v9 = vpop.f32.mrb[13].mxu0  ;;  %v2396_v44 = vpop.f32.mrb[13].mxu1 }
 0x2b4   :  { %v5402_v10 = vadd.f32 %v2270_v9, %v6758_v5  ;;  %v5414_v37 = vadd.f32 %v2396_v44, %v6761_v49  ;;  %v2272_v11 = vpop.f32.mrb[14].mxu0  ;;  %v2398_v24 = vpop.f32.mrb[14].mxu1 }
 0x2b5   :  { %vm2423_vm8 = vcmp.ge.f32.partialorder %v5401_v17, 0.0  ;;  %v2447_v4 = vmul.f32 0.2, %v5401_v17  ;;  %vm2425_vm9 = vcmp.ge.f32.partialorder %v5413_v61, 0.0  ;;  %v2449_v38 = vmul.f32 0.2, %v5413_v61 }
 0x2b6   :  { %vm2424_vm10 = vcmp.ge.f32.partialorder %v5402_v10, 0.0  ;;  %v2448_v23 = vmul.f32 0.2, %v5402_v10  ;;  %vm2426_vm11 = vcmp.ge.f32.partialorder %v5414_v37, 0.0  ;;  %v2450_v25 = vmul.f32 0.2, %v5414_v37 }
 0x2b7   :  { %v2471_v32 = vsel %vm2423_vm8, %v5401_v17, %v2447_v4  ;;  %v2473_v16 = vsel %vm2425_vm9, %v5413_v61, %v2449_v38  ;;  %v5403_v12 = vadd.f32 %v2272_v11, %v6752_v3  ;;  %v5415_v33 = vadd.f32 %v2398_v24, %v6755_v35  ;;  %v2274_v13 = vpop.f32.mrb[15].mxu0  ;;  %v2400_v14 = vpop.f32.mrb[15].mxu1 }
 0x2b8   :  { %v2472_v39 = vsel %vm2424_vm10, %v5402_v10, %v2448_v23  ;;  %v2474_v20 = vsel %vm2426_vm11, %v5414_v37, %v2450_v25  ;;  %v2495_v21 = vmul.f32 1.4142135, %v2471_v32  ;;  %v2497_v27 = vmul.f32 1.4142135, %v2473_v16  ;;  %v6059_v10 = vld [vmem:[#allocation5 + $0xa00] ss:$16 sps:$4 sm:$0xff]  }
 0x2b9   :  { %vm2427_vm12 = vcmp.ge.f32.partialorder %v5403_v12, 0.0  ;;  %vm2429_vm13 = vcmp.ge.f32.partialorder %v5415_v33, 0.0  ;;  %v2451_v43 = vmul.f32 0.2, %v5403_v12  ;;  %v2453_v47 = vmul.f32 0.2, %v5415_v33 }
 0x2ba   :  { %v5404_v28 = vadd.f32 %v2274_v13, %v6758_v5  ;;  %v5416_v29 = vadd.f32 %v2400_v14, %v6761_v49  ;;  %v2278_v30 = vpop.f32.mrb[16].mxu0  ;;  %v2404_v6 = vpop.f32.mrb[16].mxu1  ;;  %v2496_v7 = vmul.f32 1.4142135, %v2472_v39  ;;  %v6771_v31 = vmul.f32 1.4142135, %v2474_v20 }
 0x2bb   :  { %v5405_v36 = vadd.f32 %v2278_v30, %v6752_v3  ;;  %v5417_v40 = vadd.f32 %v2404_v6, %v6755_v35  ;;  %v2280_v59 = vpop.f32.mrb[17].mxu0  ;;  %v2406_v48 = vpop.f32.mrb[17].mxu1  ;;  %v2475_v50 = vsel %vm2427_vm12, %v5403_v12, %v2451_v43  ;;  %v2477_v45 = vsel %vm2429_vm13, %v5415_v33, %v2453_v47  ;;  %v6062_v37 = vld [vmem:[#allocation5 + $0xa08] ss:$16 sps:$4 sm:$0xff]   ;;  %v6067_v13 = vld [vmem:[#allocation5 + $0xa24] ss:$16 sps:$4 sm:$0xff]  }
 0x2bc   :  { %vm2428_vm14 = vcmp.ge.f32.partialorder %v5404_v28, 0.0  ;;  %v2452_v51 = vmul.f32 0.2, %v5404_v28  ;;  %v2282_v42 = vpop.f32.mrb[18].mxu0  ;;  %v2408_v52 = vpop.f32.mrb[18].mxu1  ;;  %vm2430_vm15 = vcmp.ge.f32.partialorder %v5416_v29, 0.0  ;;  %v5406_v46 = vadd.f32 %v2280_v59, %v6758_v5 }
 0x2bd   :  { %v2499_v53 = vmul.f32 1.4142135, %v2475_v50  ;;  %v2501_v54 = vmul.f32 1.4142135, %v2477_v45  ;;  %vm2431_vm0 = vcmp.ge.f32.partialorder %v5405_v36, 0.0  ;;  %vm2433_vm1 = vcmp.ge.f32.partialorder %v5417_v40, 0.0 }
 0x2be   :  { %v2476_v41 = vsel %vm2428_vm14, %v5404_v28, %v2452_v51  ;;  %v2454_v55 = vmul.f32 0.2, %v5416_v29  ;;  %v2455_v15 = vmul.f32 0.2, %v5405_v36  ;;  %v2284_v56 = vpop.f32.mrb[19].mxu0  ;;  %v2410_v1 = vpop.f32.mrb[19].mxu1  ;;  %v5418_v58 = vadd.f32 %v2406_v48, %v6761_v49 }
 0x2bf   :  { %v2519_v60 = vpack.c.bf16 %v2499_v53, %v2495_v21  ;;  %v6775_v62 = vpack.c.bf16 %v2501_v54, %v2497_v27  ;;  %v2500_v63 = vmul.f32 1.4142135, %v2476_v41  ;;  %v2457_v0 = vmul.f32 0.2, %v5417_v40  ;;  %v6070_v14 = vld [vmem:[#allocation5 + $0xa2c] ss:$16 sps:$4 sm:$0xff]  }
 0x2c0   :  { %v2478_v2 = vsel %vm2430_vm15, %v5416_v29, %v2454_v55  ;;  %v2479_v57 = vsel %vm2431_vm0, %v5405_v36, %v2455_v15  ;;  %v5407_v61 = vadd.f32 %v2282_v42, %v6752_v3  ;;  %vm2432_vm2 = vcmp.ge.f32.partialorder %v5406_v46, 0.0  ;;  %v6065_v6 = vld [vmem:[#allocation5 + $0xa20] ss:$16 sps:$4 sm:$0xff]   ;;  %v6073_v59 = vld [vmem:[#allocation5 + $0xa44] ss:$16 sps:$4 sm:$0xff]  }
 0x2c1   :  { %v6779_v34 = vmul.f32 1.4142135, %v2478_v2  ;;  %v6781_v8 = vmul.f32 1.4142135, %v2479_v57  ;;  %v2481_v17 = vsel %vm2433_vm1, %v5417_v40, %v2457_v0  ;;  %v2456_v44 = vmul.f32 0.2, %v5406_v46 }
 0x2c2   :  { %v6784_v9 = vmul.f32 1.4142135, %v2481_v17  ;;  %vm2434_vm3 = vcmp.ge.f32.partialorder %v5418_v58, 0.0  ;;  %v2458_v11 = vmul.f32 0.2, %v5418_v58  ;;  %vm2435_vm4 = vcmp.ge.f32.partialorder %v5407_v61, 0.0 }
 0x2c3   :  { %v2459_v24 = vmul.f32 0.2, %v5407_v61  ;;  %v5419_v4 = vadd.f32 %v2408_v52, %v6755_v35  ;;  %v2288_v38 = vpop.f32.mrb[20].mxu0  ;;  %v2480_v23 = vsel %vm2432_vm2, %v5406_v46, %v2456_v44  ;;  %v5408_v25 = vadd.f32 %v2284_v56, %v6758_v5  ;;  %v2414_v12 = vpop.f32.mrb[20].mxu1  ;;  %v6076_v15 = vld [vmem:[#allocation5 + $0xa4c] ss:$16 sps:$4 sm:$0xff]  }
 0x2c4   :  { %v5420_v32 = vadd.f32 %v2410_v1, %v6761_v49  ;;  %v2520_v16 = vpack.c.bf16 %v2500_v63, %v2496_v7  ;;  %v2290_v33 = vpop.f32.mrb[21].mxu0  ;;  %v6789_v39 = vmul.f32 1.4142135, %v2480_v23  ;;  %v2482_v20 = vsel %vm2434_vm3, %v5418_v58, %v2458_v11  ;;  %v2416_v27 = vpop.f32.mrb[21].mxu1  ;;  %v6068_v7 = vld [vmem:[#allocation5 + $0xa28] ss:$16 sps:$4 sm:$0xff]  }
 0x2c5   :  { %v2483_v21 = vsel %vm2435_vm4, %v5407_v61, %v2459_v24  ;;  %vm2437_vm5 = vcmp.ge.f32.partialorder %v5419_v4, 0.0  ;;  %v2292_v43 = vpop.f32.mrb[22].mxu0  ;;  %v6792_v47 = vmul.f32 1.4142135, %v2482_v20  ;;  %v2461_v29 = vmul.f32 0.2, %v5419_v4 }
 0x2c6   :  { %v6794_v28 = vmul.f32 1.4142135, %v2483_v21  ;;  %3355 = vmatprep.mubr.bf16.mxu0 %v2520_v16  ;;  %3481 = vmatprep.mubr.bf16.mxu1 %v2520_v16  ;;  %v5409_v30 = vadd.f32 %v2288_v38, %v6752_v3  ;;  %vm2436_vm6 = vcmp.ge.f32.partialorder %v5408_v25, 0.0  ;;  %v2460_v36 = vmul.f32 0.2, %v5408_v25  ;;  %v2418_v51 = vpop.f32.mrb[22].mxu1 }
 0x2c7   :  { %vm2438_vm7 = vcmp.ge.f32.partialorder %v5420_v32, 0.0  ;;  %v2462_v40 = vmul.f32 0.2, %v5420_v32  ;;  %3356 = vmatmul.mubr.bf16.vlgmr.msra.gmra.mrb[24].mxu0 %v2519_v60  ;;  %3482 = vmatmul.mubr.bf16.vlgmr.msra.gmra.mrb[24].mxu1 %v2519_v60  ;;  %v2485_v48 = vsel %vm2437_vm5, %v5419_v4, %v2461_v29  ;;  %v5421_v45 = vadd.f32 %v2414_v12, %v6755_v35  ;;  %v2294_v42 = vpop.f32.mrb[23].mxu0  ;;  %v2420_v55 = vpop.f32.mrb[23].mxu1 }
 0x2c8   :  { %3387 = vmatpush1.bf16.msra.mxu0 %v6059_v10  ;;  %3513 = vmatpush1.bf16.msra.mxu1 %v6062_v37  ;;  %vm2439_vm8 = vcmp.ge.f32.partialorder %v5409_v30, 0.0  ;;  %v2463_v50 = vmul.f32 0.2, %v5409_v30  ;;  %v6799_v52 = vmul.f32 1.4142135, %v2485_v48  ;;  %v2484_v53 = vsel %vm2436_vm6, %v5408_v25, %v2460_v36 }
 0x2c9   :  { %v2486_v54 = vsel %vm2438_vm7, %v5420_v32, %v2462_v40  ;;  %v5410_v41 = vadd.f32 %v2290_v33, %v6758_v5  ;;  %3388 = vmatprep.subr.bf16.mxu0 %v6067_v13  ;;  %3514 = vmatprep.subr.bf16.mxu1 %v6070_v14  ;;  %v2508_v56 = vmul.f32 1.4142135, %v2484_v53  ;;  %vm2441_vm9 = vcmp.ge.f32.partialorder %v5421_v45, 0.0  ;;  %v6071_v0 = vld [vmem:[#allocation5 + $0xa40] ss:$16 sps:$4 sm:$0xff]  }
 0x2ca   :  { %v2510_v60 = vmul.f32 1.4142135, %v2486_v54  ;;  %v2487_v63 = vsel %vm2439_vm8, %v5409_v30, %v2463_v50  ;;  %v2465_v2 = vmul.f32 0.2, %v5421_v45  ;;  %v5422_v57 = vadd.f32 %v2416_v27, %v6761_v49  ;;  %v6074_v44 = vld [vmem:[#allocation5 + $0xa48] ss:$16 sps:$4 sm:$0xff]  }
 0x2cb   :  { %v2511_v1 = vmul.f32 1.4142135, %v2487_v63  ;;  %vm2440_vm10 = vcmp.ge.f32.partialorder %v5410_v41, 0.0  ;;  %v2464_v46 = vmul.f32 0.2, %v5410_v41  ;;  %v5411_v58 = vadd.f32 %v2292_v43, %v6752_v3 }
 0x2cc   :  { %v5423_v17 = vadd.f32 %v2418_v51, %v6755_v35  ;;  %3389 = vmatpush1.bf16.msra.mxu0 %v6065_v6  ;;  %3515 = vmatpush1.bf16.msra.mxu1 %v6068_v7  ;;  %v5412_v61 = vadd.f32 %v2294_v42, %v6758_v5  ;;  %v6079_v10 = vld [vmem:[#allocation5 + $0xa64] ss:$16 sps:$4 sm:$0xff]   ;;  %v2489_v37 = vsel %vm2441_vm9, %v5421_v45, %v2465_v2  ;;  %vm2442_vm11 = vcmp.ge.f32.partialorder %v5422_v57, 0.0  ;;  %v6082_v4 = vld [vmem:[#allocation5 + $0xa6c] ss:$16 sps:$4 sm:$0xff]  }
 0x2cd   :  { %v2466_v11 = vmul.f32 0.2, %v5422_v57  ;;  %v5424_v24 = vadd.f32 %v2420_v55, %v6761_v49  ;;  %3390 = vmatprep.subr.bf16.mxu0 %v6073_v59  ;;  %3516 = vmatprep.subr.bf16.mxu1 %v6076_v15  ;;  %v2513_v38 = vmul.f32 1.4142135, %v2489_v37  ;;  %v2488_v23 = vsel %vm2440_vm10, %v5410_v41, %v2464_v46  ;;  %v6077_v43 = vld [vmem:[#allocation5 + $0xa60] ss:$16 sps:$4 sm:$0xff]  }
 0x2ce   :  { %vm2443_vm12 = vcmp.ge.f32.partialorder %v5411_v58, 0.0  ;;  %v2467_v3 = vmul.f32 0.2, %v5411_v58  ;;  %v2512_v35 = vmul.f32 1.4142135, %v2488_v23  ;;  %vm2445_vm13 = vcmp.ge.f32.partialorder %v5423_v17, 0.0 }
 0x2cf   :  { %v2490_v25 = vsel %vm2442_vm11, %v5422_v57, %v2466_v11  ;;  %v2469_v32 = vmul.f32 0.2, %v5423_v17  ;;  %vm2444_vm14 = vcmp.ge.f32.partialorder %v5412_v61, 0.0  ;;  %v2468_v12 = vmul.f32 0.2, %v5412_v61 }
 0x2d0   :  { %v2514_v5 = vmul.f32 1.4142135, %v2490_v25  ;;  %v2491_v16 = vsel %vm2443_vm12, %v5411_v58, %v2467_v3  ;;  %3391 = vmatpush1.bf16.msra.mxu0 %v6071_v0  ;;  %3517 = vmatpush1.bf16.msra.mxu1 %v6074_v44  ;;  %vm2446_vm15 = vcmp.ge.f32.partialorder %v5424_v24, 0.0  ;;  %v2470_v13 = vmul.f32 0.2, %v5424_v24 }
 0x2d1   :  { %v2515_v33 = vmul.f32 1.4142135, %v2491_v16  ;;  %v2493_v49 = vsel %vm2445_vm13, %v5423_v17, %v2469_v32  ;;  %3392 = vmatprep.subr.bf16.mxu0 %v6079_v10  ;;  %3518 = vmatprep.subr.bf16.mxu1 %v6082_v4  ;;  %v2492_v20 = vsel %vm2444_vm14, %v5412_v61, %v2468_v12  ;;  %v2524_v21 = vpack.c.bf16 %v2508_v56, %v6789_v39  ;;  %v6080_v29 = vld [vmem:[#allocation5 + $0xa68] ss:$16 sps:$4 sm:$0xff]   ;;  %v6085_v7 = vld [vmem:[#allocation5 + $0xa84] ss:$16 sps:$4 sm:$0xff]  }
 0x2d2   :  { %v2517_v14 = vmul.f32 1.4142135, %v2493_v49  ;;  %v2523_v27 = vpack.c.bf16 %v6794_v28, %v6781_v8  ;;  %v2516_v30 = vmul.f32 1.4142135, %v2492_v20  ;;  %v2494_v6 = vsel %vm2446_vm15, %v5424_v24, %v2470_v13  ;;  %v6088_v48 = vld [vmem:[#allocation5 + $0xa8c] ss:$16 sps:$4 sm:$0xff]  }
 0x2d3   :  { %v2527_v36 = vpack.c.bf16 %v2515_v33, %v2511_v1  ;;  %v2522_v40 = vpack.c.bf16 %v6779_v34, %v6771_v31  ;;  %v2518_v59 = vmul.f32 1.4142135, %v2494_v6  ;;  %3365 = vmatprep.mubr.bf16.mxu0 %v2524_v21  ;;  %3491 = vmatprep.mubr.bf16.mxu1 %v2524_v21  ;;  %v6815_v50 = vpack.c.bf16 %v2510_v60, %v6792_v47  ;;  %v6083_v45 = vld [vmem:[#allocation5 + $0xa80] ss:$16 sps:$4 sm:$0xff]   ;;  %v6086_v31 = vld [vmem:[#allocation5 + $0xa88] ss:$16 sps:$4 sm:$0xff]  }
 0x2d4   :  { %v6819_v39 = vpack.c.bf16 %v6799_v52, %v6784_v9  ;;  %v6821_v8 = vpack.c.bf16 %v2517_v14, %v2513_v38  ;;  %3366 = vmatmul.mubr.bf16.gmra.mrb[28].mxu0 %v2523_v27  ;;  %3492 = vmatmul.mubr.bf16.gmra.mrb[28].mxu1 %v2523_v27  ;;  %v2528_v28 = vpack.c.bf16 %v2516_v30, %v2512_v35  ;;  %v6091_v51 = vld [vmem:[#allocation5 + $0xaa4] ss:$16 sps:$4 sm:$0xff]   ;;  %v6094_v47 = vld [vmem:[#allocation5 + $0xaac] ss:$16 sps:$4 sm:$0xff]   ;;  %v6089_v9 = vld [vmem:[#allocation5 + $0xaa0] ss:$16 sps:$4 sm:$0xff]  }
 0x2d5   :  { %3393 = vmatpush1.bf16.msra.mxu0 %v6077_v43  ;;  %3519 = vmatpush1.bf16.msra.mxu1 %v6080_v29  ;;  %v6823_v34 = vpack.c.bf16 %v2518_v59, %v2514_v5  ;;  %v6092_v42 = vld [vmem:[#allocation5 + $0xaa8] ss:$16 sps:$4 sm:$0xff]   ;;  %v6097_v52 = vld [vmem:[#allocation5 + $0xac4] ss:$16 sps:$4 sm:$0xff]   ;;  %v6100_v53 = vld [vmem:[#allocation5 + $0xacc] ss:$16 sps:$4 sm:$0xff]  }
 0x2d6   :  { %3375 = vmatprep.mubr.bf16.mxu0 %v2528_v28  ;;  %3394 = vmatprep.subr.bf16.mxu0 %v6085_v7  ;;  %v6095_v54 = vld [vmem:[#allocation5 + $0xac0] ss:$16 sps:$4 sm:$0xff]   ;;  %v6098_v41 = vld [vmem:[#allocation5 + $0xac8] ss:$16 sps:$4 sm:$0xff]   ;;  %v6103_v55 = vld [vmem:[#allocation5 + $0xae4] ss:$16 sps:$4 sm:$0xff]  }
 0x2d7   :  { %3501 = vmatprep.mubr.bf16.mxu1 %v2528_v28  ;;  %3520 = vmatprep.subr.bf16.mxu1 %v6088_v48  ;;  %v6106_v15 = vld [vmem:[#allocation5 + $0xaec] ss:$16 sps:$4 sm:$0xff]   ;;  %v6101_v56 = vld [vmem:[#allocation5 + $0xae0] ss:$16 sps:$4 sm:$0xff]   ;;  %v6104_v60 = vld [vmem:[#allocation5 + $0xae8] ss:$16 sps:$4 sm:$0xff]  }
 0x2d8   :  { %v6109_v63 = vld [vmem:[#allocation5 + $0xb04] ss:$16 sps:$4 sm:$0xff]   ;;  %v6112_v0 = vld [vmem:[#allocation5 + $0xb0c] ss:$16 sps:$4 sm:$0xff]   ;;  %v6107_v1 = vld [vmem:[#allocation5 + $0xb00] ss:$16 sps:$4 sm:$0xff]  }
 0x2d9   :  { %3395 = vmatpush1.bf16.msra.mxu0 %v6083_v45  ;;  %3521 = vmatpush1.bf16.msra.mxu1 %v6086_v31  ;;  %v6110_v2 = vld [vmem:[#allocation5 + $0xb08] ss:$16 sps:$4 sm:$0xff]   ;;  %v6115_v57 = vld [vmem:[#allocation5 + $0xb24] ss:$16 sps:$4 sm:$0xff]   ;;  %v6118_v46 = vld [vmem:[#allocation5 + $0xb2c] ss:$16 sps:$4 sm:$0xff]  }
 0x2da   :  { %3396 = vmatprep.subr.bf16.mxu0 %v6091_v51  ;;  %3522 = vmatprep.subr.bf16.mxu1 %v6094_v47  ;;  %v6113_v58 = vld [vmem:[#allocation5 + $0xb20] ss:$16 sps:$4 sm:$0xff]   ;;  %v6116_v17 = vld [vmem:[#allocation5 + $0xb28] ss:$16 sps:$4 sm:$0xff]   ;;  %v6121_v61 = vld [vmem:[#allocation5 + $0xb44] ss:$16 sps:$4 sm:$0xff]  }
 0x2db   :  { %v6124_v44 = vld [vmem:[#allocation5 + $0xb4c] ss:$16 sps:$4 sm:$0xff]   ;;  %v6119_v10 = vld [vmem:[#allocation5 + $0xb40] ss:$16 sps:$4 sm:$0xff]   ;;  %v6122_v37 = vld [vmem:[#allocation5 + $0xb48] ss:$16 sps:$4 sm:$0xff]  }
 0x2dc   :  { %3376 = vmatmul.mubr.bf16.gmra.mrb[32].mxu0 %v2527_v36  ;;  %3502 = vmatmul.mubr.bf16.gmra.mrb[32].mxu1 %v2527_v36  ;;  %v6127_v11 = vld [vmem:[#allocation5 + $0xb64] ss:$16 sps:$4 sm:$0xff]   ;;  %v6130_v24 = vld [vmem:[#allocation5 + $0xb6c] ss:$16 sps:$4 sm:$0xff]   ;;  %v6125_v4 = vld [vmem:[#allocation5 + $0xb60] ss:$16 sps:$4 sm:$0xff]  }
 0x2dd   :  { %3418 = vmatprep.mubr.bf16.mxu0 %v2522_v40  ;;  %3544 = vmatprep.mubr.bf16.mxu1 %v2522_v40  ;;  %v6128_v38 = vld [vmem:[#allocation5 + $0xb68] ss:$16 sps:$4 sm:$0xff]   ;;  %v6133_v23 = vld [vmem:[#allocation5 + $0xb84] ss:$16 sps:$4 sm:$0xff]   ;;  %v6136_v3 = vld [vmem:[#allocation5 + $0xb8c] ss:$16 sps:$4 sm:$0xff]  }
 0x2de   :  { %3397 = vmatpush1.bf16.msra.mxu0 %v6089_v9  ;;  %3523 = vmatpush1.bf16.msra.mxu1 %v6092_v42  ;;  %v6131_v35 = vld [vmem:[#allocation5 + $0xb80] ss:$16 sps:$4 sm:$0xff]   ;;  %v6134_v25 = vld [vmem:[#allocation5 + $0xb88] ss:$16 sps:$4 sm:$0xff]   ;;  %v6139_v32 = vld [vmem:[#allocation5 + $0xba4] ss:$16 sps:$4 sm:$0xff]  }
 0x2df   :  { %3398 = vmatprep.subr.bf16.mxu0 %v6097_v52  ;;  %3524 = vmatprep.subr.bf16.mxu1 %v6100_v53  ;;  %v6142_v5 = vld [vmem:[#allocation5 + $0xbac] ss:$16 sps:$4 sm:$0xff]   ;;  %v6137_v16 = vld [vmem:[#allocation5 + $0xba0] ss:$16 sps:$4 sm:$0xff]   ;;  %v6140_v12 = vld [vmem:[#allocation5 + $0xba8] ss:$16 sps:$4 sm:$0xff]  }
 0x2e0   :  { %v6145_v33 = vld [vmem:[#allocation5 + $0xbc4] ss:$16 sps:$4 sm:$0xff]   ;;  %v6148_v49 = vld [vmem:[#allocation5 + $0xbcc] ss:$16 sps:$4 sm:$0xff]   ;;  %v6143_v13 = vld [vmem:[#allocation5 + $0xbc0] ss:$16 sps:$4 sm:$0xff]  }
 0x2e1   :  { %v6146_v14 = vld [vmem:[#allocation5 + $0xbc8] ss:$16 sps:$4 sm:$0xff]   ;;  %v6151_v20 = vld [vmem:[#allocation5 + $0xbe4] ss:$16 sps:$4 sm:$0xff]   ;;  %v6154_v21 = vld [vmem:[#allocation5 + $0xbec] ss:$16 sps:$4 sm:$0xff]  }
 0x2e2   :  { %3399 = vmatpush1.bf16.msra.mxu0 %v6095_v54  ;;  %3525 = vmatpush1.bf16.msra.mxu1 %v6098_v41  ;;  %v6149_v27 = vld [vmem:[#allocation5 + $0xbe0] ss:$16 sps:$4 sm:$0xff]   ;;  %v6152_v43 = vld [vmem:[#allocation5 + $0xbe8] ss:$16 sps:$4 sm:$0xff]   ;;  %v6157_v29 = vld [vmem:[#allocation5 + $0xc04] ss:$16 sps:$4 sm:$0xff]  }
 0x2e3   :  { %3400 = vmatprep.subr.bf16.mxu0 %v6103_v55  ;;  %3526 = vmatprep.subr.bf16.mxu1 %v6106_v15  ;;  %v6160_v30 = vld [vmem:[#allocation5 + $0xc0c] ss:$16 sps:$4 sm:$0xff]   ;;  %v6155_v6 = vld [vmem:[#allocation5 + $0xc00] ss:$16 sps:$4 sm:$0xff]   ;;  %v6158_v7 = vld [vmem:[#allocation5 + $0xc08] ss:$16 sps:$4 sm:$0xff]  }
 0x2e4   :  { %v6163_v36 = vld [vmem:[#allocation5 + $0xc24] ss:$16 sps:$4 sm:$0xff]   ;;  %v6166_v40 = vld [vmem:[#allocation5 + $0xc2c] ss:$16 sps:$4 sm:$0xff]   ;;  %v6161_v59 = vld [vmem:[#allocation5 + $0xc20] ss:$16 sps:$4 sm:$0xff]  }
 0x2e5   :  { %v6164_v48 = vld [vmem:[#allocation5 + $0xc28] ss:$16 sps:$4 sm:$0xff]   ;;  %v6169_v28 = vld [vmem:[#allocation5 + $0xc44] ss:$16 sps:$4 sm:$0xff]   ;;  %v6172_v45 = vld [vmem:[#allocation5 + $0xc4c] ss:$16 sps:$4 sm:$0xff]  }
 0x2e6   :  { %3401 = vmatpush1.bf16.msra.mxu0 %v6101_v56  ;;  %3527 = vmatpush1.bf16.msra.mxu1 %v6104_v60  ;;  %v6167_v31 = vld [vmem:[#allocation5 + $0xc40] ss:$16 sps:$4 sm:$0xff]   ;;  %v6170_v51 = vld [vmem:[#allocation5 + $0xc48] ss:$16 sps:$4 sm:$0xff]   ;;  %v6175_v47 = vld [vmem:[#allocation5 + $0xc64] ss:$16 sps:$4 sm:$0xff]  }
 0x2e7   :  { %3402 = vmatprep.subr.bf16.mxu0 %v6109_v63  ;;  %3528 = vmatprep.subr.bf16.mxu1 %v6112_v0  ;;  %v6176_v9 = vld [vmem:[#allocation5 + $0xc68] ss:$16 sps:$4 sm:$0xff]   ;;  %v6181_v42 = vld [vmem:[#allocation5 + $0xc84] ss:$16 sps:$4 sm:$0xff]   ;;  %v6184_v52 = vld [vmem:[#allocation5 + $0xc8c] ss:$16 sps:$4 sm:$0xff]  }
 0x2e8   :  { %v6179_v53 = vld [vmem:[#allocation5 + $0xc80] ss:$16 sps:$4 sm:$0xff]   ;;  %v6182_v54 = vld [vmem:[#allocation5 + $0xc88] ss:$16 sps:$4 sm:$0xff]   ;;  %v6187_v41 = vld [vmem:[#allocation5 + $0xca4] ss:$16 sps:$4 sm:$0xff]  }
 0x2e9   :  { %v6188_v55 = vld [vmem:[#allocation5 + $0xca8] ss:$16 sps:$4 sm:$0xff]   ;;  %v6193_v15 = vld [vmem:[#allocation5 + $0xcc4] ss:$16 sps:$4 sm:$0xff]   ;;  %v6196_v56 = vld [vmem:[#allocation5 + $0xccc] ss:$16 sps:$4 sm:$0xff]  }
 0x2ea   :  { %3403 = vmatpush1.bf16.msra.mxu0 %v6107_v1  ;;  %3529 = vmatpush1.bf16.msra.mxu1 %v6110_v2  ;;  %v6191_v60 = vld [vmem:[#allocation5 + $0xcc0] ss:$16 sps:$4 sm:$0xff]   ;;  %v6194_v63 = vld [vmem:[#allocation5 + $0xcc8] ss:$16 sps:$4 sm:$0xff]   ;;  %v6199_v0 = vld [vmem:[#allocation5 + $0xce4] ss:$16 sps:$4 sm:$0xff]  }
 0x2eb   :  { %3404 = vmatprep.subr.bf16.mxu0 %v6115_v57  ;;  %3530 = vmatprep.subr.bf16.mxu1 %v6118_v46  ;;  %v6202_v1 = vld [vmem:[#allocation5 + $0xcec] ss:$16 sps:$4 sm:$0xff]   ;;  %v6197_v2 = vld [vmem:[#allocation5 + $0xce0] ss:$16 sps:$4 sm:$0xff]   ;;  %v6205_v57 = vld [vmem:[#allocation5 + $0xd04] ss:$16 sps:$4 sm:$0xff]  }
 0x2ec   :  { %v6208_v46 = vld [vmem:[#allocation5 + $0xd0c] ss:$16 sps:$4 sm:$0xff]  }
 0x2ee   :  { %3405 = vmatpush1.bf16.msra.mxu0 %v6113_v58  ;;  %3531 = vmatpush1.bf16.msra.mxu1 %v6116_v17  ;;  %v6203_v58 = vld [vmem:[#allocation5 + $0xd00] ss:$16 sps:$4 sm:$0xff]   ;;  %v6206_v17 = vld [vmem:[#allocation5 + $0xd08] ss:$16 sps:$4 sm:$0xff]  }
 0x2ef   :  { %3406 = vmatprep.subr.bf16.mxu0 %v6121_v61  ;;  %3532 = vmatprep.subr.bf16.mxu1 %v6124_v44  ;;  %v6211_v61 = vld [vmem:[#allocation5 + $0xd24] ss:$16 sps:$4 sm:$0xff]   ;;  %v6214_v44 = vld [vmem:[#allocation5 + $0xd2c] ss:$16 sps:$4 sm:$0xff]  }
 0x2f2   :  { %3407 = vmatpush1.bf16.msra.mxu0 %v6119_v10  ;;  %3533 = vmatpush1.bf16.msra.mxu1 %v6122_v37  ;;  %v6209_v10 = vld [vmem:[#allocation5 + $0xd20] ss:$16 sps:$4 sm:$0xff]   ;;  %v6212_v37 = vld [vmem:[#allocation5 + $0xd28] ss:$16 sps:$4 sm:$0xff]  }
 0x2f3   :  { %3408 = vmatprep.subr.bf16.mxu0 %v6127_v11  ;;  %3534 = vmatprep.subr.bf16.mxu1 %v6130_v24  ;;  %v6217_v11 = vld [vmem:[#allocation5 + $0xd44] ss:$16 sps:$4 sm:$0xff]   ;;  %v6220_v24 = vld [vmem:[#allocation5 + $0xd4c] ss:$16 sps:$4 sm:$0xff]  }
 0x2f6   :  { %3409 = vmatpush1.bf16.msra.mxu0 %v6125_v4  ;;  %3535 = vmatpush1.bf16.msra.mxu1 %v6128_v38  ;;  %v6215_v4 = vld [vmem:[#allocation5 + $0xd40] ss:$16 sps:$4 sm:$0xff]   ;;  %v6218_v38 = vld [vmem:[#allocation5 + $0xd48] ss:$16 sps:$4 sm:$0xff]  }
 0x2f7   :  { %3410 = vmatprep.subr.bf16.mxu0 %v6133_v23  ;;  %3536 = vmatprep.subr.bf16.mxu1 %v6136_v3  ;;  %v6223_v23 = vld [vmem:[#allocation5 + $0xd64] ss:$16 sps:$4 sm:$0xff]   ;;  %v6226_v3 = vld [vmem:[#allocation5 + $0xd6c] ss:$16 sps:$4 sm:$0xff]  }
 0x2fa   :  { %3411 = vmatpush1.bf16.msra.mxu0 %v6131_v35  ;;  %3537 = vmatpush1.bf16.msra.mxu1 %v6134_v25  ;;  %v6221_v35 = vld [vmem:[#allocation5 + $0xd60] ss:$16 sps:$4 sm:$0xff]   ;;  %v6224_v25 = vld [vmem:[#allocation5 + $0xd68] ss:$16 sps:$4 sm:$0xff]  }
 0x2fb   :  { %3412 = vmatprep.subr.bf16.mxu0 %v6139_v32  ;;  %3538 = vmatprep.subr.bf16.mxu1 %v6142_v5  ;;  %v6229_v32 = vld [vmem:[#allocation5 + $0xd84] ss:$16 sps:$4 sm:$0xff]   ;;  %v6232_v5 = vld [vmem:[#allocation5 + $0xd8c] ss:$16 sps:$4 sm:$0xff]  }
 0x2fe   :  { %3413 = vmatpush1.bf16.msra.mxu0 %v6137_v16  ;;  %3539 = vmatpush1.bf16.msra.mxu1 %v6140_v12  ;;  %v6227_v16 = vld [vmem:[#allocation5 + $0xd80] ss:$16 sps:$4 sm:$0xff]   ;;  %v6230_v12 = vld [vmem:[#allocation5 + $0xd88] ss:$16 sps:$4 sm:$0xff]  }
 0x2ff   :  { %3414 = vmatprep.subr.bf16.mxu0 %v6145_v33  ;;  %3540 = vmatprep.subr.bf16.mxu1 %v6148_v49  ;;  %v6233_v33 = vld [vmem:[#allocation5 + $0xda0] ss:$16 sps:$4 sm:$0xff]   ;;  %v6235_v49 = vld [vmem:[#allocation5 + $0xda4] ss:$16 sps:$4 sm:$0xff]  }
 0x302   :  { %3415 = vmatpush1.bf16.msra.mxu0 %v6143_v13  ;;  %3541 = vmatpush1.bf16.msra.mxu1 %v6146_v14  ;;  %v6236_v13 = vld [vmem:[#allocation5 + $0xda8] ss:$16 sps:$4 sm:$0xff]   ;;  %v6238_v14 = vld [vmem:[#allocation5 + $0xdac] ss:$16 sps:$4 sm:$0xff]  }
 0x303   :  { %3416 = vmatprep.subr.bf16.mxu0 %v6151_v20  ;;  %3542 = vmatprep.subr.bf16.mxu1 %v6154_v21  ;;  %v6241_v20 = vld [vmem:[#allocation5 + $0xdc4] ss:$16 sps:$4 sm:$0xff]   ;;  %v6244_v21 = vld [vmem:[#allocation5 + $0xdcc] ss:$16 sps:$4 sm:$0xff]  }
 0x306   :  { %3417 = vmatpush1.bf16.msra.mxu0 %v6149_v27  ;;  %3543 = vmatpush1.bf16.msra.mxu1 %v6152_v43  ;;  %v6239_v27 = vld [vmem:[#allocation5 + $0xdc0] ss:$16 sps:$4 sm:$0xff]   ;;  %v6242_v43 = vld [vmem:[#allocation5 + $0xdc8] ss:$16 sps:$4 sm:$0xff]  }
 0x307   :  { %4475 = vmatprep.subr.bf16.mxu0 %v6157_v29  ;;  %4601 = vmatprep.subr.bf16.mxu1 %v6160_v30  ;;  %v6247_v29 = vld [vmem:[#allocation5 + $0xde4] ss:$16 sps:$4 sm:$0xff]   ;;  %v6250_v30 = vld [vmem:[#allocation5 + $0xdec] ss:$16 sps:$4 sm:$0xff]  }
 0x309   :  { %3419 = vmatmul.mubr.bf16.vlgmr.msra.gmra.mrb[24].mxu0 %v6775_v62  ;;  %3545 = vmatmul.mubr.bf16.vlgmr.msra.gmra.mrb[24].mxu1 %v6775_v62  ;;  %v6178_v62 = vld [vmem:[#allocation5 + $0xc6c] ss:$16 sps:$4 sm:$0xff]  }
 0x30a   :  { %3428 = vmatprep.mubr.bf16.mxu0 %v6815_v50  ;;  %3554 = vmatprep.mubr.bf16.mxu1 %v6815_v50  ;;  %v6173_v50 = vld [vmem:[#allocation5 + $0xc60] ss:$16 sps:$4 sm:$0xff]  }
 0x30b   :  { %4476 = vmatpush1.bf16.msra.mxu0 %v6155_v6  ;;  %4602 = vmatpush1.bf16.msra.mxu1 %v6158_v7  ;;  %v6245_v6 = vld [vmem:[#allocation5 + $0xde0] ss:$16 sps:$4 sm:$0xff]   ;;  %v6248_v7 = vld [vmem:[#allocation5 + $0xde8] ss:$16 sps:$4 sm:$0xff]  }
 0x30c   :  { %4477 = vmatprep.subr.bf16.mxu0 %v6163_v36  ;;  %4603 = vmatprep.subr.bf16.mxu1 %v6166_v40  ;;  %v6253_v36 = vld [vmem:[#allocation5 + $0xe04] ss:$16 sps:$4 sm:$0xff]   ;;  %v6256_v40 = vld [vmem:[#allocation5 + $0xe0c] ss:$16 sps:$4 sm:$0xff]  }
 0x30f   :  { %4478 = vmatpush1.bf16.msra.mxu0 %v6161_v59  ;;  %4604 = vmatpush1.bf16.msra.mxu1 %v6164_v48  ;;  %v2661_v59 = vld [vmem:[#allocation7 + $0x8] sm:$0xf] }
 0x310   :  { %4479 = vmatprep.subr.bf16.mxu0 %v6169_v28  ;;  %4605 = vmatprep.subr.bf16.mxu1 %v6172_v45  ;;  %v6836_v48 = vrot.slane %v2661_v59, %v6656_v18  ;;  %v6839_v28 = vrot.slane %v2661_v59, %v6658_v19  ;;  %v6842_v45 = vrot.slane %v2661_v59, %v6660_v22 }
 0x311   :  { %3429 = vmatmul.mubr.bf16.gmra.mrb[28].mxu0 %v6819_v39  ;;  %3555 = vmatmul.mubr.bf16.gmra.mrb[28].mxu1 %v6819_v39  ;;  %v6190_v39 = vld [vmem:[#allocation5 + $0xcac] ss:$16 sps:$4 sm:$0xff]  }
 0x312   :  { %3438 = vmatprep.mubr.bf16.mxu0 %v6823_v34  ;;  %3564 = vmatprep.mubr.bf16.mxu1 %v6823_v34  ;;  %v6185_v34 = vld [vmem:[#allocation5 + $0xca0] ss:$16 sps:$4 sm:$0xff]  }
 0x313   :  { %4480 = vmatpush1.bf16.msra.mxu0 %v6167_v31  ;;  %4606 = vmatpush1.bf16.msra.mxu1 %v6170_v51  ;;  %v6845_v31 = vrot.slane %v2661_v59, %v6662_v26 }
 0x314   :  { %4481 = vmatprep.subr.bf16.mxu0 %v6175_v47  ;;  %4607 = vmatprep.subr.bf16.mxu1 %v6178_v62 }
 0x317   :  { %4482 = vmatpush1.bf16.msra.mxu0 %v6173_v50  ;;  %4608 = vmatpush1.bf16.msra.mxu1 %v6176_v9 }
 0x318   :  { %4483 = vmatprep.subr.bf16.mxu0 %v6181_v42  ;;  %4609 = vmatprep.subr.bf16.mxu1 %v6184_v52 }
 0x319   :  { %3439 = vmatmul.mubr.bf16.gmra.mrb[32].mxu0 %v6821_v8  ;;  %3565 = vmatmul.mubr.bf16.gmra.mrb[32].mxu1 %v6821_v8  ;;  %v6200_v8 = vld [vmem:[#allocation5 + $0xce8] ss:$16 sps:$4 sm:$0xff]  }
 0x31b   :  { %4484 = vmatpush1.bf16.msra.mxu0 %v6179_v53  ;;  %4610 = vmatpush1.bf16.msra.mxu1 %v6182_v54 }
 0x31c   :  { %4485 = vmatprep.subr.bf16.mxu0 %v6187_v41  ;;  %4611 = vmatprep.subr.bf16.mxu1 %v6190_v39 }
 0x31f   :  { %4486 = vmatpush1.bf16.msra.mxu0 %v6185_v34  ;;  %4612 = vmatpush1.bf16.msra.mxu1 %v6188_v55 }
 0x320   :  { %4487 = vmatprep.subr.bf16.mxu0 %v6193_v15  ;;  %4613 = vmatprep.subr.bf16.mxu1 %v6196_v56 }
 0x323   :  { %4488 = vmatpush1.bf16.msra.mxu0 %v6191_v60  ;;  %4614 = vmatpush1.bf16.msra.mxu1 %v6194_v63 }
 0x324   :  { %4489 = vmatprep.subr.bf16.mxu0 %v6199_v0  ;;  %4615 = vmatprep.subr.bf16.mxu1 %v6202_v1 }
 0x327   :  { %4490 = vmatpush1.bf16.msra.mxu0 %v6197_v2  ;;  %4616 = vmatpush1.bf16.msra.mxu1 %v6200_v8 }
 0x328   :  { %4491 = vmatprep.subr.bf16.mxu0 %v6205_v57  ;;  %4617 = vmatprep.subr.bf16.mxu1 %v6208_v46 }
 0x32b   :  { %4492 = vmatpush1.bf16.msra.mxu0 %v6203_v58  ;;  %4618 = vmatpush1.bf16.msra.mxu1 %v6206_v17 }
 0x32c   :  { %4493 = vmatprep.subr.bf16.mxu0 %v6211_v61  ;;  %4619 = vmatprep.subr.bf16.mxu1 %v6214_v44 }
 0x32f   :  { %4494 = vmatpush1.bf16.msra.mxu0 %v6209_v10  ;;  %4620 = vmatpush1.bf16.msra.mxu1 %v6212_v37 }
 0x330   :  { %4495 = vmatprep.subr.bf16.mxu0 %v6217_v11  ;;  %4621 = vmatprep.subr.bf16.mxu1 %v6220_v24 }
 0x333   :  { %4496 = vmatpush1.bf16.msra.mxu0 %v6215_v4  ;;  %4622 = vmatpush1.bf16.msra.mxu1 %v6218_v38 }
 0x334   :  { %4497 = vmatprep.subr.bf16.mxu0 %v6223_v23  ;;  %4623 = vmatprep.subr.bf16.mxu1 %v6226_v3 }
 0x337   :  { %4498 = vmatpush1.bf16.msra.mxu0 %v6221_v35  ;;  %4624 = vmatpush1.bf16.msra.mxu1 %v6224_v25 }
 0x338   :  { %4499 = vmatprep.subr.bf16.mxu0 %v6229_v32  ;;  %4625 = vmatprep.subr.bf16.mxu1 %v6232_v5 }
 0x33b   :  { %4500 = vmatpush1.bf16.msra.mxu0 %v6227_v16  ;;  %4626 = vmatpush1.bf16.msra.mxu1 %v6230_v12 }
 0x33c   :  { %4501 = vmatprep.subr.bf16.mxu0 %v6235_v49  ;;  %4627 = vmatprep.subr.bf16.mxu1 %v6238_v14 }
 0x33f   :  { %4502 = vmatpush1.bf16.msra.mxu0 %v6233_v33  ;;  %4628 = vmatpush1.bf16.msra.mxu1 %v6236_v13 }
 0x340   :  { %4503 = vmatprep.subr.bf16.mxu0 %v6241_v20  ;;  %4629 = vmatprep.subr.bf16.mxu1 %v6244_v21 }
 0x343   :  { %4504 = vmatpush1.bf16.msra.mxu0 %v6239_v27  ;;  %4630 = vmatpush1.bf16.msra.mxu1 %v6242_v43 }
 0x344   :  { %4505 = vmatprep.subr.bf16.mxu0 %v6247_v29  ;;  %4631 = vmatprep.subr.bf16.mxu1 %v6250_v30 }
 0x347   :  { %4506 = vmatpush1.bf16.msra.mxu0 %v6245_v6  ;;  %4632 = vmatpush1.bf16.msra.mxu1 %v6248_v7 }
 0x348   :  { %4538 = vmatprep.subr.bf16.mxu0 %v6253_v36  ;;  %4664 = vmatprep.subr.bf16.mxu1 %v6256_v40 }
 0x3dc   :  { %v3420_v51 = vpop.f32.mrb[24].mxu0  ;;  %v3546_v47 = vpop.f32.mrb[24].mxu1 }
 0x3dd   :  { %v5425_v62 = vadd.f32 %v3420_v51, %v6836_v48  ;;  %v5437_v50 = vadd.f32 %v3546_v47, %v6839_v28  ;;  %v3422_v9 = vpop.f32.mrb[25].mxu0  ;;  %v3548_v42 = vpop.f32.mrb[25].mxu1 }
 0x3de   :  { %v5426_v52 = vadd.f32 %v3422_v9, %v6842_v45  ;;  %v5438_v53 = vadd.f32 %v3548_v42, %v6845_v31  ;;  %v3424_v54 = vpop.f32.mrb[26].mxu0  ;;  %v3550_v41 = vpop.f32.mrb[26].mxu1 }
 0x3df   :  { %vm3575_vm0 = vcmp.ge.f32.partialorder %v5425_v62, 0.0  ;;  %v3599_v39 = vmul.f32 0.2, %v5425_v62  ;;  %vm3577_vm1 = vcmp.ge.f32.partialorder %v5437_v50, 0.0  ;;  %v3601_v34 = vmul.f32 0.2, %v5437_v50 }
 0x3e0   :  { %vm3576_vm2 = vcmp.ge.f32.partialorder %v5426_v52, 0.0  ;;  %v3600_v55 = vmul.f32 0.2, %v5426_v52  ;;  %vm3578_vm3 = vcmp.ge.f32.partialorder %v5438_v53, 0.0  ;;  %v3602_v15 = vmul.f32 0.2, %v5438_v53 }
 0x3e1   :  { %v3623_v56 = vsel %vm3575_vm0, %v5425_v62, %v3599_v39  ;;  %v3625_v60 = vsel %vm3577_vm1, %v5437_v50, %v3601_v34  ;;  %v5427_v63 = vadd.f32 %v3424_v54, %v6836_v48  ;;  %v5439_v0 = vadd.f32 %v3550_v41, %v6839_v28  ;;  %v3426_v1 = vpop.f32.mrb[27].mxu0  ;;  %v3552_v2 = vpop.f32.mrb[27].mxu1 }
 0x3e2   :  { %v3624_v8 = vsel %vm3576_vm2, %v5426_v52, %v3600_v55  ;;  %v3626_v57 = vsel %vm3578_vm3, %v5438_v53, %v3602_v15  ;;  %v3647_v46 = vmul.f32 1.4142135, %v3623_v56  ;;  %v3649_v58 = vmul.f32 1.4142135, %v3625_v60  ;;  %v6251_v52 = vld [vmem:[#allocation5 + $0xe00] ss:$16 sps:$4 sm:$0xff]  }
 0x3e3   :  { %vm3579_vm4 = vcmp.ge.f32.partialorder %v5427_v63, 0.0  ;;  %vm3581_vm5 = vcmp.ge.f32.partialorder %v5439_v0, 0.0  ;;  %v3603_v17 = vmul.f32 0.2, %v5427_v63  ;;  %v3605_v61 = vmul.f32 0.2, %v5439_v0 }
 0x3e4   :  { %v5428_v44 = vadd.f32 %v3426_v1, %v6842_v45  ;;  %v5440_v10 = vadd.f32 %v3552_v2, %v6845_v31  ;;  %v3430_v37 = vpop.f32.mrb[28].mxu0  ;;  %v3556_v11 = vpop.f32.mrb[28].mxu1  ;;  %v3648_v24 = vmul.f32 1.4142135, %v3624_v8  ;;  %v6855_v4 = vmul.f32 1.4142135, %v3626_v57 }
 0x3e5   :  { %v5429_v38 = vadd.f32 %v3430_v37, %v6836_v48  ;;  %v5441_v23 = vadd.f32 %v3556_v11, %v6839_v28  ;;  %v3432_v3 = vpop.f32.mrb[29].mxu0  ;;  %v3558_v35 = vpop.f32.mrb[29].mxu1  ;;  %v3627_v25 = vsel %vm3579_vm4, %v5427_v63, %v3603_v17  ;;  %v3629_v32 = vsel %vm3581_vm5, %v5439_v0, %v3605_v61  ;;  %v6254_v53 = vld [vmem:[#allocation5 + $0xe08] ss:$16 sps:$4 sm:$0xff]   ;;  %v6259_v1 = vld [vmem:[#allocation5 + $0xe24] ss:$16 sps:$4 sm:$0xff]  }
 0x3e6   :  { %vm3580_vm6 = vcmp.ge.f32.partialorder %v5428_v44, 0.0  ;;  %v3604_v5 = vmul.f32 0.2, %v5428_v44  ;;  %v3434_v16 = vpop.f32.mrb[30].mxu0  ;;  %v3560_v12 = vpop.f32.mrb[30].mxu1  ;;  %vm3582_vm7 = vcmp.ge.f32.partialorder %v5440_v10, 0.0  ;;  %v5430_v40 = vadd.f32 %v3432_v3, %v6842_v45 }
 0x3e7   :  { %v3651_v33 = vmul.f32 1.4142135, %v3627_v25  ;;  %v3653_v49 = vmul.f32 1.4142135, %v3629_v32  ;;  %vm3583_vm8 = vcmp.ge.f32.partialorder %v5429_v38, 0.0  ;;  %vm3585_vm9 = vcmp.ge.f32.partialorder %v5441_v23, 0.0 }
 0x3e8   :  { %v3628_v13 = vsel %vm3580_vm6, %v5428_v44, %v3604_v5  ;;  %v3606_v14 = vmul.f32 0.2, %v5440_v10  ;;  %v3607_v20 = vmul.f32 0.2, %v5429_v38  ;;  %v3436_v21 = vpop.f32.mrb[31].mxu0  ;;  %v3562_v6 = vpop.f32.mrb[31].mxu1  ;;  %v5442_v59 = vadd.f32 %v3558_v35, %v6845_v31 }
 0x3e9   :  { %v3671_v27 = vpack.c.bf16 %v3651_v33, %v3647_v46  ;;  %v6859_v43 = vpack.c.bf16 %v3653_v49, %v3649_v58  ;;  %v3652_v29 = vmul.f32 1.4142135, %v3628_v13  ;;  %v3609_v30 = vmul.f32 0.2, %v5441_v23  ;;  %v6262_v2 = vld [vmem:[#allocation5 + $0xe2c] ss:$16 sps:$4 sm:$0xff]  }
 0x3ea   :  { %v3630_v7 = vsel %vm3582_vm7, %v5440_v10, %v3606_v14  ;;  %v3631_v36 = vsel %vm3583_vm8, %v5429_v38, %v3607_v20  ;;  %v5431_v50 = vadd.f32 %v3434_v16, %v6836_v48  ;;  %vm3584_vm10 = vcmp.ge.f32.partialorder %v5430_v40, 0.0  ;;  %v6257_v11 = vld [vmem:[#allocation5 + $0xe20] ss:$16 sps:$4 sm:$0xff]   ;;  %v6265_v3 = vld [vmem:[#allocation5 + $0xe44] ss:$16 sps:$4 sm:$0xff]  }
 0x3eb   :  { %v6863_v51 = vmul.f32 1.4142135, %v3630_v7  ;;  %v6865_v47 = vmul.f32 1.4142135, %v3631_v36  ;;  %v3633_v62 = vsel %vm3585_vm9, %v5441_v23, %v3609_v30  ;;  %v3608_v42 = vmul.f32 0.2, %v5430_v40 }
 0x3ec   :  { %v6868_v9 = vmul.f32 1.4142135, %v3633_v62  ;;  %vm3586_vm11 = vcmp.ge.f32.partialorder %v5442_v59, 0.0  ;;  %v3610_v54 = vmul.f32 0.2, %v5442_v59  ;;  %vm3587_vm12 = vcmp.ge.f32.partialorder %v5431_v50, 0.0 }
 0x3ed   :  { %v3611_v41 = vmul.f32 0.2, %v5431_v50  ;;  %v5443_v39 = vadd.f32 %v3560_v12, %v6839_v28  ;;  %v3440_v34 = vpop.f32.mrb[32].mxu0  ;;  %v3632_v55 = vsel %vm3584_vm10, %v5430_v40, %v3608_v42  ;;  %v5432_v15 = vadd.f32 %v3436_v21, %v6842_v45  ;;  %v3566_v63 = vpop.f32.mrb[32].mxu1  ;;  %v6268_v20 = vld [vmem:[#allocation5 + $0xe4c] ss:$16 sps:$4 sm:$0xff]  }
 0x3ee   :  { %v5444_v56 = vadd.f32 %v3562_v6, %v6845_v31  ;;  %v3672_v60 = vpack.c.bf16 %v3652_v29, %v3648_v24  ;;  %v3442_v0 = vpop.f32.mrb[33].mxu0  ;;  %v6873_v8 = vmul.f32 1.4142135, %v3632_v55  ;;  %v3634_v57 = vsel %vm3586_vm11, %v5442_v59, %v3610_v54  ;;  %v3568_v58 = vpop.f32.mrb[33].mxu1  ;;  %v6260_v24 = vld [vmem:[#allocation5 + $0xe28] ss:$16 sps:$4 sm:$0xff]  }
 0x3ef   :  { %v3635_v46 = vsel %vm3587_vm12, %v5431_v50, %v3611_v41  ;;  %vm3589_vm13 = vcmp.ge.f32.partialorder %v5443_v39, 0.0  ;;  %v3444_v17 = vpop.f32.mrb[34].mxu0  ;;  %v6876_v61 = vmul.f32 1.4142135, %v3634_v57  ;;  %v3613_v10 = vmul.f32 0.2, %v5443_v39 }
 0x3f0   :  { %v6878_v44 = vmul.f32 1.4142135, %v3635_v46  ;;  %4507 = vmatprep.mubr.bf16.mxu0 %v3672_v60  ;;  %4633 = vmatprep.mubr.bf16.mxu1 %v3672_v60  ;;  %v5433_v37 = vadd.f32 %v3440_v34, %v6836_v48  ;;  %vm3588_vm14 = vcmp.ge.f32.partialorder %v5432_v15, 0.0  ;;  %v3612_v38 = vmul.f32 0.2, %v5432_v15  ;;  %v3570_v5 = vpop.f32.mrb[34].mxu1 }
 0x3f1   :  { %vm3590_vm15 = vcmp.ge.f32.partialorder %v5444_v56, 0.0  ;;  %v3614_v23 = vmul.f32 0.2, %v5444_v56  ;;  %4508 = vmatmul.mubr.bf16.vlgmr.msra.gmra.mrb[36].mxu0 %v3671_v27  ;;  %4634 = vmatmul.mubr.bf16.vlgmr.msra.gmra.mrb[36].mxu1 %v3671_v27  ;;  %v3637_v35 = vsel %vm3589_vm13, %v5443_v39, %v3613_v10  ;;  %v5445_v32 = vadd.f32 %v3566_v63, %v6839_v28  ;;  %v3446_v16 = vpop.f32.mrb[35].mxu0  ;;  %v3572_v14 = vpop.f32.mrb[35].mxu1 }
 0x3f2   :  { %4539 = vmatpush1.bf16.msra.mxu0 %v6251_v52  ;;  %4665 = vmatpush1.bf16.msra.mxu1 %v6254_v53  ;;  %vm3591_vm0 = vcmp.ge.f32.partialorder %v5433_v37, 0.0  ;;  %v3615_v25 = vmul.f32 0.2, %v5433_v37  ;;  %v6883_v12 = vmul.f32 1.4142135, %v3637_v35  ;;  %v3636_v33 = vsel %vm3588_vm14, %v5432_v15, %v3612_v38 }
 0x3f3   :  { %v3638_v49 = vsel %vm3590_vm15, %v5444_v56, %v3614_v23  ;;  %v5434_v13 = vadd.f32 %v3442_v0, %v6842_v45  ;;  %4540 = vmatprep.subr.bf16.mxu0 %v6259_v1  ;;  %4666 = vmatprep.subr.bf16.mxu1 %v6262_v2  ;;  %v3660_v21 = vmul.f32 1.4142135, %v3636_v33  ;;  %vm3593_vm1 = vcmp.ge.f32.partialorder %v5445_v32, 0.0  ;;  %v6263_v30 = vld [vmem:[#allocation5 + $0xe40] ss:$16 sps:$4 sm:$0xff]  }
 0x3f4   :  { %v3662_v27 = vmul.f32 1.4142135, %v3638_v49  ;;  %v3639_v29 = vsel %vm3591_vm0, %v5433_v37, %v3615_v25  ;;  %v3617_v7 = vmul.f32 0.2, %v5445_v32  ;;  %v5446_v36 = vadd.f32 %v3568_v58, %v6845_v31  ;;  %v6266_v42 = vld [vmem:[#allocation5 + $0xe48] ss:$16 sps:$4 sm:$0xff]  }
 0x3f5   :  { %v3663_v6 = vmul.f32 1.4142135, %v3639_v29  ;;  %vm3592_vm2 = vcmp.ge.f32.partialorder %v5434_v13, 0.0  ;;  %v3616_v40 = vmul.f32 0.2, %v5434_v13  ;;  %v5435_v59 = vadd.f32 %v3444_v17, %v6836_v48 }
 0x3f6   :  { %v5447_v62 = vadd.f32 %v3570_v5, %v6839_v28  ;;  %4541 = vmatpush1.bf16.msra.mxu0 %v6257_v11  ;;  %4667 = vmatpush1.bf16.msra.mxu1 %v6260_v24  ;;  %v5436_v50 = vadd.f32 %v3446_v16, %v6842_v45  ;;  %v6271_v52 = vld [vmem:[#allocation5 + $0xe64] ss:$16 sps:$4 sm:$0xff]   ;;  %v3641_v53 = vsel %vm3593_vm1, %v5445_v32, %v3617_v7  ;;  %vm3594_vm3 = vcmp.ge.f32.partialorder %v5446_v36, 0.0  ;;  %v6274_v39 = vld [vmem:[#allocation5 + $0xe6c] ss:$16 sps:$4 sm:$0xff]  }
 0x3f7   :  { %v3618_v54 = vmul.f32 0.2, %v5446_v36  ;;  %v5448_v41 = vadd.f32 %v3572_v14, %v6845_v31  ;;  %4542 = vmatprep.subr.bf16.mxu0 %v6265_v3  ;;  %4668 = vmatprep.subr.bf16.mxu1 %v6268_v20  ;;  %v3665_v34 = vmul.f32 1.4142135, %v3641_v53  ;;  %v3640_v55 = vsel %vm3592_vm2, %v5434_v13, %v3616_v40  ;;  %v6269_v17 = vld [vmem:[#allocation5 + $0xe60] ss:$16 sps:$4 sm:$0xff]  }
 0x3f8   :  { %vm3595_vm4 = vcmp.ge.f32.partialorder %v5435_v59, 0.0  ;;  %v3619_v48 = vmul.f32 0.2, %v5435_v59  ;;  %v3664_v28 = vmul.f32 1.4142135, %v3640_v55  ;;  %vm3597_vm5 = vcmp.ge.f32.partialorder %v5447_v62, 0.0 }
 0x3f9   :  { %v3642_v15 = vsel %vm3594_vm3, %v5446_v36, %v3618_v54  ;;  %v3621_v56 = vmul.f32 0.2, %v5447_v62  ;;  %vm3596_vm6 = vcmp.ge.f32.partialorder %v5436_v50, 0.0  ;;  %v3620_v63 = vmul.f32 0.2, %v5436_v50 }
 0x3fa   :  { %v3666_v45 = vmul.f32 1.4142135, %v3642_v15  ;;  %v3643_v60 = vsel %vm3595_vm4, %v5435_v59, %v3619_v48  ;;  %4543 = vmatpush1.bf16.msra.mxu0 %v6263_v30  ;;  %4669 = vmatpush1.bf16.msra.mxu1 %v6266_v42  ;;  %vm3598_vm7 = vcmp.ge.f32.partialorder %v5448_v41, 0.0  ;;  %v3622_v1 = vmul.f32 0.2, %v5448_v41 }
 0x3fb   :  { %v3667_v0 = vmul.f32 1.4142135, %v3643_v60  ;;  %v3645_v31 = vsel %vm3597_vm5, %v5447_v62, %v3621_v56  ;;  %4544 = vmatprep.subr.bf16.mxu0 %v6271_v52  ;;  %4670 = vmatprep.subr.bf16.mxu1 %v6274_v39  ;;  %v3644_v57 = vsel %vm3596_vm6, %v5436_v50, %v3620_v63  ;;  %v3676_v46 = vpack.c.bf16 %v3660_v21, %v6873_v8  ;;  %v6272_v10 = vld [vmem:[#allocation5 + $0xe68] ss:$16 sps:$4 sm:$0xff]   ;;  %v6277_v24 = vld [vmem:[#allocation5 + $0xe84] ss:$16 sps:$4 sm:$0xff]  }
 0x3fc   :  { %v3669_v2 = vmul.f32 1.4142135, %v3645_v31  ;;  %v3675_v58 = vpack.c.bf16 %v6878_v44, %v6865_v47  ;;  %v3668_v37 = vmul.f32 1.4142135, %v3644_v57  ;;  %v3646_v11 = vsel %vm3598_vm7, %v5448_v41, %v3622_v1  ;;  %v6280_v35 = vld [vmem:[#allocation5 + $0xe8c] ss:$16 sps:$4 sm:$0xff]  }
 0x3fd   :  { %v3679_v38 = vpack.c.bf16 %v3667_v0, %v3663_v6  ;;  %v3674_v23 = vpack.c.bf16 %v6863_v51, %v6855_v4  ;;  %v3670_v3 = vmul.f32 1.4142135, %v3646_v11  ;;  %4517 = vmatprep.mubr.bf16.mxu0 %v3676_v46  ;;  %4643 = vmatprep.mubr.bf16.mxu1 %v3676_v46  ;;  %v6899_v25 = vpack.c.bf16 %v3662_v27, %v6876_v61  ;;  %v6275_v32 = vld [vmem:[#allocation5 + $0xe80] ss:$16 sps:$4 sm:$0xff]   ;;  %v6278_v4 = vld [vmem:[#allocation5 + $0xe88] ss:$16 sps:$4 sm:$0xff]  }
 0x3fe   :  { %v6903_v8 = vpack.c.bf16 %v6883_v12, %v6868_v9  ;;  %v6905_v47 = vpack.c.bf16 %v3669_v2, %v3665_v34  ;;  %4518 = vmatmul.mubr.bf16.gmra.mrb[40].mxu0 %v3675_v58  ;;  %4644 = vmatmul.mubr.bf16.gmra.mrb[40].mxu1 %v3675_v58  ;;  %v3680_v44 = vpack.c.bf16 %v3668_v37, %v3664_v28  ;;  %v6283_v5 = vld [vmem:[#allocation5 + $0xea4] ss:$16 sps:$4 sm:$0xff]   ;;  %v6286_v61 = vld [vmem:[#allocation5 + $0xeac] ss:$16 sps:$4 sm:$0xff]   ;;  %v6281_v9 = vld [vmem:[#allocation5 + $0xea0] ss:$16 sps:$4 sm:$0xff]  }
 0x3ff   :  { %4545 = vmatpush1.bf16.msra.mxu0 %v6269_v17  ;;  %4671 = vmatpush1.bf16.msra.mxu1 %v6272_v10  ;;  %v6907_v51 = vpack.c.bf16 %v3670_v3, %v3666_v45  ;;  %v6284_v16 = vld [vmem:[#allocation5 + $0xea8] ss:$16 sps:$4 sm:$0xff]   ;;  %v6289_v12 = vld [vmem:[#allocation5 + $0xec4] ss:$16 sps:$4 sm:$0xff]   ;;  %v6292_v33 = vld [vmem:[#allocation5 + $0xecc] ss:$16 sps:$4 sm:$0xff]  }
 0x400   :  { %4527 = vmatprep.mubr.bf16.mxu0 %v3680_v44  ;;  %4546 = vmatprep.subr.bf16.mxu0 %v6277_v24  ;;  %v6287_v49 = vld [vmem:[#allocation5 + $0xec0] ss:$16 sps:$4 sm:$0xff]   ;;  %v6290_v13 = vld [vmem:[#allocation5 + $0xec8] ss:$16 sps:$4 sm:$0xff]   ;;  %v6295_v14 = vld [vmem:[#allocation5 + $0xee4] ss:$16 sps:$4 sm:$0xff]  }
 0x401   :  { %4653 = vmatprep.mubr.bf16.mxu1 %v3680_v44  ;;  %4672 = vmatprep.subr.bf16.mxu1 %v6280_v35  ;;  %v6298_v20 = vld [vmem:[#allocation5 + $0xeec] ss:$16 sps:$4 sm:$0xff]   ;;  %v6293_v21 = vld [vmem:[#allocation5 + $0xee0] ss:$16 sps:$4 sm:$0xff]   ;;  %v6296_v27 = vld [vmem:[#allocation5 + $0xee8] ss:$16 sps:$4 sm:$0xff]  }
 0x402   :  { %v6301_v29 = vld [vmem:[#allocation5 + $0xf04] ss:$16 sps:$4 sm:$0xff]   ;;  %v6304_v30 = vld [vmem:[#allocation5 + $0xf0c] ss:$16 sps:$4 sm:$0xff]   ;;  %v6299_v6 = vld [vmem:[#allocation5 + $0xf00] ss:$16 sps:$4 sm:$0xff]  }
 0x403   :  { %4547 = vmatpush1.bf16.msra.mxu0 %v6275_v32  ;;  %4673 = vmatpush1.bf16.msra.mxu1 %v6278_v4  ;;  %v6302_v7 = vld [vmem:[#allocation5 + $0xf08] ss:$16 sps:$4 sm:$0xff]   ;;  %v6307_v36 = vld [vmem:[#allocation5 + $0xf24] ss:$16 sps:$4 sm:$0xff]   ;;  %v6310_v40 = vld [vmem:[#allocation5 + $0xf2c] ss:$16 sps:$4 sm:$0xff]  }
 0x404   :  { %4548 = vmatprep.subr.bf16.mxu0 %v6283_v5  ;;  %4674 = vmatprep.subr.bf16.mxu1 %v6286_v61  ;;  %v6305_v59 = vld [vmem:[#allocation5 + $0xf20] ss:$16 sps:$4 sm:$0xff]   ;;  %v6308_v62 = vld [vmem:[#allocation5 + $0xf28] ss:$16 sps:$4 sm:$0xff]   ;;  %v6313_v50 = vld [vmem:[#allocation5 + $0xf44] ss:$16 sps:$4 sm:$0xff]  }
 0x405   :  { %v6316_v42 = vld [vmem:[#allocation5 + $0xf4c] ss:$16 sps:$4 sm:$0xff]   ;;  %v6311_v52 = vld [vmem:[#allocation5 + $0xf40] ss:$16 sps:$4 sm:$0xff]   ;;  %v6314_v53 = vld [vmem:[#allocation5 + $0xf48] ss:$16 sps:$4 sm:$0xff]  }
 0x406   :  { %4528 = vmatmul.mubr.bf16.gmra.mrb[44].mxu0 %v3679_v38  ;;  %4654 = vmatmul.mubr.bf16.gmra.mrb[44].mxu1 %v3679_v38  ;;  %v6319_v54 = vld [vmem:[#allocation5 + $0xf64] ss:$16 sps:$4 sm:$0xff]   ;;  %v6322_v41 = vld [vmem:[#allocation5 + $0xf6c] ss:$16 sps:$4 sm:$0xff]   ;;  %v6317_v39 = vld [vmem:[#allocation5 + $0xf60] ss:$16 sps:$4 sm:$0xff]  }
 0x407   :  { %4570 = vmatprep.mubr.bf16.mxu0 %v3674_v23  ;;  %4696 = vmatprep.mubr.bf16.mxu1 %v3674_v23  ;;  %v6320_v34 = vld [vmem:[#allocation5 + $0xf68] ss:$16 sps:$4 sm:$0xff]   ;;  %v6325_v55 = vld [vmem:[#allocation5 + $0xf84] ss:$16 sps:$4 sm:$0xff]   ;;  %v6328_v48 = vld [vmem:[#allocation5 + $0xf8c] ss:$16 sps:$4 sm:$0xff]  }
 0x408   :  { %4549 = vmatpush1.bf16.msra.mxu0 %v6281_v9  ;;  %4675 = vmatpush1.bf16.msra.mxu1 %v6284_v16  ;;  %v6323_v28 = vld [vmem:[#allocation5 + $0xf80] ss:$16 sps:$4 sm:$0xff]   ;;  %v6326_v15 = vld [vmem:[#allocation5 + $0xf88] ss:$16 sps:$4 sm:$0xff]   ;;  %v6331_v56 = vld [vmem:[#allocation5 + $0xfa4] ss:$16 sps:$4 sm:$0xff]  }
 0x409   :  { %4550 = vmatprep.subr.bf16.mxu0 %v6289_v12  ;;  %4676 = vmatprep.subr.bf16.mxu1 %v6292_v33  ;;  %v6334_v45 = vld [vmem:[#allocation5 + $0xfac] ss:$16 sps:$4 sm:$0xff]   ;;  %v6329_v60 = vld [vmem:[#allocation5 + $0xfa0] ss:$16 sps:$4 sm:$0xff]   ;;  %v6332_v63 = vld [vmem:[#allocation5 + $0xfa8] ss:$16 sps:$4 sm:$0xff]  }
 0x40a   :  { %v6337_v0 = vld [vmem:[#allocation5 + $0xfc4] ss:$16 sps:$4 sm:$0xff]   ;;  %v6340_v31 = vld [vmem:[#allocation5 + $0xfcc] ss:$16 sps:$4 sm:$0xff]   ;;  %v6335_v1 = vld [vmem:[#allocation5 + $0xfc0] ss:$16 sps:$4 sm:$0xff]  }
 0x40b   :  { %v6338_v2 = vld [vmem:[#allocation5 + $0xfc8] ss:$16 sps:$4 sm:$0xff]   ;;  %v6343_v57 = vld [vmem:[#allocation5 + $0xfe4] ss:$16 sps:$4 sm:$0xff]   ;;  %v6346_v46 = vld [vmem:[#allocation5 + $0xfec] ss:$16 sps:$4 sm:$0xff]  }
 0x40c   :  { %4551 = vmatpush1.bf16.msra.mxu0 %v6287_v49  ;;  %4677 = vmatpush1.bf16.msra.mxu1 %v6290_v13  ;;  %v6341_v58 = vld [vmem:[#allocation5 + $0xfe0] ss:$16 sps:$4 sm:$0xff]   ;;  %v6344_v17 = vld [vmem:[#allocation5 + $0xfe8] ss:$16 sps:$4 sm:$0xff]   ;;  %v3813_v10 = vld [vmem:[#allocation7 + $0xc] sm:$0xf] }
 0x40d   :  { %4552 = vmatprep.subr.bf16.mxu0 %v6295_v14  ;;  %4678 = vmatprep.subr.bf16.mxu1 %v6298_v20  ;;  %v6920_v37 = vrot.slane %v3813_v10, %v6656_v18  ;;  %v6926_v11 = vrot.slane %v3813_v10, %v6660_v22  ;;  %v6929_v24 = vrot.slane %v3813_v10, %v6662_v26 }
 0x410   :  { %4553 = vmatpush1.bf16.msra.mxu0 %v6293_v21  ;;  %4679 = vmatpush1.bf16.msra.mxu1 %v6296_v27 }
 0x411   :  { %4554 = vmatprep.subr.bf16.mxu0 %v6301_v29  ;;  %4680 = vmatprep.subr.bf16.mxu1 %v6304_v30 }
 0x414   :  { %4555 = vmatpush1.bf16.msra.mxu0 %v6299_v6  ;;  %4681 = vmatpush1.bf16.msra.mxu1 %v6302_v7 }
 0x415   :  { %4556 = vmatprep.subr.bf16.mxu0 %v6307_v36  ;;  %4682 = vmatprep.subr.bf16.mxu1 %v6310_v40 }
 0x418   :  { %4557 = vmatpush1.bf16.msra.mxu0 %v6305_v59  ;;  %4683 = vmatpush1.bf16.msra.mxu1 %v6308_v62 }
 0x419   :  { %4558 = vmatprep.subr.bf16.mxu0 %v6313_v50  ;;  %4684 = vmatprep.subr.bf16.mxu1 %v6316_v42 }
 0x41c   :  { %4559 = vmatpush1.bf16.msra.mxu0 %v6311_v52  ;;  %4685 = vmatpush1.bf16.msra.mxu1 %v6314_v53 }
 0x41d   :  { %4560 = vmatprep.subr.bf16.mxu0 %v6319_v54  ;;  %4686 = vmatprep.subr.bf16.mxu1 %v6322_v41 }
 0x420   :  { %4561 = vmatpush1.bf16.msra.mxu0 %v6317_v39  ;;  %4687 = vmatpush1.bf16.msra.mxu1 %v6320_v34 }
 0x421   :  { %4562 = vmatprep.subr.bf16.mxu0 %v6325_v55  ;;  %4688 = vmatprep.subr.bf16.mxu1 %v6328_v48 }
 0x424   :  { %4563 = vmatpush1.bf16.msra.mxu0 %v6323_v28  ;;  %4689 = vmatpush1.bf16.msra.mxu1 %v6326_v15 }
 0x425   :  { %4564 = vmatprep.subr.bf16.mxu0 %v6331_v56  ;;  %4690 = vmatprep.subr.bf16.mxu1 %v6334_v45 }
 0x428   :  { %4565 = vmatpush1.bf16.msra.mxu0 %v6329_v60  ;;  %4691 = vmatpush1.bf16.msra.mxu1 %v6332_v63 }
 0x429   :  { %4566 = vmatprep.subr.bf16.mxu0 %v6337_v0  ;;  %4692 = vmatprep.subr.bf16.mxu1 %v6340_v31 }
 0x42c   :  { %4567 = vmatpush1.bf16.msra.mxu0 %v6335_v1  ;;  %4693 = vmatpush1.bf16.msra.mxu1 %v6338_v2 }
 0x42d   :  { %4568 = vmatprep.subr.bf16.mxu0 %v6343_v57  ;;  %4694 = vmatprep.subr.bf16.mxu1 %v6346_v46 }
 0x430   :  { %4569 = vmatpush1.bf16.msra.mxu0 %v6341_v58  ;;  %4695 = vmatpush1.bf16.msra.mxu1 %v6344_v17 }
 0x433   :  { %4571 = vmatmul.mubr.bf16.vlgmr.msra.gmra.mrb[36].mxu0 %v6859_v43  ;;  %4697 = vmatmul.mubr.bf16.vlgmr.msra.gmra.mrb[36].mxu1 %v6859_v43  ;;  %v6923_v43 = vrot.slane %v3813_v10, %v6658_v19 }
 0x434   :  { %4580 = vmatprep.mubr.bf16.mxu0 %v6899_v25  ;;  %4706 = vmatprep.mubr.bf16.mxu1 %v6899_v25 }
 0x43b   :  { %4581 = vmatmul.mubr.bf16.gmra.mrb[40].mxu0 %v6903_v8  ;;  %4707 = vmatmul.mubr.bf16.gmra.mrb[40].mxu1 %v6903_v8 }
 0x43c   :  { %4590 = vmatprep.mubr.bf16.mxu0 %v6907_v51  ;;  %4716 = vmatprep.mubr.bf16.mxu1 %v6907_v51 }
 0x443   :  { %4591 = vmatmul.mubr.bf16.gmra.mrb[44].mxu0 %v6905_v47  ;;  %4717 = vmatmul.mubr.bf16.gmra.mrb[44].mxu1 %v6905_v47 }
 0x506   :  { %v4572_v38 = vpop.f32.mrb[36].mxu0  ;;  %v4698_v23 = vpop.f32.mrb[36].mxu1 }
 0x507   :  { %v5449_v3 = vadd.f32 %v4572_v38, %v6920_v37  ;;  %v5461_v35 = vadd.f32 %v4698_v23, %v6923_v43  ;;  %v4574_v25 = vpop.f32.mrb[37].mxu0  ;;  %v4700_v8 = vpop.f32.mrb[37].mxu1 }
 0x508   :  { %v5450_v18 = vadd.f32 %v4574_v25, %v6926_v11  ;;  %v5462_v47 = vadd.f32 %v4700_v8, %v6929_v24  ;;  %v4576_v19 = vpop.f32.mrb[38].mxu0  ;;  %v4702_v44 = vpop.f32.mrb[38].mxu1 }
 0x509   :  { %vm4727_vm8 = vcmp.ge.f32.partialorder %v5449_v3, 0.0  ;;  %v4751_v22 = vmul.f32 0.2, %v5449_v3  ;;  %vm4729_vm9 = vcmp.ge.f32.partialorder %v5461_v35, 0.0  ;;  %v4753_v32 = vmul.f32 0.2, %v5461_v35 }
 0x50a   :  { %vm4728_vm10 = vcmp.ge.f32.partialorder %v5450_v18, 0.0  ;;  %v4752_v26 = vmul.f32 0.2, %v5450_v18  ;;  %vm4730_vm11 = vcmp.ge.f32.partialorder %v5462_v47, 0.0  ;;  %v4754_v4 = vmul.f32 0.2, %v5462_v47 }
 0x50b   :  { %v4775_v51 = vsel %vm4727_vm8, %v5449_v3, %v4751_v22  ;;  %v4777_v5 = vsel %vm4729_vm9, %v5461_v35, %v4753_v32  ;;  %v5451_v61 = vadd.f32 %v4576_v19, %v6920_v37  ;;  %v5463_v9 = vadd.f32 %v4702_v44, %v6923_v43  ;;  %v4578_v16 = vpop.f32.mrb[39].mxu0  ;;  %v4704_v12 = vpop.f32.mrb[39].mxu1 }
 0x50c   :  { %v4799_v33 = vmul.f32 1.4142135, %v4775_v51  ;;  %v4801_v49 = vmul.f32 1.4142135, %v4777_v5  ;;  %v4776_v13 = vsel %vm4728_vm10, %v5450_v18, %v4752_v26  ;;  %v4778_v14 = vsel %vm4730_vm11, %v5462_v47, %v4754_v4 }
 0x50d   :  { %v4800_v20 = vmul.f32 1.4142135, %v4776_v13  ;;  %v4802_v21 = vmul.f32 1.4142135, %v4778_v14  ;;  %vm4731_vm12 = vcmp.ge.f32.partialorder %v5451_v61, 0.0  ;;  %vm4733_vm13 = vcmp.ge.f32.partialorder %v5463_v9, 0.0 }
 0x50e   :  { %4823 = vst [vmem:[#allocation8] sm:$0xff] %v4799_v33  ;;  %4825 = vst [vmem:[#allocation8 + $0x10] sm:$0xff] %v4801_v49  ;;  %v4755_v27 = vmul.f32 0.2, %v5451_v61  ;;  %v4757_v29 = vmul.f32 0.2, %v5463_v9  ;;  %v5452_v30 = vadd.f32 %v4578_v16, %v6926_v11  ;;  %v5464_v6 = vadd.f32 %v4704_v12, %v6929_v24 }
 0x50f   :  { %v4582_v7 = vpop.f32.mrb[40].mxu0  ;;  %v4708_v36 = vpop.f32.mrb[40].mxu1  ;;  %4824 = vst [vmem:[#allocation8 + $0x8] sm:$0xff] %v4800_v20  ;;  %4826 = vst [vmem:[#allocation8 + $0x18] sm:$0xff] %v4802_v21 }
 0x510   :  { %v5453_v40 = vadd.f32 %v4582_v7, %v6920_v37  ;;  %v5465_v59 = vadd.f32 %v4708_v36, %v6923_v43  ;;  %v4584_v62 = vpop.f32.mrb[41].mxu0  ;;  %v4710_v50 = vpop.f32.mrb[41].mxu1  ;;  %v4779_v42 = vsel %vm4731_vm12, %v5451_v61, %v4755_v27  ;;  %v4781_v52 = vsel %vm4733_vm13, %v5463_v9, %v4757_v29 }
 0x511   :  { %vm4732_vm14 = vcmp.ge.f32.partialorder %v5452_v30, 0.0  ;;  %v4756_v53 = vmul.f32 0.2, %v5452_v30  ;;  %v4586_v54 = vpop.f32.mrb[42].mxu0  ;;  %v4712_v41 = vpop.f32.mrb[42].mxu1  ;;  %vm4734_vm15 = vcmp.ge.f32.partialorder %v5464_v6, 0.0  ;;  %v5454_v60 = vadd.f32 %v4584_v62, %v6926_v11 }
 0x512   :  { %v4803_v39 = vmul.f32 1.4142135, %v4779_v42  ;;  %v4805_v34 = vmul.f32 1.4142135, %v4781_v52  ;;  %vm4735_vm0 = vcmp.ge.f32.partialorder %v5453_v40, 0.0  ;;  %vm4737_vm1 = vcmp.ge.f32.partialorder %v5465_v59, 0.0 }
 0x513   :  { %v4780_v55 = vsel %vm4732_vm14, %v5452_v30, %v4756_v53  ;;  %v4758_v48 = vmul.f32 0.2, %v5464_v6  ;;  %v4759_v28 = vmul.f32 0.2, %v5453_v40  ;;  %v4588_v15 = vpop.f32.mrb[43].mxu0  ;;  %v5466_v63 = vadd.f32 %v4710_v50, %v6929_v24  ;;  %v4714_v0 = vpop.f32.mrb[43].mxu1 }
 0x514   :  { %4827 = vst [vmem:[#allocation8 + $0x20] sm:$0xff] %v4803_v39  ;;  %4829 = vst [vmem:[#allocation8 + $0x30] sm:$0xff] %v4805_v34  ;;  %v4804_v56 = vmul.f32 1.4142135, %v4780_v55  ;;  %v4761_v45 = vmul.f32 0.2, %v5465_v59  ;;  %v5455_v2 = vadd.f32 %v4586_v54, %v6920_v37  ;;  %v5467_v57 = vadd.f32 %v4712_v41, %v6923_v43 }
 0x515   :  { %v4782_v31 = vsel %vm4734_vm15, %v5464_v6, %v4758_v48  ;;  %v4783_v1 = vsel %vm4735_vm0, %v5453_v40, %v4759_v28  ;;  %vm4736_vm2 = vcmp.ge.f32.partialorder %v5454_v60, 0.0  ;;  %v4760_v38 = vmul.f32 0.2, %v5454_v60 }
 0x516   :  { %4828 = vst [vmem:[#allocation8 + $0x28] sm:$0xff] %v4804_v56  ;;  %v4806_v46 = vmul.f32 1.4142135, %v4782_v31  ;;  %v4807_v58 = vmul.f32 1.4142135, %v4783_v1  ;;  %v4785_v17 = vsel %vm4737_vm1, %v5465_v59, %v4761_v45  ;;  %vm4738_vm3 = vcmp.ge.f32.partialorder %v5466_v63, 0.0 }
 0x517   :  { %v4809_v10 = vmul.f32 1.4142135, %v4785_v17  ;;  %vm4739_vm4 = vcmp.ge.f32.partialorder %v5455_v2, 0.0  ;;  %v4762_v23 = vmul.f32 0.2, %v5466_v63  ;;  %vm4741_vm5 = vcmp.ge.f32.partialorder %v5467_v57, 0.0 }
 0x518   :  { %4830 = vst [vmem:[#allocation8 + $0x38] sm:$0xff] %v4806_v46  ;;  %4831 = vst [vmem:[#allocation8 + $0x40] sm:$0xff] %v4807_v58  ;;  %v4763_v3 = vmul.f32 0.2, %v5455_v2  ;;  %v5456_v35 = vadd.f32 %v4588_v15, %v6926_v11  ;;  %v4592_v25 = vpop.f32.mrb[44].mxu0  ;;  %v4784_v8 = vsel %vm4736_vm2, %v5454_v60, %v4760_v38  ;;  %v5468_v47 = vadd.f32 %v4714_v0, %v6929_v24  ;;  %v4718_v44 = vpop.f32.mrb[44].mxu1 }
 0x519   :  { %4833 = vst [vmem:[#allocation8 + $0x50] sm:$0xff] %v4809_v10  ;;  %v4765_v18 = vmul.f32 0.2, %v5467_v57  ;;  %v5457_v19 = vadd.f32 %v4592_v25, %v6920_v37  ;;  %v4594_v22 = vpop.f32.mrb[45].mxu0  ;;  %v4808_v32 = vmul.f32 1.4142135, %v4784_v8  ;;  %v4786_v26 = vsel %vm4738_vm3, %v5466_v63, %v4762_v23 }
 0x51a   :  { %v4787_v4 = vsel %vm4739_vm4, %v5455_v2, %v4763_v3  ;;  %vm4740_vm6 = vcmp.ge.f32.partialorder %v5456_v35, 0.0  ;;  %v4720_v51 = vpop.f32.mrb[45].mxu1  ;;  %v4596_v5 = vpop.f32.mrb[46].mxu0  ;;  %v4810_v61 = vmul.f32 1.4142135, %v4786_v26  ;;  %vm4742_vm7 = vcmp.ge.f32.partialorder %v5468_v47, 0.0 }
 0x51b   :  { %v4811_v9 = vmul.f32 1.4142135, %v4787_v4  ;;  %v4789_v16 = vsel %vm4741_vm5, %v5467_v57, %v4765_v18  ;;  %v4764_v12 = vmul.f32 0.2, %v5456_v35  ;;  %4832 = vst [vmem:[#allocation8 + $0x48] sm:$0xff] %v4808_v32  ;;  %vm4743_vm8 = vcmp.ge.f32.partialorder %v5457_v19, 0.0 }
 0x51c   :  { %v4813_v33 = vmul.f32 1.4142135, %v4789_v16  ;;  %v4766_v49 = vmul.f32 0.2, %v5468_v47  ;;  %4834 = vst [vmem:[#allocation8 + $0x58] sm:$0xff] %v4810_v61  ;;  %v5469_v20 = vadd.f32 %v4718_v44, %v6923_v43  ;;  %v5458_v21 = vadd.f32 %v4594_v22, %v6926_v11  ;;  %v4722_v27 = vpop.f32.mrb[46].mxu1 }
 0x51d   :  { %4835 = vst [vmem:[#allocation8 + $0x60] sm:$0xff] %v4811_v9  ;;  %v4788_v13 = vsel %vm4740_vm6, %v5456_v35, %v4764_v12  ;;  %v4767_v14 = vmul.f32 0.2, %v5457_v19  ;;  %v4598_v29 = vpop.f32.mrb[47].mxu0  ;;  %v5470_v7 = vadd.f32 %v4720_v51, %v6929_v24  ;;  %v5459_v36 = vadd.f32 %v4596_v5, %v6920_v37  ;;  %v4724_v40 = vpop.f32.mrb[47].mxu1 }
 0x51e   :  { %4837 = vst [vmem:[#allocation8 + $0x70] sm:$0xff] %v4813_v33  ;;  %v4812_v30 = vmul.f32 1.4142135, %v4788_v13  ;;  %v4790_v6 = vsel %vm4742_vm7, %v5468_v47, %v4766_v49  ;;  %vm4745_vm9 = vcmp.ge.f32.partialorder %v5469_v20, 0.0  ;;  %v4769_v50 = vmul.f32 0.2, %v5469_v20 }
 0x51f   :  { %v4814_v59 = vmul.f32 1.4142135, %v4790_v6  ;;  %v4791_v62 = vsel %vm4743_vm8, %v5457_v19, %v4767_v14  ;;  %vm4744_vm10 = vcmp.ge.f32.partialorder %v5458_v21, 0.0  ;;  %v4768_v52 = vmul.f32 0.2, %v5458_v21 }
 0x520   :  { %4836 = vst [vmem:[#allocation8 + $0x68] sm:$0xff] %v4812_v30  ;;  %v4815_v42 = vmul.f32 1.4142135, %v4791_v62  ;;  %vm4746_vm11 = vcmp.ge.f32.partialorder %v5470_v7, 0.0  ;;  %v4793_v53 = vsel %vm4745_vm9, %v5469_v20, %v4769_v50  ;;  %v4770_v54 = vmul.f32 0.2, %v5470_v7 }
 0x521   :  { %4838 = vst [vmem:[#allocation8 + $0x78] sm:$0xff] %v4814_v59  ;;  %vm4747_vm12 = vcmp.ge.f32.partialorder %v5459_v36, 0.0  ;;  %v4771_v41 = vmul.f32 0.2, %v5459_v36  ;;  %v4817_v39 = vmul.f32 1.4142135, %v4793_v53  ;;  %v4792_v34 = vsel %vm4744_vm10, %v5458_v21, %v4768_v52 }
 0x522   :  { %4839 = vst [vmem:[#allocation8 + $0x80] sm:$0xff] %v4815_v42  ;;  %v5471_v37 = vadd.f32 %v4722_v27, %v6923_v43  ;;  %v5460_v55 = vadd.f32 %v4598_v29, %v6926_v11  ;;  %v4816_v48 = vmul.f32 1.4142135, %v4792_v34  ;;  %v4794_v28 = vsel %vm4746_vm11, %v5470_v7, %v4770_v54 }
 0x523   :  { %v4795_v15 = vsel %vm4747_vm12, %v5459_v36, %v4771_v41  ;;  %v5472_v56 = vadd.f32 %v4724_v40, %v6929_v24  ;;  %4841 = vst [vmem:[#allocation8 + $0x90] sm:$0xff] %v4817_v39  ;;  %v4818_v45 = vmul.f32 1.4142135, %v4794_v28 }
 0x524   :  { %v4819_v60 = vmul.f32 1.4142135, %v4795_v15  ;;  %vm4749_vm13 = vcmp.ge.f32.partialorder %v5471_v37, 0.0  ;;  %vm4748_vm14 = vcmp.ge.f32.partialorder %v5460_v55, 0.0  ;;  %4840 = vst [vmem:[#allocation8 + $0x88] sm:$0xff] %v4816_v48 }
 0x525   :  { %v4773_v63 = vmul.f32 0.2, %v5471_v37  ;;  %v4772_v0 = vmul.f32 0.2, %v5460_v55  ;;  %vm4750_vm15 = vcmp.ge.f32.partialorder %v5472_v56, 0.0  ;;  %4842 = vst [vmem:[#allocation8 + $0x98] sm:$0xff] %v4818_v45 }
 0x526   :  { %4843 = vst [vmem:[#allocation8 + $0xa0] sm:$0xff] %v4819_v60  ;;  %v4774_v31 = vmul.f32 0.2, %v5472_v56 }
 0x527   :  { %v4797_v43 = vsel %vm4749_vm13, %v5471_v37, %v4773_v63  ;;  %v4796_v11 = vsel %vm4748_vm14, %v5460_v55, %v4772_v0 }
 0x528   :  { %v4821_v1 = vmul.f32 1.4142135, %v4797_v43  ;;  %v4820_v2 = vmul.f32 1.4142135, %v4796_v11  ;;  %v4798_v57 = vsel %vm4750_vm15, %v5472_v56, %v4774_v31 }
 0x529   :  { %v4822_v24 = vmul.f32 1.4142135, %v4798_v57 }
 0x52a   :  { %4845 = vst [vmem:[#allocation8 + $0xb0] sm:$0xff] %v4821_v1  ;;  %4844 = vst [vmem:[#allocation8 + $0xa8] sm:$0xff] %v4820_v2 }
 0x52b   :  { %4846 = vst [vmem:[#allocation8 + $0xb8] sm:$0xff] %v4822_v24 }
 0x52c   :  { %6440 = shalt.err (!%p6437_p0)
}
 0x52d   :  { %s6441_s29 = scalar_lea.hbm %s6980_s3, 3072 }
 0x52e   :  { %p6442_p1 = scmp.ne.s32.totalorder %s6980_s3, %s6441_s29  ;;  %p6445_p2 = scmp.lt.u32.totalorder %s6441_s29, %s6980_s3 }
 0x530   :  { %p6447_p3 = pnand %p6445_p2, %p6442_p1 }
 0x532   :  { %6450 = shalt.err (!%p6447_p3)
}
 0x533   :  { %4858 = dma.vmem_to_hbm [thread:$0]  %s4853_s25, 3072, %s6980_s3, [#allocation4], %s6461_s1, %s6461_s1, %s6462_s9  }
 0x534   :  { %6455 = dma.done.wait [#allocation4], 3072  }
 0x535   :  { %6456 = vsyncadd [#allocation4], 4294964224 }
 0x536   :  { %4862 = vsyncpa [#allocation3], 1 }
 0x537   :  { %4863 = vsyncpa [#allocation6], 1 }
 0x538   :  { %4864 = vsyncpa [#allocation4], 1 }

</bundles_post_ra>
